<compile_context>
chip_gen: v6e
topology: v6e:2x2x1
jax: 0.10.0
libtpu: 0.0.40
codegen_flags: <defaults>
</compile_context>

<pallas_src>
import jax
import jax.numpy as jnp
from jax.experimental import pallas as pl
from jax.experimental.pallas import tpu as pltpu

_HIGHEST = jax.lax.Precision.HIGHEST


def _round_up(x, m):
    return (x + m - 1) // m * m


def _budgets():
    """Per-generation (input-block byte budget, vmem_limit_bytes)."""
    try:
        kind = jax.devices()[0].device_kind.lower()
    except Exception:
        kind = ""
    if "v7" in kind or "7x" in kind:
        # v7x: 64 MiB physical VMEM -> 2x in-block + 2x out-block + weights must fit.
        return 6 << 20, 48 << 20
    # v5e / v6e: 128 MiB physical VMEM.
    return 8 << 20, 64 << 20


def _const_spec(shape, index_map):
    """Full-array BlockSpec for grid-invariant operands; single-buffered if supported."""
    buffered = getattr(pl, "Buffered", None)
    if buffered is not None:
        try:
            return pl.BlockSpec(shape, index_map, pipeline_mode=buffered(1))
        except TypeError:
            pass
    return pl.BlockSpec(shape, index_map)


# ---------------------------------------------------------------------------
# Kernels
# ---------------------------------------------------------------------------
def _conv_down_kernel(xm_ref, xh_ref, w01_ref, w2_ref, b_ref, o_ref):
    """Stride-2 3x3 conv on one (batch, output-row-tile) block.

    xm_ref : (1, THo, 2, WP, 2C)  row-pair-major input tile
    xh_ref : (1, 1,   2, WP, 2C)  halo: the row pair just below the tile (for kh=2)
    w01_ref: (3, 2C, Cout)        taps (kh, kw=0) and (kh, kw=1) fused along K
    w2_ref : (3, C,  Cout)        taps (kh, kw=2)
    b_ref  : (1, Cout)            float32 bias
    o_ref  : (1, THo, WP, Cout)   full-width rows (garbage columns cropped by wrapper)
    """
    _, THo, WP, Cout = o_ref.shape
    two_c = xm_ref.shape[-1]
    C = two_c // 2
    M = THo * WP

    h0 = xm_ref[0, :, 0]                       # rows 2*ho     (kh = 0)
    h1 = xm_ref[0, :, 1]                       # rows 2*ho + 1 (kh = 1)
    halo0 = xh_ref[0, :, 0]                    # (1, WP, 2C): pair below the tile
    if THo > 1:                                # rows 2*ho + 2 (kh = 2)
        h2 = jnp.concatenate([h0[1:], halo0], axis=0)
    else:
        h2 = halo0

    acc = jnp.zeros((M, Cout), jnp.float32)
    for kh, hk in enumerate((h0, h1, h2)):
        # kw=0 / kw=1 live in lanes [0,C) / [C,2C) of the same W pair: one K=2C dot.
        # The reshape is free because WP is a multiple of 8 (aligned sublane extent).
        p01 = hk.reshape(M, two_c)
        acc = acc + jnp.dot(p01, w01_ref[kh],
                            preferred_element_type=jnp.float32, precision=_HIGHEST)
        # kw=2 = lanes [0,C) of the *next* W pair: XLU sublane roll + aligned lane slice
        # (the wrapped last column is never a kept output column since WP >= Wo+1).
        hs = pltpu.roll(hk, shift=WP - 1, axis=1)          # hs[wo] = hk[(wo+1) % WP]
        p2 = hs[:, :, :C].reshape(M, C)
        acc = acc + jnp.dot(p2, w2_ref[kh],
                            preferred_element_type=jnp.float32, precision=_HIGHEST)

    acc = acc + b_ref[...]
    o_ref[0] = acc.reshape(THo, WP, Cout).astype(o_ref.dtype)


def _avgpool_kernel(x_ref, s_ref, o_ref):
    """2x2 / stride-2 average pool, NCHW-native.

    x_ref: (TB, 2W)  one row per (n, c, ho); lanes = [input row 2ho | input row 2ho+1]
    s_ref: (W, Wo)   0.25 selection matrix: column-pair sum + stride-2 lane compaction
    o_ref: (TB, Wo)
    """
    W = s_ref.shape[0]
    x = x_ref[...]
    s = x[:, :W].astype(jnp.float32) + x[:, W:2 * W].astype(jnp.float32)
    o_ref[...] = jnp.dot(s, s_ref[...], preferred_element_type=jnp.float32,
                         precision=_HIGHEST).astype(o_ref.dtype)


# ---------------------------------------------------------------------------
# Wrappers (layout plumbing + tiling decisions)
# ---------------------------------------------------------------------------
@jax.jit
def downsample_conv(x_nchw, weight, bias):
    """x_nchw: (N, C, H, W); weight: (Cout, Cin, 3, 3) torch layout; bias: (Cout,)."""
    N, C, H, W = x_nchw.shape
    Cout = weight.shape[0]
    dtype = x_nchw.dtype
    itemsize = jnp.dtype(dtype).itemsize
    blk_budget, vmem_limit = _budgets()

    # torch: F.pad(x, (0,1,0,1)) then Conv2d(k=3, stride=2, padding=0)
    Ho = (H - 2) // 2 + 1
    Wo = (W - 2) // 2 + 1

    # W-pair extent: multiple of 8 (free in-kernel reshapes, unmasked full-width
    # stores) and >= Wo+1 so the kw=2 roll never wraps into a kept column.
    WP = _round_up(Wo + 1, 8)

    # Output-row tile: ~2k matmul rows / per-generation input-block byte budget
    # (amortizes the ~0.35us grid-step overhead; fits VMEM with double buffering).
    blk_row_bytes = 2 * WP * 2 * C * itemsize
    THo = max(1, min(Ho, max(1, 2048 // WP), max(1, blk_budget // blk_row_bytes)))
    if N == 1:
        THo = min(THo, max(1, pl.cdiv(Ho, 2)))   # >=2 grid steps for dual-TC v7x
    nT = pl.cdiv(Ho, THo)
    Ho_e = nT * THo

    # Single HBM relayout: NCHW -> NHWC with fused zero padding (covers torch's
    # (0,1,0,1) pad plus alignment padding never read by any kept output).
    H_e = 2 * Ho_e + 2
    Wp_e = 2 * WP
    HP = H_e // 2
    assert HP == Ho_e + 1, "halo BlockSpec relies on exactly one extra row pair"
    x = jnp.transpose(x_nchw, (0, 2, 3, 1))
    x = jnp.pad(x, ((0, 0), (0, H_e - H), (0, Wp_e - W), (0, 0)))
    # Free (bitcast) reshape: (row pair, row phase) split; W-phase pair on lanes (2C).
    xr = x.reshape(N, HP, 2, WP, 2 * C)

    # Weights in the activation dtype (native bf16 MXU path when x is bf16); bias f32.
    w = jnp.transpose(weight, (2, 3, 1, 0)).astype(dtype)       # (kh, kw, Cin, Cout)
    w01 = jnp.concatenate([w[:, 0], w[:, 1]], axis=1)           # (3, 2C, Cout)
    w2 = w[:, 2]                                                # (3, C,  Cout)
    b = bias.reshape(1, Cout).astype(jnp.float32)

    flops = 2 * 9 * C * Cout * N * Ho_e * WP
    bytes_accessed = (xr.size * itemsize + N * Ho_e * WP * Cout * itemsize
                      + (w01.size + w2.size) * itemsize + b.size * 4)

    out = pl.pallas_call(
        _conv_down_kernel,
        out_shape=jax.ShapeDtypeStruct((N, Ho_e, WP, Cout), dtype),
        grid=(N, nT),
        in_specs=[
            pl.BlockSpec((1, THo, 2, WP, 2 * C), lambda n, t: (n, t, 0, 0, 0)),
            pl.BlockSpec((1, 1, 2, WP, 2 * C),
                         lambda n, t: (n, (t + 1) * THo, 0, 0, 0)),     # halo pair
            _const_spec((3, 2 * C, Cout), lambda n, t: (0, 0, 0)),
            _const_spec((3, C, Cout), lambda n, t: (0, 0, 0)),
            _const_spec((1, Cout), lambda n, t: (0, 0)),
        ],
        out_specs=pl.BlockSpec((1, THo, WP, Cout), lambda n, t: (n, t, 0, 0)),
        compiler_params=pltpu.CompilerParams(
            dimension_semantics=("parallel", "parallel"),
            vmem_limit_bytes=vmem_limit),
        cost_estimate=pl.CostEstimate(flops=flops, transcendentals=0,
                                      bytes_accessed=bytes_accessed),
    )(xr, xr, w01, w2, b)

    # TODO(synk): the NCHW->NHWC input relayout and the NHWC->NCHW output transpose
    # below remain plain-XLA HBM passes; folding the output side needs an in-kernel
    # (M,Cout)->(Cout,THo,WP) transpose, skipped here because it is fragile for small
    # Cout.  Lane-dense (Wo*Cout) stores for Cout<128 are likewise left to future work.
    return jnp.transpose(out[:, :Ho, :Wo, :], (0, 3, 1, 2))


@jax.jit
def downsample_avgpool(x_nchw):
    N, C, H, W = x_nchw.shape
    dtype = x_nchw.dtype
    itemsize = jnp.dtype(dtype).itemsize
    blk_budget, vmem_limit = _budgets()
    Ho, Wo = H // 2, W // 2

    x = x_nchw
    if H != 2 * Ho:                       # odd H: torch drops the last row
        x = x[:, :, :2 * Ho, :]
    R = N * C * Ho
    x2 = x.reshape(R, 2 * W)              # free reshape: stays NCHW in HBM, no transpose

    # Column-pair sum + stride-2 compaction + 0.25 scale as one small MXU matmul:
    # S[w, wo] = 0.25 for w in {2wo, 2wo+1}; an odd trailing column is never selected.
    wi = jnp.arange(W)[:, None]
    wo_idx = jnp.arange(Wo)[None, :]
    S = (wi // 2 == wo_idx).astype(jnp.float32) * jnp.float32(0.25)

    # Row tile: per-generation byte budget, multiple of 8, >=2 grid steps when possible.
    TB = max(8, (blk_budget // max(2 * W * itemsize, 1)) // 8 * 8)
    TB = min(TB, _round_up(max(R, 1), 8))
    TB = min(TB, max(8, _round_up(pl.cdiv(max(R, 1), 2), 8)))
    nb = pl.cdiv(max(R, 1), TB)

    flops = R * W + 2 * R * W * Wo
    bytes_accessed = R * 2 * W * itemsize + R * Wo * itemsize + S.size * 4

    out2 = pl.pallas_call(
        _avgpool_kernel,
        out_shape=jax.ShapeDtypeStruct((R, Wo), dtype),
        grid=(nb,),
        in_specs=[
            pl.BlockSpec((TB, 2 * W), lambda i: (i, 0)),
            _const_spec((W, Wo), lambda i: (0, 0)),
        ],
        out_specs=pl.BlockSpec((TB, Wo), lambda i: (i, 0)),
        compiler_params=pltpu.CompilerParams(
            dimension_semantics=("parallel",),
            vmem_limit_bytes=vmem_limit),
        cost_estimate=pl.CostEstimate(flops=flops, transcendentals=0,
                                      bytes_accessed=bytes_accessed),
    )(x2, S)

    return out2.reshape(N, C, Ho, Wo)


class Downsample:
    """Mirror of the PyTorch module, parameters initialized deterministically."""

    def __init__(self, in_channels, with_conv, key):
        self.with_conv = with_conv
        if with_conv:
            k1, k2 = jax.random.split(key)
            fan_in = in_channels * 3 * 3
            bound = 1.0 / (fan_in ** 0.5)
            self.weight = jax.random.uniform(
                k1, (in_channels, in_channels, 3, 3), jnp.float32, -bound, bound)
            self.bias = jax.random.uniform(
                k2, (in_channels,), jnp.float32, -bound, bound)

    def __call__(self, x_nchw):
        if self.with_conv:
            return downsample_conv(x_nchw, self.weight, self.bias)
        return downsample_avgpool(x_nchw)


# ---------------------------------------------------------------------------
# Pure-JAX references for correctness checking
# ---------------------------------------------------------------------------
def _ref_conv(x_nchw, weight, bias):
    xpad = jnp.pad(x_nchw, ((0, 0), (0, 0), (0, 1), (0, 1)))
    out = jax.lax.conv_general_dilated(
        xpad, weight, window_strides=(2, 2), padding="VALID",
        dimension_numbers=("NCHW", "OIHW", "NCHW"), precision=_HIGHEST)
    return out + bias.reshape(1, -1, 1, 1)


def _ref_avgpool(x_nchw):
    N, C, H, W = x_nchw.shape
    return x_nchw.reshape(N, C, H // 2, 2, W // 2, 2).mean(axis=(3, 5))


if __name__ == "__main__":
    key = jax.random.PRNGKey(0)
    kx, kp = jax.random.split(key)

    N, C, H, W = 2, 4, 16, 16
    x = jax.random.normal(kx, (N, C, H, W), jnp.float32)

    # with_conv = True path
    mod_conv = Downsample(C, with_conv=True, key=kp)
    y_conv = jax.block_until_ready(mod_conv(x))
    y_conv_ref = _ref_conv(x, mod_conv.weight, mod_conv.bias)
    assert y_conv.shape == (N, C, 8, 8), y_conv.shape
    assert jnp.allclose(y_conv, y_conv_ref, atol=1e-4, rtol=1e-4), "conv path mismatch"

    # with_conv = False path
    mod_pool = Downsample(C, with_conv=False, key=kp)
    y_pool = jax.block_until_ready(mod_pool(x))
    y_pool_ref = _ref_avgpool(x)
    assert y_pool.shape == (N, C, 8, 8), y_pool.shape
    assert jnp.allclose(y_pool, y_pool_ref, atol=1e-5, rtol=1e-5), "avgpool path mismatch"

    print("KERNEL_OK")
</pallas_src>

<mosaic_0001>
module attributes {stable_mosaic.version = 11 : i64} {
  func.func @_conv_down_kernel(%arg0: i32, %arg1: i32, %arg2: memref<1x8x2x16x8xf32, #tpu.memory_space<vmem>>, %arg3: memref<1x1x2x16x8xf32, #tpu.memory_space<vmem>>, %arg4: memref<3x8x4xf32, #tpu.memory_space<vmem>>, %arg5: memref<3x4x4xf32, #tpu.memory_space<vmem>>, %arg6: memref<1x4xf32, #tpu.memory_space<vmem>>, %arg7: memref<1x8x16x4xf32, #tpu.memory_space<vmem>>) attributes {dimension_semantics = [#tpu.dimension_semantics<parallel>, #tpu.dimension_semantics<parallel>], iteration_bounds = array<i64: 2, 1>, scalar_prefetch = 0 : i64, scratch_operands = 0 : i64, tpu.core_type = #tpu.core_type<tc>, window_params = [{transform_indices = @transform_0, window_bounds = array<i64: 1, 8, 2, 16, 8>}, {transform_indices = @transform_1, window_bounds = array<i64: 1, 1, 2, 16, 8>}, {pipeline_mode = #tpu.pipeline_mode<synchronous>, transform_indices = @transform_2, window_bounds = array<i64: 3, 8, 4>}, {pipeline_mode = #tpu.pipeline_mode<synchronous>, transform_indices = @transform_3, window_bounds = array<i64: 3, 4, 4>}, {pipeline_mode = #tpu.pipeline_mode<synchronous>, transform_indices = @transform_4, window_bounds = array<i64: 1, 4>}, {transform_indices = @transform_5, window_bounds = array<i64: 1, 8, 16, 4>}]} {
    %c0 = arith.constant 0 : index
    %c0_0 = arith.constant 0 : index
    %c0_1 = arith.constant 0 : index
    %c0_2 = arith.constant 0 : index
    %c0_3 = arith.constant 0 : index
    %0 = vector.load %arg2[%c0, %c0_0, %c0_1, %c0_2, %c0_3] : memref<1x8x2x16x8xf32, #tpu.memory_space<vmem>>, vector<1x8x1x16x8xf32>
    %1 = vector.shape_cast %0 : vector<1x8x1x16x8xf32> to vector<8x16x8xf32>
    %c0_4 = arith.constant 0 : index
    %c0_5 = arith.constant 0 : index
    %c1 = arith.constant 1 : index
    %c0_6 = arith.constant 0 : index
    %c0_7 = arith.constant 0 : index
    %2 = vector.load %arg2[%c0_4, %c0_5, %c1, %c0_6, %c0_7] : memref<1x8x2x16x8xf32, #tpu.memory_space<vmem>>, vector<1x8x1x16x8xf32>
    %3 = vector.shape_cast %2 : vector<1x8x1x16x8xf32> to vector<8x16x8xf32>
    %c0_8 = arith.constant 0 : index
    %c0_9 = arith.constant 0 : index
    %c0_10 = arith.constant 0 : index
    %c0_11 = arith.constant 0 : index
    %c0_12 = arith.constant 0 : index
    %4 = vector.load %arg3[%c0_8, %c0_9, %c0_10, %c0_11, %c0_12] : memref<1x1x2x16x8xf32, #tpu.memory_space<vmem>>, vector<1x1x1x16x8xf32>
    %5 = vector.shape_cast %4 : vector<1x1x1x16x8xf32> to vector<1x16x8xf32>
    %6 = vector.extract_strided_slice %1 {offsets = [1, 0, 0], sizes = [7, 16, 8], strides = [1, 1, 1]} : vector<8x16x8xf32> to vector<7x16x8xf32>
    %7 = tpu.concatenate %6, %5 in 0 : vector<7x16x8xf32>, vector<1x16x8xf32> -> vector<8x16x8xf32>
    %cst = arith.constant 0.000000e+00 : f32
    %8 = vector.broadcast %cst : f32 to vector<128x4xf32>
    %9 = vector.shape_cast %1 : vector<8x16x8xf32> to vector<128x8xf32>
    %c0_13 = arith.constant 0 : index
    %c0_14 = arith.constant 0 : index
    %c0_15 = arith.constant 0 : index
    %10 = vector.load %arg4[%c0_13, %c0_14, %c0_15] : memref<3x8x4xf32, #tpu.memory_space<vmem>>, vector<1x8x4xf32>
    %11 = vector.shape_cast %10 : vector<1x8x4xf32> to vector<8x4xf32>
    %cst_16 = arith.constant dense<0.000000e+00> : vector<128x4xf32>
    %12 = tpu.matmul %9, %11, %cst_16 {dimension_numbers = #tpu.dot_dimension_numbers<[1], [0], [0], [1], [0, 0, 1, 1], [], []>, precision = #tpu.contract_precision<fp32>} : vector<128x8xf32>, vector<8x4xf32>, vector<128x4xf32> -> vector<128x4xf32>
    %13 = arith.addf %8, %12 : vector<128x4xf32>
    %c15_i32 = arith.constant 15 : i32
    %14 = tpu.dynamic_rotate %1 by %c15_i32 dim 1 : vector<8x16x8xf32>, i32 -> vector<8x16x8xf32>
    %15 = vector.extract_strided_slice %14 {offsets = [0, 0, 0], sizes = [8, 16, 4], strides = [1, 1, 1]} : vector<8x16x8xf32> to vector<8x16x4xf32>
    %16 = vector.shape_cast %15 : vector<8x16x4xf32> to vector<128x4xf32>
    %c0_17 = arith.constant 0 : index
    %c0_18 = arith.constant 0 : index
    %c0_19 = arith.constant 0 : index
    %17 = vector.load %arg5[%c0_17, %c0_18, %c0_19] : memref<3x4x4xf32, #tpu.memory_space<vmem>>, vector<1x4x4xf32>
    %18 = vector.shape_cast %17 : vector<1x4x4xf32> to vector<4x4xf32>
    %cst_20 = arith.constant dense<0.000000e+00> : vector<128x4xf32>
    %19 = tpu.matmul %16, %18, %cst_20 {dimension_numbers = #tpu.dot_dimension_numbers<[1], [0], [0], [1], [0, 0, 1, 1], [], []>, precision = #tpu.contract_precision<fp32>} : vector<128x4xf32>, vector<4x4xf32>, vector<128x4xf32> -> vector<128x4xf32>
    %20 = arith.addf %13, %19 : vector<128x4xf32>
    %21 = vector.shape_cast %3 : vector<8x16x8xf32> to vector<128x8xf32>
    %c1_21 = arith.constant 1 : index
    %c0_22 = arith.constant 0 : index
    %c0_23 = arith.constant 0 : index
    %22 = vector.load %arg4[%c1_21, %c0_22, %c0_23] : memref<3x8x4xf32, #tpu.memory_space<vmem>>, vector<1x8x4xf32>
    %23 = vector.shape_cast %22 : vector<1x8x4xf32> to vector<8x4xf32>
    %cst_24 = arith.constant dense<0.000000e+00> : vector<128x4xf32>
    %24 = tpu.matmul %21, %23, %cst_24 {dimension_numbers = #tpu.dot_dimension_numbers<[1], [0], [0], [1], [0, 0, 1, 1], [], []>, precision = #tpu.contract_precision<fp32>} : vector<128x8xf32>, vector<8x4xf32>, vector<128x4xf32> -> vector<128x4xf32>
    %25 = arith.addf %20, %24 : vector<128x4xf32>
    %c15_i32_25 = arith.constant 15 : i32
    %26 = tpu.dynamic_rotate %3 by %c15_i32_25 dim 1 : vector<8x16x8xf32>, i32 -> vector<8x16x8xf32>
    %27 = vector.extract_strided_slice %26 {offsets = [0, 0, 0], sizes = [8, 16, 4], strides = [1, 1, 1]} : vector<8x16x8xf32> to vector<8x16x4xf32>
    %28 = vector.shape_cast %27 : vector<8x16x4xf32> to vector<128x4xf32>
    %c1_26 = arith.constant 1 : index
    %c0_27 = arith.constant 0 : index
    %c0_28 = arith.constant 0 : index
    %29 = vector.load %arg5[%c1_26, %c0_27, %c0_28] : memref<3x4x4xf32, #tpu.memory_space<vmem>>, vector<1x4x4xf32>
    %30 = vector.shape_cast %29 : vector<1x4x4xf32> to vector<4x4xf32>
    %cst_29 = arith.constant dense<0.000000e+00> : vector<128x4xf32>
    %31 = tpu.matmul %28, %30, %cst_29 {dimension_numbers = #tpu.dot_dimension_numbers<[1], [0], [0], [1], [0, 0, 1, 1], [], []>, precision = #tpu.contract_precision<fp32>} : vector<128x4xf32>, vector<4x4xf32>, vector<128x4xf32> -> vector<128x4xf32>
    %32 = arith.addf %25, %31 : vector<128x4xf32>
    %33 = vector.shape_cast %7 : vector<8x16x8xf32> to vector<128x8xf32>
    %c2 = arith.constant 2 : index
    %c0_30 = arith.constant 0 : index
    %c0_31 = arith.constant 0 : index
    %34 = vector.load %arg4[%c2, %c0_30, %c0_31] : memref<3x8x4xf32, #tpu.memory_space<vmem>>, vector<1x8x4xf32>
    %35 = vector.shape_cast %34 : vector<1x8x4xf32> to vector<8x4xf32>
    %cst_32 = arith.constant dense<0.000000e+00> : vector<128x4xf32>
    %36 = tpu.matmul %33, %35, %cst_32 {dimension_numbers = #tpu.dot_dimension_numbers<[1], [0], [0], [1], [0, 0, 1, 1], [], []>, precision = #tpu.contract_precision<fp32>} : vector<128x8xf32>, vector<8x4xf32>, vector<128x4xf32> -> vector<128x4xf32>
    %37 = arith.addf %32, %36 : vector<128x4xf32>
    %c15_i32_33 = arith.constant 15 : i32
    %38 = tpu.dynamic_rotate %7 by %c15_i32_33 dim 1 : vector<8x16x8xf32>, i32 -> vector<8x16x8xf32>
    %39 = vector.extract_strided_slice %38 {offsets = [0, 0, 0], sizes = [8, 16, 4], strides = [1, 1, 1]} : vector<8x16x8xf32> to vector<8x16x4xf32>
    %40 = vector.shape_cast %39 : vector<8x16x4xf32> to vector<128x4xf32>
    %c2_34 = arith.constant 2 : index
    %c0_35 = arith.constant 0 : index
    %c0_36 = arith.constant 0 : index
    %41 = vector.load %arg5[%c2_34, %c0_35, %c0_36] : memref<3x4x4xf32, #tpu.memory_space<vmem>>, vector<1x4x4xf32>
    %42 = vector.shape_cast %41 : vector<1x4x4xf32> to vector<4x4xf32>
    %cst_37 = arith.constant dense<0.000000e+00> : vector<128x4xf32>
    %43 = tpu.matmul %40, %42, %cst_37 {dimension_numbers = #tpu.dot_dimension_numbers<[1], [0], [0], [1], [0, 0, 1, 1], [], []>, precision = #tpu.contract_precision<fp32>} : vector<128x4xf32>, vector<4x4xf32>, vector<128x4xf32> -> vector<128x4xf32>
    %44 = arith.addf %37, %43 : vector<128x4xf32>
    %c0_38 = arith.constant 0 : index
    %c0_39 = arith.constant 0 : index
    %45 = vector.load %arg6[%c0_38, %c0_39] : memref<1x4xf32, #tpu.memory_space<vmem>>, vector<1x4xf32>
    %46 = vector.broadcast %45 : vector<1x4xf32> to vector<128x4xf32>
    %47 = arith.addf %44, %46 : vector<128x4xf32>
    %48 = vector.shape_cast %47 : vector<128x4xf32> to vector<8x16x4xf32>
    %c0_40 = arith.constant 0 : index
    %c0_41 = arith.constant 0 : index
    %c0_42 = arith.constant 0 : index
    %c0_43 = arith.constant 0 : index
    %49 = vector.load %arg7[%c0_40, %c0_41, %c0_42, %c0_43] : memref<1x8x16x4xf32, #tpu.memory_space<vmem>>, vector<1x8x16x4xf32>
    %50 = vector.shape_cast %49 : vector<1x8x16x4xf32> to vector<8x16x4xf32>
    %51 = vector.shape_cast %48 : vector<8x16x4xf32> to vector<1x8x16x4xf32>
    tpu.vector_store %arg7[%c0_40, %c0_41, %c0_42, %c0_43], %51 {strides = array<i32>} : memref<1x8x16x4xf32, #tpu.memory_space<vmem>>, vector<1x8x16x4xf32>,
    return
  }
  func.func @transform_0(%arg0: i32, %arg1: i32) -> (i32, i32, i32, i32, i32) {
    %c0_i32 = arith.constant 0 : i32
    %c0_i32_0 = arith.constant 0 : i32
    %c0_i32_1 = arith.constant 0 : i32
    %c0_i32_2 = arith.constant 0 : i32
    return %arg0, %arg1, %c0_i32, %c0_i32_0, %c0_i32_1 : i32, i32, i32, i32, i32
  }
  func.func @transform_1(%arg0: i32, %arg1: i32) -> (i32, i32, i32, i32, i32) {
    %c1_i32 = arith.constant 1 : i32
    %0 = arith.addi %arg1, %c1_i32 : i32
    %c8_i32 = arith.constant 8 : i32
    %1 = arith.muli %0, %c8_i32 : i32
    %c0_i32 = arith.constant 0 : i32
    %c0_i32_0 = arith.constant 0 : i32
    %c0_i32_1 = arith.constant 0 : i32
    %c0_i32_2 = arith.constant 0 : i32
    return %arg0, %1, %c0_i32, %c0_i32_0, %c0_i32_1 : i32, i32, i32, i32, i32
  }
  func.func @transform_2(%arg0: i32, %arg1: i32) -> (i32, i32, i32) {
    %c0_i32 = arith.constant 0 : i32
    %c0_i32_0 = arith.constant 0 : i32
    %c0_i32_1 = arith.constant 0 : i32
    %c0_i32_2 = arith.constant 0 : i32
    return %c0_i32, %c0_i32_0, %c0_i32_1 : i32, i32, i32
  }
  func.func @transform_3(%arg0: i32, %arg1: i32) -> (i32, i32, i32) {
    %c0_i32 = arith.constant 0 : i32
    %c0_i32_0 = arith.constant 0 : i32
    %c0_i32_1 = arith.constant 0 : i32
    %c0_i32_2 = arith.constant 0 : i32
    return %c0_i32, %c0_i32_0, %c0_i32_1 : i32, i32, i32
  }
  func.func @transform_4(%arg0: i32, %arg1: i32) -> (i32, i32) {
    %c0_i32 = arith.constant 0 : i32
    %c0_i32_0 = arith.constant 0 : i32
    %c0_i32_1 = arith.constant 0 : i32
    return %c0_i32, %c0_i32_0 : i32, i32
  }
  func.func @transform_5(%arg0: i32, %arg1: i32) -> (i32, i32, i32, i32) {
    %c0_i32 = arith.constant 0 : i32
    %c0_i32_0 = arith.constant 0 : i32
    %c0_i32_1 = arith.constant 0 : i32
    return %arg0, %arg1, %c0_i32, %c0_i32_0 : i32, i32, i32, i32
  }
}

</mosaic_0001>

<bundles_post_ra>
// kernel: downsample_conv.1
= control target key start
LH: loop header
LB: loop body
LE: loop exit
PB: predicated region body
PF: predicated region fallthrough
CT: control target
= control target key end

     0   :  { %s9109_s18 = smov 0   ;;  %s9111_s19 = smov 0   ;;  %s11830_s0 = inlined_call_operand.vmem [shape: f32[2,9,2,16,8], index: 0, kind: input, shape index: {}, may-alias: {0,1}]   ;;  %s11831_s1 = inlined_call_operand.vmem [shape: f32[2,9,2,16,8], index: 1, kind: input, shape index: {}, may-alias: {0,1}]   ;;  %s11832_s2 = inlined_call_operand.vmem [shape: f32[3,8,4], index: 2, kind: input, shape index: {}]   ;;  %s11833_s3 = inlined_call_operand.vmem [shape: f32[3,4,4], index: 3, kind: input, shape index: {}]   ;;  %s11834_s4 = inlined_call_operand.vmem [shape: f32[1,4], index: 4, kind: input, shape index: {}]   ;;  %s11835_s5 = inlined_call_operand.vmem [shape: f32[2,8,16,4], index: 5, kind: output, shape index: {}]  }
   0x1   :  { %s9113_s20 = smov 0  }
   0x2 LB: > { %s27_s21 = sadd.s32 1, %s9073_s19  ;;  %p7449_p0 = scmp.ge.s32.totalorder %s9077_s20, 1  ;;  %s9077_s20 = sphi %s9113_s20, %s15_s20   ;;  %s9073_s19 = sphi %s9111_s19, %s12534_s19   ;;  %s9069_s18 = sphi %s9109_s18, %s12533_s18  }
   0x3   : > { %p29_p1 = scmp.ge.s32.totalorder %s27_s21, 2  ;;  %p245_p2 = scmp.lt.s32.totalorder %s9077_s20, 3 }
   0x5   : > { %s12536_s21 = smov (%p29_p1, %s27_s21), 0  ;;  %p246_p3 = pnand %p7449_p0, %p245_p2 }
   0x7   : > { %249 = sbr.rel (%p246_p3) target bundleno = 810 (0x32a), region = 40 }
   0xc   : > { %v418_v0 = vld [vmem:[%s11833_s3] sm:$0xf]  ;;  %vm468_vm0 = vcmask 1043456   ;;  %p307_p4 = scmp.lt.s32.totalorder %s9069_s18, 1  ;;  %v399_v1 = vlaneseq  ;;  %vm419_vm2 = vcmask 31744   ;;  %vm1563_vm3 = vcmask 64512  }
   0xd   : > { %v470_v2 = vsel %vm468_vm0, %v418_v0, 0  ;;  %v382_v6 = vld [vmem:[%s11832_s2] sm:$0xff] }
   0xe   : > { %v9131_v3 = vand.u32 4294901760, %v470_v2  ;;  %s12538_s18 = smov (!%p307_p4, %s9069_s18), 1  ;;  %v9135_v4 = vshrl.u32 %v399_v1, 7  ;;  %v9167_v11 = vand.u32 4294901760, %v382_v6 }
   0xf   : > { %s9028_s24 = smul.u32 288, %s12538_s18  ;;  %s7479_s17 = sshll.u32 %s12538_s18, 7 }
  0x10   : > { %12052 = vst [vmem:[#allocation2_spill] sm:$0xff] %v9135_v4  ;;  %8092 = vmatprep.subr.mxu0 %v9131_v3  ;;  %v9139_v5 = vsub.f32 %v470_v2, %v9131_v3  ;;  %vm401_vm1 = vcmp.lt.s32.totalorder %v9135_v4, 7  ;;  %v9195_v28 = vsub.f32 %v382_v6, %v9167_v11  ;;  %s11721_s25 = scalar_lea.vmem %s11835_s5, %s7479_s17 }
  0x11   : > { %8093 = vmatpush3.msra.mxu0 %v9131_v3  ;;  %s9154_s29 = scalar_lea.vmem %s11830_s0, %s9028_s24  ;;  %s7478_s11 = sadd.s32 256, %s9028_s24 }
  0x12   : > { %v9147_v7 = vand.u32 4294901760, %v9139_v5  ;;  %8144 = vmatprep.subr.mxu0 %v9139_v5  ;;  %v9158_v8 = vld [vmem:[%s9154_s29] sm:$0xff]  ;;  %v9161_v9 = vld [vmem:[%s9154_s29 + $0x8] sm:$0xff]  ;;  %s333_s14 = scalar_lea.vmem %s11831_s1, %s7478_s11 }
  0x13   : > { %v9165_v10 = vld [vmem:[%s9154_s29 + $0x20] sm:$0xff]  ;;  %v383_v13 = vrot.slane %v9158_v8, 1  ;;  %v391_v14 = vrot.slane %v9161_v9, 1  ;;  %v9174_v15 = vld [vmem:[%s9154_s29 + $0x28] sm:$0xff] }
  0x14   : > { %v732_v12 = vsub.f32 %v9139_v5, %v9147_v7  ;;  %v9177_v16 = vld [vmem:[%s9154_s29 + $0x40] sm:$0xff]  ;;  %v9180_v17 = vld [vmem:[%s9154_s29 + $0x48] sm:$0xff]  ;;  %v384_v18 = vrot.slane %v9165_v10, 1  ;;  %v392_v19 = vrot.slane %v9174_v15, 1 }
  0x15   : > { %12053 = vst [vmem:[#allocation3_spill] sm:$0xff] %v9180_v17  ;;  %v385_v20 = vrot.slane %v9177_v16, 1  ;;  %v402_v22 = vsel %vm401_vm1, %v383_v13, %v391_v14  ;;  %v410_v23 = vsel %vm401_vm1, %v391_v14, %v383_v13  ;;  %v393_v24 = vrot.slane %v9180_v17, 1  ;;  %v9205_v33 = vld [vmem:[%s9154_s29 + $0x60] sm:$0xff]  ;;  %v9226_v42 = vld [vmem:[%s9154_s29 + $0x68] sm:$0xff] }
  0x16   : > { %v733_v21 = vand.u32 4294901760, %v732_v12  ;;  %v421_v25 = vsel %vm419_vm2, %v402_v22, 0  ;;  %v424_v26 = vsel %vm419_vm2, %v410_v23, 0  ;;  %v403_v27 = vsel %vm401_vm1, %v384_v18, %v392_v19  ;;  %12054 = vst [vmem:[#allocation4_spill] sm:$0xff] %v9205_v33  ;;  %12057 = vst [vmem:[#allocation7_spill] sm:$0xff] %v9226_v42  ;;  %v9229_v43 = vld [vmem:[%s9154_s29 + $0x80] sm:$0xff] }
  0x17   : > { %v9197_v29 = vand.u32 4294901760, %v421_v25  ;;  %v9199_v30 = vand.u32 4294901760, %v424_v26  ;;  %v427_v31 = vsel %vm419_vm2, %v403_v27, 0  ;;  %v411_v32 = vsel %vm401_vm1, %v392_v19, %v384_v18  ;;  %12058 = vst [vmem:[#allocation8_spill] sm:$0xff] %v9229_v43  ;;  %v9286_v12 = vld [vmem:[%s9154_s29 + $0x88] sm:$0xff]  ;;  %v9289_v13 = vld [vmem:[%s9154_s29 + $0xa0] sm:$0xff] }
  0x18   : > { %8118 = vmatprep.subr.mxu1 %v733_v21  ;;  %v9207_v34 = vand.u32 4294901760, %v427_v31  ;;  %v430_v35 = vsel %vm419_vm2, %v411_v32, 0  ;;  %v404_v36 = vsel %vm401_vm1, %v385_v20, %v393_v24  ;;  %v412_v37 = vsel %vm401_vm1, %v393_v24, %v385_v20  ;;  %12069 = vst [vmem:[#allocation19_spill] sm:$0xff] %v9286_v12  ;;  %12070 = vst [vmem:[#allocation20_spill] sm:$0xff] %v9289_v13  ;;  %v9292_v14 = vld [vmem:[%s9154_s29 + $0xa8] sm:$0xff]  ;;  %v9301_v22 = vld [vmem:[%s9154_s29 + $0xc0] sm:$0xff] }
  0x19   : > { %8119 = vmatpush3.msra.mxu1 %v733_v21  ;;  %v9215_v38 = vsub.f32 %v421_v25, %v9197_v29  ;;  %8120 = vmatprep.mubr.f32.mxu1 %v9197_v29  ;;  %v9219_v39 = vsub.f32 %v424_v26, %v9199_v30  ;;  %v9222_v40 = vand.u32 4294901760, %v430_v35  ;;  %v433_v41 = vsel %vm419_vm2, %v404_v36, 0  ;;  %12071 = vst [vmem:[#allocation21_spill] sm:$0xff] %v9292_v14 }
  0x1a   : > { %12055 = vst [vmem:[#allocation5_spill] sm:$0xff] %v9207_v34  ;;  %8170 = vmatprep.subr.mxu1 %v9131_v3  ;;  %8121 = vmatmul.mubr.f32.vlgmr.msra.gmra.mxu1 %v9199_v30  ;;  %v9233_v44 = vsub.f32 %v427_v31, %v9207_v34  ;;  %v9235_v45 = vand.u32 4294901760, %v433_v41  ;;  %v436_v46 = vsel %vm419_vm2, %v412_v37, 0  ;;  %v386_v47 = vrot.slane %v9205_v33, 1  ;;  %12073 = vst [vmem:[#allocation23_spill] sm:$0xff] %v9301_v22 }
  0x1b   : > { %12056 = vst [vmem:[#allocation6_spill] sm:$0xff] %v9222_v40  ;;  %v11837_v48 = vand.u32 4294901760, %v9215_v38  ;;  %v11836_v49 = vand.u32 4294901760, %v9219_v39  ;;  %8171 = vmatpush3.msra.mxu1 %v9131_v3  ;;  %8123 = vmatprep.mubr.f32.mxu1 %v9207_v34  ;;  %v9244_v50 = vsub.f32 %v430_v35, %v9222_v40  ;;  %v9246_v51 = vand.u32 4294901760, %v436_v46 }
  0x1c   : > { %12059 = vst [vmem:[#allocation9_spill] sm:$0xff] %v9233_v44  ;;  %12060 = vst [vmem:[#allocation10_spill] sm:$0xff] %v9235_v45  ;;  %v9249_v52 = vand.u32 4294901760, %v9233_v44  ;;  %v9252_v53 = vsub.f32 %v433_v41, %v9235_v45  ;;  %v394_v54 = vrot.slane %v9226_v42, 1  ;;  %v387_v55 = vrot.slane %v9229_v43, 1  ;;  %8222 = vmatprep.subr.mxu1 %v9131_v3 }
  0x1d   : > { %12061 = vst [vmem:[#allocation11_spill] sm:$0xff] %v9244_v50  ;;  %12062 = vst [vmem:[#allocation12_spill] sm:$0xff] %v9246_v51  ;;  %v541_v56 = vsub.f32 %v9215_v38, %v11837_v48  ;;  %v551_v57 = vsub.f32 %v9219_v39, %v11836_v49  ;;  %v9264_v58 = vand.u32 4294901760, %v9244_v50  ;;  %v9267_v59 = vsub.f32 %v436_v46, %v9246_v51 }
  0x1e   : > { %12063 = vst [vmem:[#allocation13_spill] sm:$0xff] %v9249_v52  ;;  %12064 = vst [vmem:[#allocation14_spill] sm:$0xff] %v9252_v53  ;;  %v561_v60 = vsub.f32 %v9233_v44, %v9249_v52  ;;  %8124 = vmatmul.mubr.f32.gmra.mxu1 %v9222_v40  ;;  %v9273_v61 = vand.u32 4294901760, %v9252_v53  ;;  %v405_v62 = vsel %vm401_vm1, %v386_v47, %v394_v54  ;;  %v395_v31 = vrot.slane %v9286_v12, 1 }
  0x1f   : > { %12065 = vst [vmem:[#allocation15_spill] sm:$0xff] %v9264_v58  ;;  %12066 = vst [vmem:[#allocation16_spill] sm:$0xff] %v9267_v59  ;;  %v413_v63 = vsel %vm401_vm1, %v394_v54, %v386_v47  ;;  %v542_v0 = vand.u32 4294901760, %v541_v56  ;;  %v552_v1 = vand.u32 4294901760, %v551_v57  ;;  %v571_v2 = vsub.f32 %v9244_v50, %v9264_v58  ;;  %8126 = vmatprep.mubr.f32.mxu1 %v9235_v45 }
  0x20   : > { %12067 = vst [vmem:[#allocation17_spill] sm:$0xff] %v9273_v61  ;;  %v9283_v6 = vand.u32 4294901760, %v9267_v59  ;;  %v9294_v18 = vand.u32 4294901760, %v561_v60  ;;  %v581_v19 = vsub.f32 %v9252_v53, %v9273_v61  ;;  %v439_v20 = vsel %vm419_vm2, %v405_v62, 0 }
  0x21   : > { %v442_v21 = vsel %vm419_vm2, %v413_v63, 0  ;;  %8094 = vmatprep.mubr.f32.mxu0 %v542_v0  ;;  %v9303_v23 = vand.u32 4294901760, %v571_v2  ;;  %v9307_v25 = vand.u32 4294901760, %v439_v20  ;;  %v388_v32 = vrot.slane %v9289_v13, 1  ;;  %v9346_v0 = vld [vmem:[%s9154_s29 + $0xc8] sm:$0xff] }
  0x22   : > { %12068 = vst [vmem:[#allocation18_spill] sm:$0xff] %v9283_v6  ;;  %12072 = vst [vmem:[#allocation22_spill] sm:$0xff] %v9294_v18  ;;  %v591_v24 = vsub.f32 %v9267_v59, %v9283_v6  ;;  %v9309_v26 = vand.u32 4294901760, %v442_v21  ;;  %8095 = vmatmul.mubr.f32.vlgmr.msra.gmra.mxu0 %v552_v1  ;;  %v9311_v27 = vand.u32 4294901760, %v581_v19  ;;  %8127 = vmatmul.mubr.f32.gmra.mxu1 %v9246_v51  ;;  %v396_v35 = vrot.slane %v9292_v14, 1  ;;  %v9349_v1 = vld [vmem:[%s9154_s29 + $0xe0] sm:$0xff] }
  0x23   : > { %12074 = vst [vmem:[#allocation24_spill] sm:$0xff] %v9303_v23  ;;  %12075 = vst [vmem:[#allocation25_spill] sm:$0xff] %v9307_v25  ;;  %8145 = vmatpush3.msra.mxu0 %v9139_v5  ;;  %8097 = vmatprep.mubr.f32.mxu0 %v9294_v18  ;;  %v9322_v37 = vsub.f32 %v439_v20, %v9307_v25  ;;  %v389_v46 = vrot.slane %v9301_v22, 1  ;;  %v406_v47 = vsel %vm401_vm1, %v387_v55, %v395_v31 }
  0x24   : > { %12076 = vst [vmem:[#allocation26_spill] sm:$0xff] %v9309_v26  ;;  %12077 = vst [vmem:[#allocation27_spill] sm:$0xff] %v9311_v27  ;;  %v9319_v36 = vand.u32 4294901760, %v591_v24  ;;  %v9325_v41 = vsub.f32 %v442_v21, %v9309_v26  ;;  %8129 = vmatprep.mubr.f32.mxu1 %v9307_v25  ;;  %v414_v5 = vsel %vm401_vm1, %v395_v31, %v387_v55  ;;  %v445_v62 = vsel %vm419_vm2, %v406_v47, 0 }
  0x25   : > { %12079 = vst [vmem:[#allocation29_spill] sm:$0xff] %v9322_v37  ;;  %v407_v54 = vsel %vm401_vm1, %v388_v32, %v396_v35  ;;  %v415_v56 = vsel %vm401_vm1, %v396_v35, %v388_v32  ;;  %v9338_v57 = vand.u32 4294901760, %v9322_v37  ;;  %v448_v63 = vsel %vm419_vm2, %v414_v5, 0  ;;  %12083 = vst [vmem:[#allocation33_spill] sm:$0xff] %v9346_v0  ;;  %8196 = vmatprep.subr.mxu0 %v9147_v7 }
  0x26   : > { %12078 = vst [vmem:[#allocation28_spill] sm:$0xff] %v9319_v36  ;;  %12080 = vst [vmem:[#allocation30_spill] sm:$0xff] %v9325_v41  ;;  %v9341_v60 = vand.u32 4294901760, %v9325_v41  ;;  %8098 = vmatmul.mubr.f32.gmra.mxu0 %v9303_v23  ;;  %8130 = vmatmul.mubr.f32.gmra.mxu1 %v9309_v26  ;;  %v9354_v55 = vand.u32 4294901760, %v445_v62  ;;  %v9356_v2 = vand.u32 4294901760, %v448_v63  ;;  %v451_v19 = vsel %vm419_vm2, %v407_v54, 0 }
  0x27   : > { %12081 = vst [vmem:[#allocation31_spill] sm:$0xff] %v9338_v57  ;;  %12084 = vst [vmem:[#allocation34_spill] sm:$0xff] %v9349_v1  ;;  %v454_v20 = vsel %vm419_vm2, %v415_v56, 0  ;;  %8100 = vmatprep.mubr.f32.mxu0 %v9311_v27  ;;  %v601_v21 = vsub.f32 %v9322_v37, %v9338_v57  ;;  %v9365_v31 = vand.u32 4294901760, %v451_v19  ;;  %v397_v5 = vrot.slane %v9346_v0, 1 }
  0x28   : > { %12082 = vst [vmem:[#allocation32_spill] sm:$0xff] %v9341_v60  ;;  %12085 = vst [vmem:[#allocation35_spill] sm:$0xff] %v9354_v55  ;;  %v611_v24 = vsub.f32 %v9325_v41, %v9341_v60  ;;  %v9367_v32 = vand.u32 4294901760, %v454_v20  ;;  %v9370_v35 = vsub.f32 %v445_v62, %v9354_v55  ;;  %8132 = vmatprep.mubr.f32.mxu1 %v9354_v55  ;;  %v390_v54 = vrot.slane %v9349_v1, 1 }
  0x29   : > { %12086 = vst [vmem:[#allocation36_spill] sm:$0xff] %v9356_v2  ;;  %12087 = vst [vmem:[#allocation37_spill] sm:$0xff] %v9365_v31  ;;  %v9374_v47 = vsub.f32 %v448_v63, %v9356_v2  ;;  %v9378_v56 = vand.u32 4294901760, %v601_v21  ;;  %v9383_v48 = vsub.f32 %v451_v19, %v9365_v31  ;;  %v408_v21 = vsel %vm401_vm1, %v389_v46, %v397_v5 }
  0x2a   : > { %12088 = vst [vmem:[#allocation38_spill] sm:$0xff] %v9367_v32  ;;  %12089 = vst [vmem:[#allocation39_spill] sm:$0xff] %v9370_v35  ;;  %v9380_v49 = vand.u32 4294901760, %v611_v24  ;;  %v9386_v27 = vsub.f32 %v454_v20, %v9367_v32  ;;  %8101 = vmatmul.mubr.f32.gmra.mxu0 %v9319_v36  ;;  %v9390_v62 = vand.u32 4294901760, %v9370_v35  ;;  %8133 = vmatmul.mubr.f32.gmra.mxu1 %v9356_v2  ;;  %v9401_v24 = vld [vmem:[%s9154_s29 + $0xe8] sm:$0xff]  ;;  %v457_v23 = vsel %vm419_vm2, %v408_v21, 0 }
  0x2b   : > { %12090 = vst [vmem:[#allocation40_spill] sm:$0xff] %v9374_v47  ;;  %12091 = vst [vmem:[#allocation41_spill] sm:$0xff] %v9378_v56  ;;  %v9393_v63 = vand.u32 4294901760, %v9374_v47  ;;  %v416_v19 = vsel %vm401_vm1, %v397_v5, %v389_v46  ;;  %8103 = vmatprep.mubr.f32.mxu0 %v9378_v56  ;;  %v9405_v20 = vand.u32 4294901760, %v9383_v48  ;;  %8135 = vmatprep.mubr.f32.mxu1 %v9365_v31  ;;  %v9417_v5 = vand.u32 4294901760, %v457_v23 }
  0x2c   : > { %12092 = vst [vmem:[#allocation42_spill] sm:$0xff] %v9380_v49  ;;  %12093 = vst [vmem:[#allocation43_spill] sm:$0xff] %v9383_v48  ;;  %v9409_v36 = vand.u32 4294901760, %v9386_v27  ;;  %v460_v18 = vsel %vm419_vm2, %v416_v19, 0  ;;  %v621_v1 = vsub.f32 %v9370_v35, %v9390_v62  ;;  %v398_v21 = vrot.slane %v9401_v24, 1 }
  0x2d   : > { %12094 = vst [vmem:[#allocation44_spill] sm:$0xff] %v9386_v27  ;;  %12095 = vst [vmem:[#allocation45_spill] sm:$0xff] %v9390_v62  ;;  %v631_v46 = vsub.f32 %v9374_v47, %v9393_v63  ;;  %v9419_v56 = vand.u32 4294901760, %v460_v18  ;;  %v641_v0 = vsub.f32 %v9383_v48, %v9405_v20  ;;  %v9433_v13 = vsub.f32 %v457_v23, %v9417_v5 }
  0x2e   : > { %12096 = vst [vmem:[#allocation46_spill] sm:$0xff] %v9393_v63  ;;  %12097 = vst [vmem:[#allocation47_spill] sm:$0xff] %v9401_v24  ;;  %v651_v22 = vsub.f32 %v9386_v27, %v9409_v36  ;;  %8104 = vmatmul.mubr.f32.gmra.mxu0 %v9380_v49  ;;  %v9427_v19 = vand.u32 4294901760, %v621_v1  ;;  %8136 = vmatmul.mubr.f32.gmra.mxu1 %v9367_v32  ;;  %v409_v24 = vsel %vm401_vm1, %v390_v54, %v398_v21 }
  0x2f   : > { %12098 = vst [vmem:[#allocation48_spill] sm:$0xff] %v9405_v20  ;;  %12099 = vst [vmem:[#allocation49_spill] sm:$0xff] %v9409_v36  ;;  %v9429_v14 = vand.u32 4294901760, %v631_v46  ;;  %v9436_v12 = vsub.f32 %v460_v18, %v9419_v56  ;;  %v9438_v43 = vand.u32 4294901760, %v641_v0  ;;  %8138 = vmatprep.mubr.f32.mxu1 %v9417_v5  ;;  %v417_v1 = vsel %vm401_vm1, %v398_v21, %v390_v54 }
  0x30   : > { %12100 = vst [vmem:[#allocation50_spill] sm:$0xff] %v9417_v5  ;;  %12101 = vst [vmem:[#allocation51_spill] sm:$0xff] %v9419_v56  ;;  %v9446_v46 = vand.u32 4294901760, %v9195_v28  ;;  %8106 = vmatprep.mubr.f32.mxu0 %v9427_v19  ;;  %v9450_v23 = vand.u32 4294901760, %v9433_v13  ;;  %v463_v0 = vsel %vm419_vm2, %v409_v24, 0  ;;  %v466_v49 = vsel %vm419_vm2, %v417_v1, 0 }
  0x31   : > { %12102 = vst [vmem:[#allocation52_spill] sm:$0xff] %v9427_v19  ;;  %12103 = vst [vmem:[#allocation53_spill] sm:$0xff] %v9429_v14  ;;  %v9453_v18 = vand.u32 4294901760, %v9436_v12  ;;  %v9457_v42 = vand.u32 4294901760, %v463_v0  ;;  %v9459_v33 = vand.u32 4294901760, %v466_v49  ;;  %v9462_v54 = vand.u32 4294901760, %v651_v22 }
  0x32   : > { %12104 = vst [vmem:[#allocation54_spill] sm:$0xff] %v9433_v13  ;;  %12105 = vst [vmem:[#allocation55_spill] sm:$0xff] %v9436_v12  ;;  %8107 = vmatmul.mubr.f32.gmra.mxu0 %v9429_v14  ;;  %v661_v21 = vsub.f32 %v9433_v13, %v9450_v23  ;;  %8139 = vmatmul.mubr.f32.gmra.mxu1 %v9419_v56  ;;  %v1872_v14 = vsub.f32 %v9195_v28, %v9446_v46 }
  0x33   : > { %12106 = vst [vmem:[#allocation56_spill] sm:$0xff] %v9438_v43  ;;  %12107 = vst [vmem:[#allocation57_spill] sm:$0xff] %v9446_v46  ;;  %v671_v19 = vsub.f32 %v9436_v12, %v9453_v18  ;;  %8109 = vmatprep.mubr.f32.mxu0 %v9438_v43  ;;  %v9471_v24 = vsub.f32 %v463_v0, %v9457_v42  ;;  %8141 = vmatprep.mubr.f32.mxu1 %v9457_v42  ;;  %v12119_v43 = vand.u32 4294901760, %v9215_v38 }
  0x34   : > { %12108 = vst [vmem:[#allocation58_spill] sm:$0xff] %v9450_v23  ;;  %12109 = vst [vmem:[#allocation59_spill] sm:$0xff] %v9453_v18  ;;  %v9475_v1 = vsub.f32 %v466_v49, %v9459_v33  ;;  %v9477_v22 = vand.u32 4294901760, %v661_v21  ;;  %v1873_v46 = vand.u32 4294901760, %v1872_v14 }
  0x35   : > { %12110 = vst [vmem:[#allocation60_spill] sm:$0xff] %v9457_v42  ;;  %12111 = vst [vmem:[#allocation61_spill] sm:$0xff] %v9459_v33  ;;  %v9482_v4 = vand.u32 4294901760, %v9471_v24  ;;  %v9488_v0 = vand.u32 4294901760, %v671_v19 }
  0x36   : > { %12112 = vst [vmem:[#allocation62_spill] sm:$0xff] %v9462_v54  ;;  %12113 = vst [vmem:[#allocation63_spill] sm:$0xff] %v9471_v24  ;;  %v9485_v17 = vand.u32 4294901760, %v9475_v1  ;;  %8110 = vmatmul.mubr.f32.gmra.mxu0 %v9462_v54  ;;  %8142 = vmatmul.mubr.f32.gmra.mxu1 %v9459_v33  ;;  %v12122_v54 = vand.u32 4294901760, %v9219_v39 }
  0x37   : > { %12114 = vst [vmem:[#allocation64_spill] sm:$0xff] %v9475_v1  ;;  %12115 = vst [vmem:[#allocation65_spill] sm:$0xff] %v9477_v22  ;;  %8112 = vmatprep.mubr.f32.mxu0 %v9477_v22  ;;  %v681_v49 = vsub.f32 %v9471_v24, %v9482_v4  ;;  %8172 = vmatprep.mubr.f32.mxu1 %v12119_v43 }
  0x38   : > { %12116 = vst [vmem:[#allocation66_spill] sm:$0xff] %v9482_v4  ;;  %12117 = vst [vmem:[#allocation67_spill] sm:$0xff] %v9485_v17  ;;  %v691_v21 = vsub.f32 %v9475_v1, %v9485_v17 }
  0x39   : > { %12118 = vst [vmem:[#allocation68_spill] sm:$0xff] %v9488_v0  ;;  %v9498_v42 = vand.u32 4294901760, %v681_v49  ;;  %v12126_v49 = vld [vmem:[#allocation4_spill] sm:$0xff] }
  0x3a   : > { %8113 = vmatmul.mubr.f32.gmra.mxu0 %v9488_v0  ;;  %v9501_v19 = vand.u32 4294901760, %v691_v21  ;;  %8173 = vmatmul.mubr.f32.vlgmr.msra.gmra.mxu1 %v12122_v54  ;;  %v1583_v21 = vsel %vm1563_vm3, %v12126_v49, 0 }
  0x3b   : > { %12120 = vst [vmem:[#allocation69_spill] sm:$0xff] %v9498_v42  ;;  %8115 = vmatprep.mubr.f32.mxu0 %v9498_v42  ;;  %8223 = vmatpush3.msra.mxu1 %v9131_v3  ;;  %v1565_v3 = vsel %vm1563_vm3, %v9158_v8, 0 }
  0x3c   : > { %12121 = vst [vmem:[#allocation70_spill] sm:$0xff] %v9501_v19  ;;  %8175 = vmatprep.mubr.f32.mxu1 %v9249_v52  ;;  %8274 = vmatprep.subr.mxu1 %v1873_v46  ;;  %v12166_v52 = vld [vmem:[#allocation57_spill] sm:$0xff] }
  0x3e   : > { %8116 = vmatmul.mubr.f32.gmra.mxu0 %v9501_v19  ;;  %8176 = vmatmul.mubr.f32.gmra.mxu1 %v9264_v58 }
  0x3f   : > { %8146 = vmatprep.mubr.f32.mxu0 %v9215_v38  ;;  %8178 = vmatprep.mubr.f32.mxu1 %v9273_v61  ;;  %v12164_v61 = vld [vmem:[#allocation33_spill] sm:$0xff] }
  0x40   : > { %v1604_v58 = vsel %vm1563_vm3, %v12164_v61, 0 }
  0x42   : > { %8147 = vmatmul.mubr.f32.vlgmr.msra.gmra.mxu0 %v9219_v39  ;;  %8179 = vmatmul.mubr.f32.gmra.mxu1 %v9283_v6  ;;  %v1574_v39 = vsel %vm1563_vm3, %v9174_v15, 0  ;;  %v12127_v15 = vld [vmem:[#allocation60_spill] sm:$0xff] }
  0x43   : > { %8197 = vmatpush3.msra.mxu0 %v9147_v7  ;;  %8149 = vmatprep.mubr.f32.mxu0 %v9233_v44  ;;  %v1568_v7 = vsel %vm1563_vm3, %v9161_v9, 0  ;;  %v9589_v14 = vand.u32 4294901760, %v1574_v39 }
  0x44   : > { %8181 = vmatprep.mubr.f32.mxu1 %v9338_v57  ;;  %8248 = vmatprep.subr.mxu0 %v9167_v11  ;;  %v9569_v38 = vand.u32 4294901760, %v1568_v7 }
  0x45   : > { %12124 = vst [vmem:[#allocation72_spill] sm:$0xff] %v9589_v14  ;;  %v9611_v49 = vsub.f32 %v1574_v39, %v9589_v14 }
  0x46   : > { %8150 = vmatmul.mubr.f32.gmra.mxu0 %v9244_v50  ;;  %8182 = vmatmul.mubr.f32.gmra.mxu1 %v9341_v60  ;;  %v9585_v43 = vsub.f32 %v1568_v7, %v9569_v38  ;;  %v12155_v60 = vld [vmem:[#allocation23_spill] sm:$0xff] }
  0x47   : > { %8152 = vmatprep.mubr.f32.mxu0 %v9252_v53  ;;  %8184 = vmatprep.mubr.f32.mxu1 %v9390_v62  ;;  %12132 = vst [vmem:[#allocation75_spill] sm:$0xff] %v9611_v49  ;;  %v1601_v50 = vsel %vm1563_vm3, %v12155_v60, 0 }
  0x4a   : > { %8153 = vmatmul.mubr.f32.gmra.mxu0 %v9267_v59  ;;  %8185 = vmatmul.mubr.f32.gmra.mxu1 %v9393_v63 }
  0x4b   : > { %8155 = vmatprep.mubr.f32.mxu0 %v9322_v37  ;;  %8187 = vmatprep.mubr.f32.mxu1 %v9405_v20 }
  0x4e   : > { %8156 = vmatmul.mubr.f32.gmra.mxu0 %v9325_v41  ;;  %8188 = vmatmul.mubr.f32.gmra.mxu1 %v9409_v36 }
  0x4f   : > { %8158 = vmatprep.mubr.f32.mxu0 %v9370_v35  ;;  %8190 = vmatprep.mubr.f32.mxu1 %v9450_v23  ;;  %v12145_v23 = vld [vmem:[#allocation19_spill] sm:$0xff]  ;;  %v12146_v35 = vld [vmem:[#allocation20_spill] sm:$0xff] }
  0x50   : > { %v1595_v36 = vsel %vm1563_vm3, %v12146_v35, 0 }
  0x51   : > { %v9682_v62 = vand.u32 4294901760, %v1595_v36 }
  0x52   : > { %8159 = vmatmul.mubr.f32.gmra.mxu0 %v9374_v47  ;;  %8191 = vmatmul.mubr.f32.gmra.mxu1 %v9453_v18 }
  0x53   : > { %8161 = vmatprep.mubr.f32.mxu0 %v9383_v48  ;;  %8193 = vmatprep.mubr.f32.mxu1 %v9482_v4  ;;  %12153 = vst [vmem:[#allocation86_spill] sm:$0xff] %v9682_v62 }
  0x56   : > { %8162 = vmatmul.mubr.f32.gmra.mxu0 %v9386_v27  ;;  %8194 = vmatmul.mubr.f32.gmra.mxu1 %v9485_v17 }
  0x57   : > { %8164 = vmatprep.mubr.f32.mxu0 %v9433_v13  ;;  %8224 = vmatprep.mubr.f32.mxu1 %v9197_v29 }
  0x5a   : > { %8165 = vmatmul.mubr.f32.gmra.mxu0 %v9436_v12  ;;  %8225 = vmatmul.mubr.f32.vlgmr.msra.gmra.mxu1 %v9199_v30  ;;  %v12133_v12 = vld [vmem:[#allocation7_spill] sm:$0xff] }
  0x5b   : > { %8167 = vmatprep.mubr.f32.mxu0 %v9471_v24  ;;  %8275 = vmatpush3.msra.mxu1 %v1873_v46  ;;  %v12125_v46 = vld [vmem:[#allocation3_spill] sm:$0xff]  ;;  %v9605_v24 = vand.u32 4294901760, %v1583_v21 }
  0x5c   : > { %8227 = vmatprep.mubr.f32.mxu1 %v9207_v34  ;;  %8326 = vmatprep.subr.mxu1 %v9167_v11  ;;  %v1580_v54 = vsel %vm1563_vm3, %v12125_v46, 0  ;;  %v12137_v46 = vld [vmem:[#allocation8_spill] sm:$0xff] }
  0x5d   : > { %12131 = vst [vmem:[#allocation74_spill] sm:$0xff] %v9605_v24  ;;  %v1589_v39 = vsel %vm1563_vm3, %v12137_v46, 0 }
  0x5e   : > { %8168 = vmatmul.mubr.f32.gmra.mxu0 %v9475_v1  ;;  %8228 = vmatmul.mubr.f32.gmra.mxu1 %v9222_v40  ;;  %v9603_v1 = vand.u32 4294901760, %v1580_v54  ;;  %v9644_v46 = vand.u32 4294901760, %v1589_v39 }
  0x5f   : > { %8198 = vmatprep.mubr.f32.mxu0 %v9197_v29  ;;  %8230 = vmatprep.mubr.f32.mxu1 %v9235_v45  ;;  %v9565_v29 = vand.u32 4294901760, %v1565_v3 }
  0x60   : > { %12130 = vst [vmem:[#allocation73_spill] sm:$0xff] %v9603_v1  ;;  %v9629_v4 = vsub.f32 %v1580_v54, %v9603_v1  ;;  %12143 = vst [vmem:[#allocation80_spill] sm:$0xff] %v9644_v46  ;;  %v9673_v35 = vsub.f32 %v1589_v39, %v9644_v46 }
  0x61   : > { %v9576_v8 = vsub.f32 %v1565_v3, %v9565_v29 }
  0x62   : > { %8199 = vmatmul.mubr.f32.vlgmr.msra.gmra.mxu0 %v9199_v30  ;;  %8231 = vmatmul.mubr.f32.gmra.mxu1 %v9246_v51  ;;  %v1571_v30 = vsel %vm1563_vm3, %v9165_v10, 0  ;;  %v1577_v10 = vsel %vm1563_vm3, %v9177_v16, 0  ;;  %v1586_v16 = vsel %vm1563_vm3, %v12133_v12, 0  ;;  %12138 = vst [vmem:[#allocation8_spill] sm:$0xff] %v9629_v4  ;;  %v9632_v12 = vsub.f32 %v1583_v21, %v9605_v24  ;;  %12150 = vst [vmem:[#allocation83_spill] sm:$0xff] %v9673_v35 }
  0x63   : > { %8249 = vmatpush3.msra.mxu0 %v9167_v11  ;;  %8201 = vmatprep.mubr.f32.mxu0 %v9207_v34  ;;  %v9578_v9 = vand.u32 4294901760, %v1571_v30  ;;  %v9601_v7 = vand.u32 4294901760, %v1577_v10  ;;  %v9634_v48 = vand.u32 4294901760, %v1586_v16  ;;  %v9699_v44 = vand.u32 4294901760, %v9673_v35 }
  0x64   : > { %8233 = vmatprep.mubr.f32.mxu1 %v9307_v25  ;;  %8300 = vmatprep.subr.mxu0 %v9195_v28  ;;  %12139 = vst [vmem:[#allocation77_spill] sm:$0xff] %v9632_v12  ;;  %v9663_v41 = vand.u32 4294901760, %v9632_v12 }
  0x65   : > { %12123 = vst [vmem:[#allocation71_spill] sm:$0xff] %v9578_v9  ;;  %v9599_v3 = vsub.f32 %v1571_v30, %v9578_v9  ;;  %12129 = vst [vmem:[#allocation4_spill] sm:$0xff] %v9601_v7  ;;  %v12134_v30 = vand.u32 4294901760, %v9576_v8  ;;  %v9624_v27 = vsub.f32 %v1577_v10, %v9601_v7  ;;  %v9642_v10 = vand.u32 4294901760, %v9611_v49 }
  0x66   : > { %8202 = vmatmul.mubr.f32.gmra.mxu0 %v9222_v40  ;;  %8234 = vmatmul.mubr.f32.gmra.mxu1 %v9309_v26  ;;  %12140 = vst [vmem:[#allocation78_spill] sm:$0xff] %v9634_v48  ;;  %12148 = vst [vmem:[#allocation20_spill] sm:$0xff] %v9663_v41  ;;  %v9666_v20 = vsub.f32 %v1586_v16, %v9634_v48  ;;  %v1761_v61 = vsub.f32 %v9673_v35, %v9699_v44 }
  0x67   : > { %8204 = vmatprep.mubr.f32.mxu0 %v9235_v45  ;;  %8236 = vmatprep.mubr.f32.mxu1 %v9354_v55  ;;  %12128 = vst [vmem:[#allocation3_spill] sm:$0xff] %v9599_v3  ;;  %v1681_v13 = vsub.f32 %v9576_v8, %v12134_v30  ;;  %v9621_v17 = vand.u32 4294901760, %v9599_v3  ;;  %12136 = vst [vmem:[#allocation76_spill] sm:$0xff] %v9624_v27  ;;  %v12141_v30 = vand.u32 4294901760, %v9585_v43  ;;  %v9651_v47 = vand.u32 4294901760, %v9624_v27 }
  0x68   : > { %12142 = vst [vmem:[#allocation79_spill] sm:$0xff] %v9642_v10  ;;  %12149 = vst [vmem:[#allocation82_spill] sm:$0xff] %v9666_v20 }
  0x69   : > { %12135 = vst [vmem:[#allocation7_spill] sm:$0xff] %v9621_v17  ;;  %v1691_v18 = vsub.f32 %v9585_v43, %v12141_v30  ;;  %v1682_v54 = vand.u32 4294901760, %v1681_v13  ;;  %v1701_v21 = vsub.f32 %v9599_v3, %v9621_v17  ;;  %12144 = vst [vmem:[#allocation81_spill] sm:$0xff] %v9651_v47  ;;  %v1592_v30 = vsel %vm1563_vm3, %v12145_v23, 0 }
  0x6a   : > { %8205 = vmatmul.mubr.f32.gmra.mxu0 %v9246_v51  ;;  %8237 = vmatmul.mubr.f32.gmra.mxu1 %v9356_v2  ;;  %v9660_v13 = vand.u32 4294901760, %v9629_v4  ;;  %v1711_v23 = vsub.f32 %v9611_v49, %v9642_v10  ;;  %v9675_v63 = vand.u32 4294901760, %v1592_v30  ;;  %v1721_v16 = vsub.f32 %v9624_v27, %v9651_v47  ;;  %12158 = vst [vmem:[#allocation87_spill] sm:$0xff] %v9699_v44 }
  0x6b   : > { %8207 = vmatprep.mubr.f32.mxu0 %v9307_v25  ;;  %8239 = vmatprep.mubr.f32.mxu1 %v9365_v31  ;;  %v1692_v37 = vand.u32 4294901760, %v1691_v18  ;;  %v9677_v59 = vand.u32 4294901760, %v1701_v21  ;;  %v12154_v18 = vld [vmem:[#allocation21_spill] sm:$0xff]  ;;  %v9693_v21 = vand.u32 4294901760, %v9666_v20 }
  0x6c   : > { %12147 = vst [vmem:[#allocation19_spill] sm:$0xff] %v9660_v13  ;;  %12151 = vst [vmem:[#allocation84_spill] sm:$0xff] %v9675_v63  ;;  %v1598_v53 = vsel %vm1563_vm3, %v12154_v18, 0  ;;  %v1731_v39 = vsub.f32 %v9629_v4, %v9660_v13  ;;  %v9695_v57 = vand.u32 4294901760, %v1711_v23  ;;  %v9702_v18 = vsub.f32 %v1592_v30, %v9675_v63  ;;  %v12165_v30 = vld [vmem:[#allocation34_spill] sm:$0xff] }
  0x6d   : > { %12152 = vst [vmem:[#allocation85_spill] sm:$0xff] %v9677_v59  ;;  %12156 = vst [vmem:[#allocation21_spill] sm:$0xff] %v9693_v21  ;;  %v9704_v60 = vand.u32 4294901760, %v1598_v53  ;;  %v9708_v6 = vand.u32 4294901760, %v1721_v16  ;;  %v9713_v23 = vand.u32 4294901760, %v1601_v50  ;;  %v1607_v19 = vsel %vm1563_vm3, %v12165_v30, 0 }
  0x6e   : > { %8208 = vmatmul.mubr.f32.gmra.mxu0 %v9309_v26  ;;  %8240 = vmatmul.mubr.f32.gmra.mxu1 %v9367_v32  ;;  %12157 = vst [vmem:[#allocation23_spill] sm:$0xff] %v9695_v57  ;;  %12159 = vst [vmem:[#allocation88_spill] sm:$0xff] %v9702_v18  ;;  %v7470_v16 = vld [vmem:[%s11832_s2 + $0x8] sm:$0xff]  ;;  %v9735_v30 = vand.u32 4294901760, %v9702_v18 }
  0x6f   : > { %8210 = vmatprep.mubr.f32.mxu0 %v9354_v55  ;;  %8242 = vmatprep.mubr.f32.mxu1 %v9417_v5  ;;  %12160 = vst [vmem:[#allocation89_spill] sm:$0xff] %v9704_v60  ;;  %12161 = vst [vmem:[#allocation90_spill] sm:$0xff] %v9708_v6  ;;  %v9748_v22 = vsub.f32 %v1601_v50, %v9713_v23 }
  0x70   : > { %12163 = vst [vmem:[#allocation92_spill] sm:$0xff] %v9713_v23  ;;  %12169 = vst [vmem:[#allocation57_spill] sm:$0xff] %v9735_v30 }
  0x71   : > { %12173 = vst [vmem:[#allocation96_spill] sm:$0xff] %v9748_v22  ;;  %v9777_v55 = vand.u32 4294901760, %v9748_v22 }
  0x72   : > { %8211 = vmatmul.mubr.f32.gmra.mxu0 %v9356_v2  ;;  %8243 = vmatmul.mubr.f32.gmra.mxu1 %v9419_v56 }
  0x73   : > { %8213 = vmatprep.mubr.f32.mxu0 %v9365_v31  ;;  %8245 = vmatprep.mubr.f32.mxu1 %v12127_v15  ;;  %12181 = vst [vmem:[#allocation102_spill] sm:$0xff] %v9777_v55 }
  0x76   : > { %8214 = vmatmul.mubr.f32.gmra.mxu0 %v9367_v32  ;;  %8246 = vmatmul.mubr.f32.gmra.mxu1 %v9459_v33  ;;  %v1771_v32 = vsub.f32 %v9702_v18, %v9735_v30 }
  0x77   : > { %8216 = vmatprep.mubr.f32.mxu0 %v9417_v5  ;;  %8276 = vmatprep.mubr.f32.mxu1 %v9565_v29  ;;  %v9754_v5 = vand.u32 4294901760, %v7470_v16 }
  0x78   : > { %v9786_v25 = vand.u32 4294901760, %v1771_v32 }
  0x7a   : > { %8217 = vmatmul.mubr.f32.gmra.mxu0 %v9419_v56  ;;  %8277 = vmatmul.mubr.f32.vlgmr.msra.gmra.mxu1 %v9569_v38  ;;  %12183 = vst [vmem:[#allocation104_spill] sm:$0xff] %v9786_v25 }
  0x7b   : > { %8219 = vmatprep.mubr.f32.mxu0 %v12127_v15  ;;  %8327 = vmatpush3.msra.mxu1 %v9167_v11  ;;  %v12175_v15 = vld [vmem:[#allocation47_spill] sm:$0xff] }
  0x7c   : > { %8279 = vmatprep.mubr.f32.mxu1 %v9578_v9  ;;  %8378 = vmatprep.subr.mxu1 %v9167_v11  ;;  %v1610_v56 = vsel %vm1563_vm3, %v12175_v15, 0  ;;  %v9771_v15 = vand.u32 4294901760, %v1761_v61 }
  0x7d   : > { %v9768_v2 = vand.u32 4294901760, %v1610_v56 }
  0x7e   : > { %8220 = vmatmul.mubr.f32.gmra.mxu0 %v9459_v33  ;;  %8280 = vmatmul.mubr.f32.gmra.mxu1 %v9589_v14  ;;  %v9750_v33 = vand.u32 4294901760, %v1607_v19  ;;  %12180 = vst [vmem:[#allocation101_spill] sm:$0xff] %v9771_v15 }
  0x7f   : > { %8250 = vmatprep.mubr.f32.mxu0 %v1682_v54  ;;  %8282 = vmatprep.mubr.f32.mxu1 %v9601_v7  ;;  %v1741_v54 = vsub.f32 %v9632_v12, %v9663_v41  ;;  %12179 = vst [vmem:[#allocation100_spill] sm:$0xff] %v9768_v2  ;;  %v9795_v45 = vsub.f32 %v1610_v56, %v9768_v2 }
  0x80   : > { %12174 = vst [vmem:[#allocation97_spill] sm:$0xff] %v9750_v33  ;;  %v9780_v26 = vsub.f32 %v1607_v19, %v9750_v33 }
  0x81   : > { %v9723_v42 = vand.u32 4294901760, %v1741_v54  ;;  %v9740_v54 = vand.u32 4294901760, %v1604_v58  ;;  %12185 = vst [vmem:[#allocation106_spill] sm:$0xff] %v9795_v45 }
  0x82   : > { %8251 = vmatmul.mubr.f32.vlgmr.msra.gmra.mxu0 %v1692_v37  ;;  %8283 = vmatmul.mubr.f32.gmra.mxu1 %v9603_v1  ;;  %v9711_v37 = vsub.f32 %v1595_v36, %v9682_v62  ;;  %v1751_v36 = vsub.f32 %v9666_v20, %v9693_v21  ;;  %12182 = vst [vmem:[#allocation103_spill] sm:$0xff] %v9780_v26  ;;  %v9804_v32 = vand.u32 4294901760, %v9780_v26 }
  0x83   : > { %8301 = vmatpush3.msra.mxu0 %v9195_v28  ;;  %8253 = vmatprep.mubr.f32.mxu0 %v9677_v59  ;;  %v9721_v28 = vand.u32 4294901760, %v1731_v39  ;;  %12168 = vst [vmem:[#allocation34_spill] sm:$0xff] %v9723_v42  ;;  %v9738_v39 = vsub.f32 %v1598_v53, %v9704_v60  ;;  %12171 = vst [vmem:[#allocation94_spill] sm:$0xff] %v9740_v54  ;;  %v9766_v50 = vsub.f32 %v1604_v58, %v9740_v54 }
  0x84   : > { %12162 = vst [vmem:[#allocation91_spill] sm:$0xff] %v9711_v37  ;;  %8285 = vmatprep.mubr.f32.mxu1 %v9605_v24  ;;  %8352 = vmatprep.subr.mxu0 %v12166_v52  ;;  %v9745_v0 = vand.u32 4294901760, %v9711_v37  ;;  %v9756_v53 = vand.u32 4294901760, %v1751_v36  ;;  %v9783_v58 = vsub.f32 %v7470_v16, %v9754_v5  ;;  %v1801_v16 = vsub.f32 %v9748_v22, %v9777_v55 }
  0x85   : > { %12167 = vst [vmem:[#allocation33_spill] sm:$0xff] %v9721_v28  ;;  %12170 = vst [vmem:[#allocation93_spill] sm:$0xff] %v9738_v39  ;;  %v9763_v31 = vand.u32 4294901760, %v9738_v39  ;;  %v9792_v51 = vand.u32 4294901760, %v9766_v50 }
  0x86   : > { %8254 = vmatmul.mubr.f32.gmra.mxu0 %v9695_v57  ;;  %8286 = vmatmul.mubr.f32.gmra.mxu1 %v9634_v48  ;;  %12172 = vst [vmem:[#allocation95_spill] sm:$0xff] %v9745_v0  ;;  %12176 = vst [vmem:[#allocation47_spill] sm:$0xff] %v9756_v53  ;;  %v1781_v36 = vsub.f32 %v9711_v37, %v9745_v0  ;;  %v9807_v40 = vand.u32 4294901760, %v9783_v58 }
  0x87   : > { %8256 = vmatprep.mubr.f32.mxu0 %v9708_v6  ;;  %8288 = vmatprep.mubr.f32.mxu1 %v9644_v46  ;;  %12177 = vst [vmem:[#allocation98_spill] sm:$0xff] %v9763_v31  ;;  %12178 = vst [vmem:[#allocation99_spill] sm:$0xff] %v9766_v50  ;;  %v1791_v61 = vsub.f32 %v9738_v39, %v9763_v31  ;;  %v1811_v56 = vsub.f32 %v9766_v50, %v9792_v51 }
  0x88   : > { %12184 = vst [vmem:[#allocation105_spill] sm:$0xff] %v9792_v51  ;;  %v9798_v19 = vand.u32 4294901760, %v1781_v36  ;;  %12187 = vst [vmem:[#allocation108_spill] sm:$0xff] %v9804_v32  ;;  %v9816_v36 = vand.u32 4294901760, %v9795_v45 }
  0x89   : > { %v9810_v34 = vand.u32 4294901760, %v1791_v61  ;;  %v3013_v61 = vsub.f32 %v9783_v58, %v9807_v40 }
  0x8a   : > { %8257 = vmatmul.mubr.f32.gmra.mxu0 %v9721_v28  ;;  %8289 = vmatmul.mubr.f32.gmra.mxu1 %v9675_v63  ;;  %12186 = vst [vmem:[#allocation107_spill] sm:$0xff] %v9798_v19  ;;  %12189 = vst [vmem:[#allocation110_spill] sm:$0xff] %v9816_v36 }
  0x8b   : > { %8259 = vmatprep.mubr.f32.mxu0 %v9723_v42  ;;  %8291 = vmatprep.mubr.f32.mxu1 %v9682_v62  ;;  %12188 = vst [vmem:[#allocation109_spill] sm:$0xff] %v9810_v34  ;;  %v1831_v42 = vsub.f32 %v9795_v45, %v9816_v36  ;;  %v3014_v28 = vand.u32 4294901760, %v3013_v61 }
  0x8d   : > { %v9838_v6 = vand.u32 4294901760, %v1831_v42  ;;  %v9875_v42 = vld [vmem:[%s9154_s29 + $0x38] sm:$0xff] }
  0x8e   : > { %8260 = vmatmul.mubr.f32.gmra.mxu0 %v9756_v53  ;;  %8292 = vmatmul.mubr.f32.gmra.mxu1 %v9704_v60  ;;  %v1821_v53 = vsub.f32 %v9780_v26, %v9804_v32 }
  0x8f   : > { %8262 = vmatprep.mubr.f32.mxu0 %v9771_v15  ;;  %8294 = vmatprep.mubr.f32.mxu1 %v9713_v23  ;;  %v9819_v15 = vand.u32 4294901760, %v1801_v16  ;;  %12194 = vst [vmem:[#allocation114_spill] sm:$0xff] %v9838_v6 }
  0x90   : > { %v9833_v16 = vand.u32 4294901760, %v1821_v53  ;;  %v9887_v53 = vld [vmem:[%s9154_s29 + $0x58] sm:$0xff] }
  0x91   : > { %12190 = vst [vmem:[#allocation111_spill] sm:$0xff] %v9819_v15  ;;  %v3870_v61 = vrot.slane %v9887_v53, 1 }
  0x92   : > { %8263 = vmatmul.mubr.f32.gmra.mxu0 %v9786_v25  ;;  %8295 = vmatmul.mubr.f32.gmra.mxu1 %v9740_v54  ;;  %v9827_v25 = vand.u32 4294901760, %v1811_v56  ;;  %12192 = vst [vmem:[#allocation113_spill] sm:$0xff] %v9833_v16  ;;  %v12195_v56 = vand.u32 4294901760, %v9585_v43 }
  0x93   : > { %8265 = vmatprep.mubr.f32.mxu0 %v9798_v19  ;;  %8297 = vmatprep.mubr.f32.mxu1 %v9750_v33  ;;  %v12193_v19 = vand.u32 4294901760, %v9576_v8 }
  0x94   : > { %12191 = vst [vmem:[#allocation112_spill] sm:$0xff] %v9827_v25 }
  0x96   : > { %8266 = vmatmul.mubr.f32.gmra.mxu0 %v9810_v34  ;;  %8298 = vmatmul.mubr.f32.gmra.mxu1 %v9768_v2 }
  0x97   : > { %8268 = vmatprep.mubr.f32.mxu0 %v9819_v15  ;;  %8328 = vmatprep.mubr.f32.mxu1 %v12193_v19 }
  0x9a   : > { %8269 = vmatmul.mubr.f32.gmra.mxu0 %v9827_v25  ;;  %8329 = vmatmul.mubr.f32.vlgmr.msra.gmra.mxu1 %v12195_v56 }
  0x9b   : > { %8271 = vmatprep.mubr.f32.mxu0 %v9833_v16  ;;  %8379 = vmatpush3.msra.mxu1 %v9167_v11  ;;  %v9872_v11 = vld [vmem:[%s9154_s29 + $0x30] sm:$0xff]  ;;  %v2721_v16 = vsel %vm1563_vm3, %v9887_v53, 0 }
  0x9c   : > { %8331 = vmatprep.mubr.f32.mxu1 %v9621_v17  ;;  %8430 = vmatprep.subr.mxu1 %v3014_v28  ;;  %v10058_v15 = vand.u32 4294901760, %v2721_v16 }
  0x9e   : > { %8272 = vmatmul.mubr.f32.gmra.mxu0 %v9838_v6  ;;  %8332 = vmatmul.mubr.f32.gmra.mxu1 %v9642_v10  ;;  %v2715_v6 = vsel %vm1563_vm3, %v9875_v42, 0 }
  0x9f   : > { %8302 = vmatprep.mubr.f32.mxu0 %v9576_v8  ;;  %8334 = vmatprep.mubr.f32.mxu1 %v9651_v47  ;;  %v3869_v8 = vrot.slane %v9875_v42, 1  ;;  %v10044_v42 = vand.u32 4294901760, %v2715_v6 }
  0xa2   : > { %8303 = vmatmul.mubr.f32.vlgmr.msra.gmra.mxu0 %v9585_v43  ;;  %8335 = vmatmul.mubr.f32.gmra.mxu1 %v9660_v13  ;;  %v9884_v43 = vld [vmem:[%s9154_s29 + $0x50] sm:$0xff] }
  0xa3   : > { %8353 = vmatpush3.msra.mxu0 %v12166_v52  ;;  %8305 = vmatprep.mubr.f32.mxu0 %v9599_v3  ;;  %v3861_v52 = vrot.slane %v9872_v11, 1  ;;  %v3862_v19 = vrot.slane %v9884_v43, 1  ;;  %v2718_v17 = vsel %vm1563_vm3, %v9884_v43, 0 }
  0xa4   : > { %8337 = vmatprep.mubr.f32.mxu1 %v9663_v41  ;;  %8404 = vmatprep.subr.mxu0 %v9754_v5  ;;  %v10004_v41 = vld [vmem:[%s9154_s29 + $0xf8] sm:$0xff]  ;;  %v10056_v25 = vand.u32 4294901760, %v2718_v17 }
  0xa6   : > { %8306 = vmatmul.mubr.f32.gmra.mxu0 %v9611_v49  ;;  %8338 = vmatmul.mubr.f32.gmra.mxu1 %v9693_v21  ;;  %v2712_v21 = vsel %vm1563_vm3, %v9872_v11, 0  ;;  %v10001_v49 = vld [vmem:[%s9154_s29 + $0xf0] sm:$0xff] }
  0xa7   : > { %8308 = vmatprep.mubr.f32.mxu0 %v9624_v27  ;;  %8340 = vmatprep.mubr.f32.mxu1 %v9699_v44  ;;  %v3867_v3 = vrot.slane %v10001_v49, 1  ;;  %v10025_v10 = vand.u32 4294901760, %v2712_v21 }
  0xa9   : > { %v10054_v53 = vsub.f32 %v2712_v21, %v10025_v10 }
  0xaa   : > { %8309 = vmatmul.mubr.f32.gmra.mxu0 %v9629_v4  ;;  %8341 = vmatmul.mubr.f32.gmra.mxu1 %v9735_v30 }
  0xab   : > { %8311 = vmatprep.mubr.f32.mxu0 %v9632_v12  ;;  %8343 = vmatprep.mubr.f32.mxu1 %v9745_v0  ;;  %v9975_v0 = vld [vmem:[%s9154_s29 + $0xd0] sm:$0xff]  ;;  %v9978_v12 = vld [vmem:[%s9154_s29 + $0xd8] sm:$0xff] }
  0xac   : > { %v3866_v30 = vrot.slane %v9975_v0, 1 }
  0xae   : > { %8312 = vmatmul.mubr.f32.gmra.mxu0 %v9666_v20  ;;  %8344 = vmatmul.mubr.f32.gmra.mxu1 %v9763_v31  ;;  %v9972_v20 = vld [vmem:[%s9154_s29 + $0x18] sm:$0xff] }
  0xaf   : > { %8314 = vmatprep.mubr.f32.mxu0 %v9673_v35  ;;  %8346 = vmatprep.mubr.f32.mxu1 %v9777_v55  ;;  %v2709_v27 = vsel %vm1563_vm3, %v9972_v20, 0 }
  0xb0   : > { %v10014_v13 = vand.u32 4294901760, %v2709_v27 }
  0xb2   : > { %8315 = vmatmul.mubr.f32.gmra.mxu0 %v9702_v18  ;;  %8347 = vmatmul.mubr.f32.gmra.mxu1 %v9792_v51 }
  0xb3   : > { %8317 = vmatprep.mubr.f32.mxu0 %v9711_v37  ;;  %8349 = vmatprep.mubr.f32.mxu1 %v9804_v32  ;;  %v9893_v32 = vsel %vm401_vm1, %v3861_v52, %v3869_v8 }
  0xb4   : > { %12197 = vst [vmem:[#allocation115_spill] sm:$0xff] %v9893_v32 }
  0xb6   : > { %8318 = vmatmul.mubr.f32.gmra.mxu0 %v9738_v39  ;;  %8350 = vmatmul.mubr.f32.gmra.mxu1 %v9816_v36  ;;  %v9905_v36 = vld [vmem:[%s9154_s29 + $0x70] sm:$0xff]  ;;  %v9908_v39 = vld [vmem:[%s9154_s29 + $0x78] sm:$0xff] }
  0xb7   : > { %8320 = vmatprep.mubr.f32.mxu0 %v9748_v22  ;;  %8380 = vmatprep.mubr.f32.mxu1 %v9565_v29  ;;  %v9899_v22 = vsel %vm401_vm1, %v3869_v8, %v3861_v52  ;;  %v3871_v37 = vrot.slane %v9908_v39, 1  ;;  %v9914_v52 = vsel %vm401_vm1, %v3862_v19, %v3870_v61  ;;  %v9925_v8 = vld [vmem:[%s9154_s29 + $0x90] sm:$0xff] }
  0xb8   : > { %12198 = vst [vmem:[#allocation116_spill] sm:$0xff] %v9899_v22  ;;  %12199 = vst [vmem:[#allocation117_spill] sm:$0xff] %v9914_v52  ;;  %v3864_v51 = vrot.slane %v9925_v8, 1 }
  0xba   : > { %8321 = vmatmul.mubr.f32.gmra.mxu0 %v9766_v50  ;;  %8381 = vmatmul.mubr.f32.vlgmr.msra.gmra.mxu1 %v9569_v38  ;;  %v3863_v50 = vrot.slane %v9905_v36, 1 }
  0xbb   : > { %8323 = vmatprep.mubr.f32.mxu0 %v9780_v26  ;;  %8431 = vmatpush3.msra.mxu1 %v3014_v28  ;;  %v9920_v28 = vsel %vm401_vm1, %v3870_v61, %v3862_v19  ;;  %v9928_v26 = vld [vmem:[%s9154_s29 + $0x98] sm:$0xff]  ;;  %v9947_v19 = vld [vmem:[%s9154_s29 + $0xb0] sm:$0xff] }
  0xbc   : > { %8383 = vmatprep.mubr.f32.mxu1 %v9578_v9  ;;  %8482 = vmatprep.subr.mxu1 %v9754_v5  ;;  %12200 = vst [vmem:[#allocation118_spill] sm:$0xff] %v9920_v28  ;;  %v9934_v18 = vsel %vm401_vm1, %v3863_v50, %v3871_v37  ;;  %v9953_v61 = vld [vmem:[%s9154_s29 + $0x10] sm:$0xff] }
  0xbd   : > { %12201 = vst [vmem:[#allocation119_spill] sm:$0xff] %v9934_v18  ;;  %v2706_v31 = vsel %vm1563_vm3, %v9953_v61, 0 }
  0xbe   : > { %8324 = vmatmul.mubr.f32.gmra.mxu0 %v9795_v45  ;;  %8384 = vmatmul.mubr.f32.gmra.mxu1 %v9589_v14  ;;  %v3872_v45 = vrot.slane %v9928_v26, 1  ;;  %v9994_v44 = vand.u32 4294901760, %v2706_v31 }
  0xbf   : > { %8354 = vmatprep.mubr.f32.mxu0 %v9565_v29  ;;  %8386 = vmatprep.mubr.f32.mxu1 %v9601_v7  ;;  %v9940_v29 = vsel %vm401_vm1, %v3871_v37, %v3863_v50  ;;  %v3865_v37 = vrot.slane %v9947_v19, 1 }
  0xc0   : > { %12202 = vst [vmem:[#allocation120_spill] sm:$0xff] %v9940_v29  ;;  %v9959_v55 = vsel %vm401_vm1, %v3864_v51, %v3872_v45  ;;  %v9965_v35 = vsel %vm401_vm1, %v3872_v45, %v3864_v51  ;;  %v3874_v45 = vrot.slane %v9978_v12, 1  ;;  %v10023_v47 = vsub.f32 %v2706_v31, %v9994_v44 }
  0xc1   : > { %12203 = vst [vmem:[#allocation121_spill] sm:$0xff] %v9959_v55  ;;  %12204 = vst [vmem:[#allocation122_spill] sm:$0xff] %v9965_v35  ;;  %v10042_v31 = vsub.f32 %v2709_v27, %v10014_v13 }
  0xc2   : > { %8355 = vmatmul.mubr.f32.vlgmr.msra.gmra.mxu0 %v9569_v38  ;;  %8387 = vmatmul.mubr.f32.gmra.mxu1 %v9603_v1  ;;  %v9950_v38 = vld [vmem:[%s9154_s29 + $0xb8] sm:$0xff]  ;;  %v10018_v11 = vsel %vm401_vm1, %v3874_v45, %v3866_v30  ;;  %v12211_v21 = vand.u32 4294901760, %v10023_v47 }
  0xc3   : > { %8405 = vmatpush3.msra.mxu0 %v9754_v5  ;;  %8357 = vmatprep.mubr.f32.mxu0 %v9578_v9  ;;  %v3873_v50 = vrot.slane %v9950_v38, 1  ;;  %12208 = vst [vmem:[#allocation126_spill] sm:$0xff] %v10018_v11 }
  0xc4   : > { %8389 = vmatprep.mubr.f32.mxu1 %v9605_v24  ;;  %8456 = vmatprep.subr.mxu0 %v9783_v58  ;;  %v2822_v34 = vsub.f32 %v10023_v47, %v12211_v21 }
  0xc5   : > { %v9984_v51 = vsel %vm401_vm1, %v3865_v37, %v3873_v50  ;;  %v9990_v4 = vsel %vm401_vm1, %v3873_v50, %v3865_v37  ;;  %v3875_v37 = vrot.slane %v10004_v41, 1  ;;  %v10010_v50 = vsel %vm401_vm1, %v3866_v30, %v3874_v45 }
  0xc6   : > { %8358 = vmatmul.mubr.f32.gmra.mxu0 %v9589_v14  ;;  %8390 = vmatmul.mubr.f32.gmra.mxu1 %v9634_v48  ;;  %12205 = vst [vmem:[#allocation123_spill] sm:$0xff] %v9984_v51  ;;  %12206 = vst [vmem:[#allocation124_spill] sm:$0xff] %v9990_v4  ;;  %v2724_v30 = vsel %vm1563_vm3, %v9905_v36, 0  ;;  %v2727_v36 = vsel %vm1563_vm3, %v9908_v39, 0  ;;  %v2748_v4 = vsel %vm1563_vm3, %v10001_v49, 0 }
  0xc7   : > { %8360 = vmatprep.mubr.f32.mxu0 %v9601_v7  ;;  %8392 = vmatprep.mubr.f32.mxu1 %v9644_v46  ;;  %12207 = vst [vmem:[#allocation125_spill] sm:$0xff] %v10010_v50  ;;  %v10037_v45 = vsel %vm401_vm1, %v3867_v3, %v3875_v37  ;;  %v10048_v43 = vsel %vm401_vm1, %v3875_v37, %v3867_v3  ;;  %v10060_v27 = vand.u32 4294901760, %v2724_v30 }
  0xc8   : > { %12209 = vst [vmem:[#allocation127_spill] sm:$0xff] %v10037_v45  ;;  %12210 = vst [vmem:[#allocation128_spill] sm:$0xff] %v10048_v43  ;;  %v10066_v37 = vsub.f32 %v2715_v6, %v10044_v42  ;;  %v2730_v6 = vsel %vm1563_vm3, %v9925_v8, 0  ;;  %v10082_v3 = vsub.f32 %v2721_v16, %v10058_v15  ;;  %v2733_v16 = vsel %vm1563_vm3, %v9928_v26, 0 }
  0xc9   : > { %v10085_v39 = vsub.f32 %v2724_v30, %v10060_v27  ;;  %v10095_v8 = vand.u32 4294901760, %v2730_v6  ;;  %v2823_v30 = vand.u32 4294901760, %v2822_v34 }
  0xca   : > { %8361 = vmatmul.mubr.f32.gmra.mxu0 %v9603_v1  ;;  %8393 = vmatmul.mubr.f32.gmra.mxu1 %v9675_v63 }
  0xcb   : > { %8363 = vmatprep.mubr.f32.mxu0 %v9605_v24  ;;  %8395 = vmatprep.mubr.f32.mxu1 %v9682_v62  ;;  %12213 = vst [vmem:[#allocation129_spill] sm:$0xff] %v10095_v8  ;;  %v10122_v57 = vsub.f32 %v2730_v6, %v10095_v8  ;;  %v12220_v6 = vand.u32 4294901760, %v10085_v39 }
  0xcd   : > { %v2882_v14 = vsub.f32 %v10085_v39, %v12220_v6 }
  0xce   : > { %8364 = vmatmul.mubr.f32.gmra.mxu0 %v9634_v48  ;;  %8396 = vmatmul.mubr.f32.gmra.mxu1 %v9704_v60  ;;  %v2736_v48 = vsel %vm1563_vm3, %v9947_v19, 0  ;;  %v12216_v19 = vand.u32 4294901760, %v10066_v37 }
  0xcf   : > { %8366 = vmatprep.mubr.f32.mxu0 %v9644_v46  ;;  %8398 = vmatprep.mubr.f32.mxu1 %v9713_v23  ;;  %v10124_v26 = vand.u32 4294901760, %v2736_v48  ;;  %v2883_v50 = vand.u32 4294901760, %v2882_v14 }
  0xd0   : > { %v2852_v24 = vsub.f32 %v10066_v37, %v12216_v19  ;;  %v12219_v19 = vand.u32 4294901760, %v10082_v3 }
  0xd1   : > { %12217 = vst [vmem:[#allocation131_spill] sm:$0xff] %v10124_v26  ;;  %v10147_v45 = vsub.f32 %v2736_v48, %v10124_v26 }
  0xd2   : > { %8367 = vmatmul.mubr.f32.gmra.mxu0 %v9675_v63  ;;  %8399 = vmatmul.mubr.f32.gmra.mxu1 %v9740_v54  ;;  %v12212_v63 = vand.u32 4294901760, %v10042_v31  ;;  %v2872_v7 = vsub.f32 %v10082_v3, %v12219_v19 }
  0xd3   : > { %8369 = vmatprep.mubr.f32.mxu0 %v9682_v62  ;;  %8401 = vmatprep.mubr.f32.mxu1 %v9750_v33  ;;  %v10077_v62 = vsub.f32 %v2718_v17, %v10056_v25 }
  0xd4   : > { %v2873_v48 = vand.u32 4294901760, %v2872_v7 }
  0xd5   : > { %v12218_v59 = vand.u32 4294901760, %v10077_v62 }
  0xd6   : > { %8370 = vmatmul.mubr.f32.gmra.mxu0 %v9704_v60  ;;  %8402 = vmatmul.mubr.f32.gmra.mxu1 %v9768_v2  ;;  %v2832_v60 = vsub.f32 %v10042_v31, %v12212_v63 }
  0xd7   : > { %8372 = vmatprep.mubr.f32.mxu0 %v9713_v23  ;;  %8432 = vmatprep.mubr.f32.mxu1 %v9994_v44  ;;  %v10087_v23 = vand.u32 4294901760, %v2727_v36  ;;  %v2862_v1 = vsub.f32 %v10077_v62, %v12218_v59 }
  0xd9   : > { %v10112_v34 = vsub.f32 %v2727_v36, %v10087_v23 }
  0xda   : > { %8373 = vmatmul.mubr.f32.gmra.mxu0 %v9740_v54  ;;  %v8122_v21 = vpop.f32.mrf.mxu1  ;;  %8433 = vmatmul.mubr.f32.vlgmr.msra.gmra.mxu1 %v10014_v13  ;;  %v12214_v54 = vand.u32 4294901760, %v10054_v53 }
  0xdb   : > { %8375 = vmatprep.mubr.f32.mxu0 %v9750_v33  ;;  %8483 = vmatpush3.msra.mxu1 %v9754_v5  ;;  %v10114_v33 = vand.u32 4294901760, %v2733_v16 }
  0xdc   : > { %v2842_v46 = vsub.f32 %v10054_v53, %v12214_v54  ;;  %v770_v17 = vpop.f32.mrf.mxu1  ;;  %8435 = vmatprep.mubr.f32.mxu1 %v10025_v10  ;;  %8534 = vmatprep.subr.mxu1 %v9754_v5  ;;  %v2833_v54 = vand.u32 4294901760, %v2832_v60  ;;  %v2739_v60 = vsel %vm1563_vm3, %v9950_v38, 0  ;;  %v2853_v38 = vand.u32 4294901760, %v2852_v24 }
  0xdd   : > { %12215 = vst [vmem:[#allocation130_spill] sm:$0xff] %v10114_v33  ;;  %v10142_v59 = vsub.f32 %v2733_v16, %v10114_v33  ;;  %v10149_v6 = vand.u32 4294901760, %v2739_v60  ;;  %v2863_v24 = vand.u32 4294901760, %v2862_v1  ;;  %v12223_v1 = vand.u32 4294901760, %v10112_v34 }
  0xde   : > { %8376 = vmatmul.mubr.f32.gmra.mxu0 %v9768_v2  ;;  %v8125_v63 = vpop.f32.mrf.mxu1  ;;  %8436 = vmatmul.mubr.f32.gmra.mxu1 %v10044_v42  ;;  %v2843_v36 = vand.u32 4294901760, %v2842_v46  ;;  %v2742_v46 = vsel %vm1563_vm3, %v9975_v0, 0  ;;  %v7471_v0 = vld [vmem:[%s11833_s3 + $0x4] sm:$0xf] }
  0xdf   : > { %8406 = vmatprep.mubr.f32.mxu0 %v2823_v30  ;;  %8438 = vmatprep.mubr.f32.mxu1 %v10056_v25  ;;  %12221 = vst [vmem:[#allocation132_spill] sm:$0xff] %v10149_v6  ;;  %v10157_v16 = vand.u32 4294901760, %v2742_v46 }
  0xe0   : > { %v782_v2 = vpop.f32.mrf.mxu1 }
  0xe1   : > { %12222 = vst [vmem:[#allocation133_spill] sm:$0xff] %v10157_v16 }
  0xe2   : > { %v8096_v9 = vpop.f32.mrf.mxu0  ;;  %8407 = vmatmul.mubr.f32.vlgmr.msra.gmra.mxu0 %v2833_v54  ;;  %v8128_v43 = vpop.f32.mrf.mxu1  ;;  %8439 = vmatmul.mubr.f32.gmra.mxu1 %v10058_v15  ;;  %v2745_v54 = vsel %vm1563_vm3, %v9978_v12, 0  ;;  %v3943_v12 = vsel %vm468_vm0, %v7471_v0, 0  ;;  %v10188_v0 = vand.u32 4294901760, %v2748_v4 }
  0xe3   : > { %v10154_v30 = vadd.f32 %v8122_v21, %v8096_v9  ;;  %8457 = vmatpush3.msra.mxu0 %v9783_v58  ;;  %8409 = vmatprep.mubr.f32.mxu0 %v2843_v36  ;;  %v2892_v58 = vsub.f32 %v10112_v34, %v12223_v1  ;;  %v12224_v36 = vand.u32 4294901760, %v10122_v57  ;;  %v10180_v51 = vand.u32 4294901760, %v2745_v54 }
  0xe4   : > { %v544_v19 = vpop.f32.mrf.mxu0  ;;  %v794_v11 = vpop.f32.mrf.mxu1  ;;  %8441 = vmatprep.mubr.f32.mxu1 %v10060_v27  ;;  %8508 = vmatprep.subr.mxu0 %v9807_v40  ;;  %12226 = vst [vmem:[#allocation135_spill] sm:$0xff] %v10188_v0  ;;  %v10192_v35 = vand.u32 4294901760, %v3943_v12 }
  0xe5   : > { %v10165_v9 = vadd.f32 %v770_v17, %v544_v19  ;;  %v2902_v49 = vsub.f32 %v10122_v57, %v12224_v36  ;;  %v10178_v19 = vsub.f32 %v2739_v60, %v10149_v6  ;;  %12225 = vst [vmem:[#allocation134_spill] sm:$0xff] %v10180_v51  ;;  %v2751_v36 = vsel %vm1563_vm3, %v10004_v41, 0 }
  0xe6   : > { %v8099_v7 = vpop.f32.mrf.mxu0  ;;  %8410 = vmatmul.mubr.f32.gmra.mxu0 %v2853_v38  ;;  %v8131_v14 = vpop.f32.mrf.mxu1  ;;  %8442 = vmatmul.mubr.f32.gmra.mxu1 %v10087_v23  ;;  %v10186_v38 = vsub.f32 %v2742_v46, %v10157_v16  ;;  %v2893_v55 = vand.u32 4294901760, %v2892_v58  ;;  %v10202_v41 = vsub.f32 %v2745_v54, %v10180_v51  ;;  %v10204_v28 = vand.u32 4294901760, %v2751_v36 }
  0xe7   : > { %v10182_v1 = vadd.f32 %v8125_v63, %v8099_v7  ;;  %8412 = vmatprep.mubr.f32.mxu0 %v2863_v24  ;;  %8444 = vmatprep.mubr.f32.mxu1 %v10095_v8  ;;  %v12227_v63 = vand.u32 4294901760, %v10142_v59  ;;  %v2903_v46 = vand.u32 4294901760, %v2902_v49  ;;  %v12228_v58 = vand.u32 4294901760, %v10147_v45 }
  0xe8   : > { %v564_v21 = vpop.f32.mrf.mxu0  ;;  %v806_v17 = vpop.f32.mrf.mxu1  ;;  %v10214_v49 = vsub.f32 %v2748_v4, %v10188_v0  ;;  %v10217_v54 = vsub.f32 %v3943_v12, %v10192_v35  ;;  %v12230_v12 = vand.u32 4294901760, %v10186_v38 }
  0xe9   : > { %v10194_v60 = vadd.f32 %v782_v2, %v564_v21  ;;  %v2912_v24 = vsub.f32 %v10142_v59, %v12227_v63  ;;  %v2922_v21 = vsub.f32 %v10147_v45, %v12228_v58  ;;  %v12229_v58 = vand.u32 4294901760, %v10178_v19 }
  0xea   : > { %v8102_v7 = vpop.f32.mrf.mxu0  ;;  %8413 = vmatmul.mubr.f32.gmra.mxu0 %v2873_v48  ;;  %v8134_v29 = vpop.f32.mrf.mxu1  ;;  %8445 = vmatmul.mubr.f32.gmra.mxu1 %v10114_v33  ;;  %v10227_v48 = vsub.f32 %v2751_v36, %v10204_v28 }
  0xeb   : > { %v10206_v2 = vadd.f32 %v8128_v43, %v8102_v7  ;;  %8415 = vmatprep.mubr.f32.mxu0 %v2883_v50  ;;  %8447 = vmatprep.mubr.f32.mxu1 %v10124_v26  ;;  %v2913_v50 = vand.u32 4294901760, %v2912_v24  ;;  %v2932_v22 = vsub.f32 %v10178_v19, %v12229_v58  ;;  %v12233_v26 = vand.u32 4294901760, %v10214_v49 }
  0xec   : > { %v584_v63 = vpop.f32.mrf.mxu0  ;;  %v818_v18 = vpop.f32.mrf.mxu1 }
  0xed   : > { %v10219_v52 = vadd.f32 %v794_v11, %v584_v63  ;;  %v2923_v11 = vand.u32 4294901760, %v2922_v21  ;;  %v12232_v21 = vand.u32 4294901760, %v10202_v41 }
  0xee   : > { %v8105_v43 = vpop.f32.mrf.mxu0  ;;  %8416 = vmatmul.mubr.f32.gmra.mxu0 %v2893_v55  ;;  %v8137_v7 = vpop.f32.mrf.mxu1  ;;  %8448 = vmatmul.mubr.f32.gmra.mxu1 %v10149_v6  ;;  %v2942_v55 = vsub.f32 %v10186_v38, %v12230_v12  ;;  %v10237_v6 = vand.u32 4294901760, %v10217_v54 }
  0xef   : > { %v10229_v32 = vadd.f32 %v8131_v14, %v8105_v43  ;;  %8418 = vmatprep.mubr.f32.mxu0 %v2903_v46  ;;  %8450 = vmatprep.mubr.f32.mxu1 %v10157_v16  ;;  %v2933_v14 = vand.u32 4294901760, %v2932_v22  ;;  %v2952_v43 = vsub.f32 %v10202_v41, %v12232_v21 }
  0xf0   : > { %v604_v63 = vpop.f32.mrf.mxu0  ;;  %v830_v58 = vpop.f32.mrf.mxu1  ;;  %12231 = vst [vmem:[#allocation136_spill] sm:$0xff] %v10237_v6  ;;  %v2943_v16 = vand.u32 4294901760, %v2942_v55 }
  0xf1   : > { %v10239_v4 = vadd.f32 %v806_v17, %v604_v63  ;;  %v2962_v17 = vsub.f32 %v10214_v49, %v12233_v26  ;;  %v4205_v63 = vsub.f32 %v10217_v54, %v10237_v6  ;;  %v2953_v12 = vand.u32 4294901760, %v2952_v43 }
  0xf2   : > { %v8108_v36 = vpop.f32.mrf.mxu0  ;;  %8419 = vmatmul.mubr.f32.gmra.mxu0 %v2913_v50  ;;  %v8140_v46 = vpop.f32.mrf.mxu1  ;;  %8451 = vmatmul.mubr.f32.gmra.mxu1 %v10180_v51 }
  0xf3   : > { %v10246_v24 = vadd.f32 %v8134_v29, %v8108_v36  ;;  %8421 = vmatprep.mubr.f32.mxu0 %v2923_v11  ;;  %8453 = vmatprep.mubr.f32.mxu1 %v10188_v0  ;;  %v12234_v11 = vand.u32 4294901760, %v10227_v48  ;;  %v2963_v36 = vand.u32 4294901760, %v2962_v17  ;;  %v12235_v0 = vand.u32 4294901760, %v10023_v47 }
  0xf4   : > { %v624_v22 = vpop.f32.mrf.mxu0  ;;  %v842_v50 = vpop.f32.mrf.mxu1  ;;  %v12238_v17 = vand.u32 4294901760, %v10066_v37 }
  0xf5   : > { %v10254_v21 = vadd.f32 %v818_v18, %v624_v22  ;;  %v2972_v55 = vsub.f32 %v10227_v48, %v12234_v11  ;;  %v10264_v22 = vand.u32 4294901760, %v4205_v63  ;;  %v12236_v11 = vand.u32 4294901760, %v10042_v31 }
  0xf6   : > { %v8111_v51 = vpop.f32.mrf.mxu0  ;;  %8422 = vmatmul.mubr.f32.gmra.mxu0 %v2933_v14  ;;  %v8143_v29 = vpop.f32.mrf.mxu1  ;;  %8454 = vmatmul.mubr.f32.gmra.mxu1 %v10204_v28 }
  0xf7   : > { %v10260_v26 = vadd.f32 %v8137_v7, %v8111_v51  ;;  %8424 = vmatprep.mubr.f32.mxu0 %v2943_v16  ;;  %8484 = vmatprep.mubr.f32.mxu1 %v12235_v0  ;;  %v2973_v33 = vand.u32 4294901760, %v2972_v55  ;;  %v12237_v7 = vand.u32 4294901760, %v10054_v53 }
  0xf8   : > { %v644_v6 = vpop.f32.mrf.mxu0  ;;  %v854_v18 = vpop.f32.mrf.mxu1 }
  0xf9   : > { %v10266_v14 = vadd.f32 %v830_v58, %v644_v6 }
  0xfa   : > { %v8114_v43 = vpop.f32.mrf.mxu0  ;;  %8425 = vmatmul.mubr.f32.gmra.mxu0 %v2953_v12  ;;  %v8174_v8 = vpop.f32.mrf.mxu1  ;;  %8485 = vmatmul.mubr.f32.vlgmr.msra.gmra.mxu1 %v12236_v11 }
  0xfb   : > { %v10270_v51 = vadd.f32 %v8140_v46, %v8114_v43  ;;  %8427 = vmatprep.mubr.f32.mxu0 %v2963_v36  ;;  %8535 = vmatpush3.msra.mxu1 %v9754_v5  ;;  %v12239_v5 = vand.u32 4294901760, %v10077_v62 }
  0xfc   : > { %v664_v16 = vpop.f32.mrf.mxu0  ;;  %v1113_v0 = vpop.f32.mrf.mxu1  ;;  %8487 = vmatprep.mubr.f32.mxu1 %v12237_v7  ;;  %8586 = vmatprep.subr.mxu1 %v10264_v22 }
  0xfd   : > { %v10276_v6 = vadd.f32 %v842_v50, %v664_v16  ;;  %v12241_v16 = vand.u32 4294901760, %v10085_v39 }
  0xfe   : > { %v8117_v58 = vpop.f32.mrf.mxu0  ;;  %8428 = vmatmul.mubr.f32.gmra.mxu0 %v2973_v33  ;;  %v8177_v12 = vpop.f32.mrf.mxu1  ;;  %8488 = vmatmul.mubr.f32.gmra.mxu1 %v12238_v17  ;;  %v12240_v33 = vand.u32 4294901760, %v10082_v3  ;;  %v12243_v17 = vand.u32 4294901760, %v10122_v57 }
  0xff   : > { %v10280_v46 = vadd.f32 %v8143_v29, %v8117_v58  ;;  %8458 = vmatprep.mubr.f32.mxu0 %v10023_v47  ;;  %8490 = vmatprep.mubr.f32.mxu1 %v12239_v5 }
 0x100   : > { %v684_v63 = vpop.f32.mrf.mxu0  ;;  %v1129_v55 = vpop.f32.mrf.mxu1 }
 0x101   : > { %v10285_v36 = vadd.f32 %v854_v18, %v684_v63 }
 0x102   : > { %v8148_v43 = vpop.f32.mrf.mxu0  ;;  %8459 = vmatmul.mubr.f32.vlgmr.msra.gmra.mxu0 %v10042_v31  ;;  %v8180_v50 = vpop.f32.mrf.mxu1  ;;  %8491 = vmatmul.mubr.f32.gmra.mxu1 %v12240_v33 }
 0x103   : > { %v942_v11 = vadd.f32 %v8148_v43, %v10154_v30  ;;  %8509 = vmatpush3.msra.mxu0 %v9807_v40  ;;  %8461 = vmatprep.mubr.f32.mxu0 %v10054_v53  ;;  %v12242_v30 = vand.u32 4294901760, %v10112_v34 }
 0x104   : > { %v934_v47 = vpop.f32.mrf.mxu0  ;;  %v1145_v29 = vpop.f32.mrf.mxu1  ;;  %8493 = vmatprep.mubr.f32.mxu1 %v12241_v16  ;;  %8560 = vmatprep.subr.mxu0 %v10192_v35 }
 0x105   : > { %v10296_v18 = vadd.f32 %v8174_v8, %v942_v11  ;;  %v935_v31 = vadd.f32 %v934_v47, %v10165_v9 }
 0x106   : > { %v8151_v7 = vpop.f32.mrf.mxu0  ;;  %8462 = vmatmul.mubr.f32.gmra.mxu0 %v10066_v37  ;;  %v8183_v58 = vpop.f32.mrf.mxu1  ;;  %8494 = vmatmul.mubr.f32.gmra.mxu1 %v12242_v30 }
 0x107   : > { %v10302_v40 = vadd.f32 %v1113_v0, %v935_v31  ;;  %v956_v53 = vadd.f32 %v8151_v7, %v10182_v1  ;;  %8464 = vmatprep.mubr.f32.mxu0 %v10077_v62  ;;  %8496 = vmatprep.mubr.f32.mxu1 %v12243_v17  ;;  %v12244_v0 = vand.u32 4294901760, %v10142_v59  ;;  %v12245_v1 = vand.u32 4294901760, %v10147_v45 }
 0x108   : > { %v948_v8 = vpop.f32.mrf.mxu0  ;;  %v1161_v5 = vpop.f32.mrf.mxu1 }
 0x109   : > { %v10308_v63 = vadd.f32 %v8177_v12, %v956_v53  ;;  %v949_v9 = vadd.f32 %v948_v8, %v10194_v60 }
 0x10a   : > { %v8154_v37 = vpop.f32.mrf.mxu0  ;;  %8465 = vmatmul.mubr.f32.gmra.mxu0 %v10082_v3  ;;  %v8186_v43 = vpop.f32.mrf.mxu1  ;;  %8497 = vmatmul.mubr.f32.gmra.mxu1 %v12244_v0 }
 0x10b   : > { %v10314_v33 = vadd.f32 %v1129_v55, %v949_v9  ;;  %v970_v62 = vadd.f32 %v8154_v37, %v10206_v2  ;;  %8467 = vmatprep.mubr.f32.mxu0 %v10085_v39  ;;  %8499 = vmatprep.mubr.f32.mxu1 %v12245_v1  ;;  %v12246_v55 = vand.u32 4294901760, %v10178_v19  ;;  %v12247_v2 = vand.u32 4294901760, %v10186_v38 }
 0x10c   : > { %v962_v12 = vpop.f32.mrf.mxu0  ;;  %v1177_v11 = vpop.f32.mrf.mxu1 }
 0x10d   : > { %v10320_v47 = vadd.f32 %v8180_v50, %v970_v62  ;;  %v963_v60 = vadd.f32 %v962_v12, %v10219_v52 }
 0x10e   : > { %v8157_v3 = vpop.f32.mrf.mxu0  ;;  %8468 = vmatmul.mubr.f32.gmra.mxu0 %v10112_v34  ;;  %v8189_v16 = vpop.f32.mrf.mxu1  ;;  %8500 = vmatmul.mubr.f32.gmra.mxu1 %v12246_v55 }
 0x10f   : > { %v10326_v31 = vadd.f32 %v1145_v29, %v963_v60  ;;  %v984_v39 = vadd.f32 %v8157_v3, %v10229_v32  ;;  %8470 = vmatprep.mubr.f32.mxu0 %v10122_v57  ;;  %8502 = vmatprep.mubr.f32.mxu1 %v12247_v2  ;;  %v12248_v29 = vand.u32 4294901760, %v10202_v41  ;;  %v12249_v32 = vand.u32 4294901760, %v10214_v49 }
 0x110   : > { %v976_v50 = vpop.f32.mrf.mxu0  ;;  %v1193_v7 = vpop.f32.mrf.mxu1 }
 0x111   : > { %v10332_v30 = vadd.f32 %v8183_v58, %v984_v39  ;;  %v977_v52 = vadd.f32 %v976_v50, %v10239_v4 }
 0x112   : > { %v8160_v34 = vpop.f32.mrf.mxu0  ;;  %8471 = vmatmul.mubr.f32.gmra.mxu0 %v10142_v59  ;;  %v8192_v53 = vpop.f32.mrf.mxu1  ;;  %8503 = vmatmul.mubr.f32.gmra.mxu1 %v12248_v29  ;;  %v12251_v29 = vld [vmem:[#allocation129_spill] sm:$0xff] }
 0x113   : > { %v10338_v17 = vadd.f32 %v1161_v5, %v977_v52  ;;  %v998_v57 = vadd.f32 %v8160_v34, %v10246_v24  ;;  %8473 = vmatprep.mubr.f32.mxu0 %v10147_v45  ;;  %8505 = vmatprep.mubr.f32.mxu1 %v12249_v32  ;;  %v12250_v5 = vand.u32 4294901760, %v10227_v48 }
 0x114   : > { %v990_v58 = vpop.f32.mrf.mxu0  ;;  %v1209_v8 = vpop.f32.mrf.mxu1 }
 0x115   : > { %v10344_v9 = vadd.f32 %v8186_v43, %v998_v57  ;;  %v991_v4 = vadd.f32 %v990_v58, %v10254_v21 }
 0x116   : > { %v8163_v59 = vpop.f32.mrf.mxu0  ;;  %8474 = vmatmul.mubr.f32.gmra.mxu0 %v10178_v19  ;;  %v8195_v37 = vpop.f32.mrf.mxu1  ;;  %8506 = vmatmul.mubr.f32.gmra.mxu1 %v12250_v5 }
 0x117   : > { %v10350_v0 = vadd.f32 %v1177_v11, %v991_v4  ;;  %v1012_v45 = vadd.f32 %v8163_v59, %v10260_v26  ;;  %8476 = vmatprep.mubr.f32.mxu0 %v10186_v38  ;;  %8536 = vmatprep.mubr.f32.mxu1 %v9994_v44 }
 0x118   : > { %v1004_v24 = vpop.f32.mrf.mxu0  ;;  %v1225_v43 = vpop.f32.mrf.mxu1 }
 0x119   : > { %v10355_v62 = vadd.f32 %v8189_v16, %v1012_v45  ;;  %v1005_v21 = vadd.f32 %v1004_v24, %v10266_v14  ;;  %v12253_v45 = vld [vmem:[#allocation131_spill] sm:$0xff] }
 0x11a   : > { %v8166_v1 = vpop.f32.mrf.mxu0  ;;  %8477 = vmatmul.mubr.f32.gmra.mxu0 %v10202_v41  ;;  %v8226_v19 = vpop.f32.mrf.mxu1  ;;  %8537 = vmatmul.mubr.f32.vlgmr.msra.gmra.mxu1 %v10014_v13  ;;  %v12254_v24 = vld [vmem:[#allocation115_spill] sm:$0xff] }
 0x11b   : > { %v10360_v12 = vadd.f32 %v1193_v7, %v1005_v21  ;;  %v1026_v26 = vadd.f32 %v8166_v1, %v10270_v51  ;;  %8479 = vmatprep.mubr.f32.mxu0 %v10214_v49  ;;  %8587 = vmatpush3.msra.mxu1 %v10264_v22  ;;  %v3860_v22 = vrot.slane %v9953_v61, 1 }
 0x11c   : > { %v1018_v38 = vpop.f32.mrf.mxu0  ;;  %v1469_v11 = vpop.f32.mrf.mxu1  ;;  %8539 = vmatprep.mubr.f32.mxu1 %v10025_v10  ;;  %8638 = vmatprep.subr.mxu1 %v10192_v35 }
 0x11d   : > { %v10367_v14 = vadd.f32 %v8192_v53, %v1026_v26  ;;  %v1019_v41 = vadd.f32 %v1018_v38, %v10276_v6  ;;  %v3868_v6 = vrot.slane %v9972_v20, 1 }
 0x11e   : > { %v8169_v60 = vpop.f32.mrf.mxu0  ;;  %8480 = vmatmul.mubr.f32.gmra.mxu0 %v10227_v48  ;;  %v8229_v3 = vpop.f32.mrf.mxu1  ;;  %8540 = vmatmul.mubr.f32.gmra.mxu1 %v10044_v42 }
 0x11f   : > { %v10372_v51 = vadd.f32 %v1209_v8, %v1019_v41  ;;  %v1040_v49 = vadd.f32 %v8169_v60, %v10280_v46  ;;  %8510 = vmatprep.mubr.f32.mxu0 %v9994_v44  ;;  %8542 = vmatprep.mubr.f32.mxu1 %v10056_v25 }
 0x120   : > { %v1032_v16 = vpop.f32.mrf.mxu0  ;;  %v1481_v55 = vpop.f32.mrf.mxu1 }
 0x121   : > { %v10379_v39 = vadd.f32 %v8195_v37, %v1040_v49  ;;  %v1033_v48 = vadd.f32 %v1032_v16, %v10285_v36  ;;  %v3876_v36 = vsel %vm401_vm1, %v3860_v22, %v3868_v6  ;;  %v12252_v37 = vld [vmem:[#allocation130_spill] sm:$0xff] }
 0x122   : > { %v8200_v2 = vpop.f32.mrf.mxu0  ;;  %8511 = vmatmul.mubr.f32.vlgmr.msra.gmra.mxu0 %v10014_v13  ;;  %v8232_v50 = vpop.f32.mrf.mxu1  ;;  %8543 = vmatmul.mubr.f32.gmra.mxu1 %v10058_v15  ;;  %v3895_v57 = vsel %vm419_vm2, %v3876_v36, 0 }
 0x123   : > { %v10384_v46 = vadd.f32 %v1225_v43, %v1033_v48  ;;  %v1314_v44 = vadd.f32 %v8200_v2, %v10296_v18  ;;  %8561 = vmatpush3.msra.mxu0 %v10192_v35  ;;  %8513 = vmatprep.mubr.f32.mxu0 %v10025_v10  ;;  %v3884_v10 = vsel %vm401_vm1, %v3868_v6, %v3860_v22 }
 0x124   : > { %v1307_v61 = vpop.f32.mrf.mxu0  ;;  %v1493_v20 = vpop.f32.mrf.mxu1  ;;  %8545 = vmatprep.mubr.f32.mxu1 %v10060_v27  ;;  %8612 = vmatprep.subr.mxu0 %v10217_v54  ;;  %v3898_v8 = vsel %vm419_vm2, %v3884_v10, 0 }
 0x125   : > { %v10393_v13 = vadd.f32 %v8226_v19, %v1314_v44  ;;  %v1308_v7 = vadd.f32 %v1307_v61, %v10302_v40  ;;  %v10421_v1 = vand.u32 4294901760, %v3898_v8  ;;  %v12262_v44 = vld [vmem:[#allocation119_spill] sm:$0xff] }
 0x126   : > { %v8203_v52 = vpop.f32.mrf.mxu0  ;;  %8514 = vmatmul.mubr.f32.gmra.mxu0 %v10044_v42  ;;  %v8235_v18 = vpop.f32.mrf.mxu1  ;;  %8546 = vmatmul.mubr.f32.gmra.mxu1 %v10087_v23  ;;  %v3913_v61 = vsel %vm419_vm2, %v12262_v44, 0 }
 0x127   : > { %v10400_v34 = vadd.f32 %v1469_v11, %v1308_v7  ;;  %v1326_v53 = vadd.f32 %v8203_v52, %v10308_v63  ;;  %8516 = vmatprep.mubr.f32.mxu0 %v10056_v25  ;;  %8548 = vmatprep.mubr.f32.mxu1 %v12251_v29  ;;  %v10412_v63 = vand.u32 4294901760, %v3895_v57  ;;  %12255 = vst [vmem:[#allocation129_spill] sm:$0xff] %v10421_v1  ;;  %v12263_v7 = vld [vmem:[#allocation134_spill] sm:$0xff] }
 0x128   : > { %v1319_v40 = vpop.f32.mrf.mxu0  ;;  %v1505_v32 = vpop.f32.mrf.mxu1  ;;  %v10443_v6 = vsub.f32 %v3898_v8, %v10421_v1 }
 0x129   : > { %v10406_v58 = vadd.f32 %v8229_v3, %v1326_v53  ;;  %v1320_v42 = vadd.f32 %v1319_v40, %v10314_v33  ;;  %v3901_v33 = vsel %vm419_vm2, %v12254_v24, 0  ;;  %v12258_v3 = vld [vmem:[#allocation133_spill] sm:$0xff] }
 0x12a   : > { %v8206_v4 = vpop.f32.mrf.mxu0  ;;  %8517 = vmatmul.mubr.f32.gmra.mxu0 %v10058_v15  ;;  %v8238_v59 = vpop.f32.mrf.mxu1  ;;  %8549 = vmatmul.mubr.f32.gmra.mxu1 %v12252_v37  ;;  %v10431_v11 = vand.u32 4294901760, %v3901_v33  ;;  %v12012_v8 = vand.u32 4294901760, %v10443_v6 }
 0x12b   : > { %v10414_v25 = vadd.f32 %v1481_v55, %v1320_v42  ;;  %v1338_v5 = vadd.f32 %v8206_v4, %v10320_v47  ;;  %8519 = vmatprep.mubr.f32.mxu0 %v10060_v27  ;;  %8551 = vmatprep.mubr.f32.mxu1 %v12253_v45  ;;  %v12256_v47 = vld [vmem:[#allocation132_spill] sm:$0xff]  ;;  %v10429_v27 = vsub.f32 %v3895_v57, %v10412_v63 }
 0x12c   : > { %v1331_v43 = vpop.f32.mrf.mxu0  ;;  %v1517_v21 = vpop.f32.mrf.mxu1  ;;  %12257 = vst [vmem:[#allocation130_spill] sm:$0xff] %v10431_v11  ;;  %v10455_v52 = vsub.f32 %v3901_v33, %v10431_v11 }
 0x12d   : > { %v10423_v15 = vadd.f32 %v8232_v50, %v1338_v5  ;;  %v1332_v19 = vadd.f32 %v1331_v43, %v10326_v31  ;;  %v12259_v31 = vld [vmem:[#allocation116_spill] sm:$0xff]  ;;  %v12013_v57 = vand.u32 4294901760, %v10429_v27 }
 0x12e   : > { %v8209_v26 = vpop.f32.mrf.mxu0  ;;  %8520 = vmatmul.mubr.f32.gmra.mxu0 %v10087_v23  ;;  %v8241_v38 = vpop.f32.mrf.mxu1  ;;  %8552 = vmatmul.mubr.f32.gmra.mxu1 %v12256_v47  ;;  %v3904_v49 = vsel %vm419_vm2, %v12259_v31, 0  ;;  %v12260_v23 = vld [vmem:[#allocation117_spill] sm:$0xff]  ;;  %v12010_v43 = vand.u32 4294901760, %v10455_v52 }
 0x12f   : > { %v10433_v41 = vadd.f32 %v1493_v20, %v1332_v19  ;;  %v1350_v60 = vadd.f32 %v8209_v26, %v10332_v30  ;;  %8522 = vmatprep.mubr.f32.mxu0 %v12251_v29  ;;  %8554 = vmatprep.mubr.f32.mxu1 %v12258_v3  ;;  %v3907_v22 = vsel %vm419_vm2, %v12260_v23, 0  ;;  %v12261_v30 = vld [vmem:[#allocation118_spill] sm:$0xff]  ;;  %v10457_v10 = vand.u32 4294901760, %v3904_v49  ;;  %v12266_v29 = vld [vmem:[#allocation135_spill] sm:$0xff]  ;;  %v12270_v26 = vld [vmem:[#allocation121_spill] sm:$0xff] }
 0x130   : > { %v1343_v16 = vpop.f32.mrf.mxu0  ;;  %v1529_v55 = vpop.f32.mrf.mxu1  ;;  %v3910_v50 = vsel %vm419_vm2, %v12261_v30, 0 }
 0x131   : > { %v10445_v48 = vadd.f32 %v8235_v18, %v1350_v60  ;;  %v1344_v2 = vadd.f32 %v1343_v16, %v10338_v17  ;;  %12264 = vst [vmem:[#allocation131_spill] sm:$0xff] %v10457_v10  ;;  %v10459_v18 = vand.u32 4294901760, %v3907_v22  ;;  %v10470_v4 = vand.u32 4294901760, %v3910_v50 }
 0x132   : > { %v8212_v20 = vpop.f32.mrf.mxu0  ;;  %8523 = vmatmul.mubr.f32.gmra.mxu0 %v12252_v37  ;;  %v8244_v36 = vpop.f32.mrf.mxu1  ;;  %8555 = vmatmul.mubr.f32.gmra.mxu1 %v12263_v7  ;;  %v10472_v37 = vand.u32 4294901760, %v3913_v61  ;;  %v10485_v19 = vsub.f32 %v3904_v49, %v10457_v10 }
 0x133   : > { %12265 = vst [vmem:[#allocation115_spill] sm:$0xff] %v10459_v18  ;;  %v10461_v17 = vadd.f32 %v1505_v32, %v1344_v2  ;;  %v1362_v53 = vadd.f32 %v8212_v20, %v10344_v9  ;;  %8525 = vmatprep.mubr.f32.mxu0 %v12253_v45  ;;  %8557 = vmatprep.mubr.f32.mxu1 %v12266_v29  ;;  %12267 = vst [vmem:[#allocation132_spill] sm:$0xff] %v10470_v4  ;;  %v12269_v9 = vld [vmem:[#allocation120_spill] sm:$0xff] }
 0x134   : > { %v1355_v40 = vpop.f32.mrf.mxu0  ;;  %v10467_v42 = vpop.f32.mrf.mxu1  ;;  %12268 = vst [vmem:[#allocation133_spill] sm:$0xff] %v10472_v37  ;;  %v3916_v45 = vsel %vm419_vm2, %v12269_v9, 0  ;;  %v12274_v9 = vld [vmem:[#allocation123_spill] sm:$0xff] }
 0x135   : > { %v10474_v5 = vadd.f32 %v8238_v59, %v1362_v53  ;;  %v1356_v32 = vadd.f32 %v1355_v40, %v10350_v0  ;;  %v10488_v59 = vsub.f32 %v3907_v22, %v10459_v18  ;;  %v3919_v0 = vsel %vm419_vm2, %v12270_v26, 0  ;;  %v12273_v53 = vld [vmem:[#allocation122_spill] sm:$0xff] }
 0x136   : > { %v8215_v24 = vpop.f32.mrf.mxu0  ;;  %8526 = vmatmul.mubr.f32.gmra.mxu0 %v12256_v47  ;;  %v10480_v33 = vpop.f32.mrf.mxu1  ;;  %8558 = vmatmul.mubr.f32.gmra.mxu1 %v10204_v28  ;;  %v4014_v47 = vsub.f32 %v10429_v27, %v12013_v57  ;;  %v4024_v22 = vsub.f32 %v10443_v6, %v12012_v8  ;;  %v10516_v30 = vand.u32 4294901760, %v3919_v0 }
 0x137   : > { %v10492_v60 = vadd.f32 %v1517_v21, %v1356_v32  ;;  %v1374_v31 = vadd.f32 %v8215_v24, %v10355_v62  ;;  %8528 = vmatprep.mubr.f32.mxu0 %v12258_v3  ;;  %8588 = vmatprep.mubr.f32.mxu1 %v10412_v63  ;;  %v10506_v21 = vsub.f32 %v3910_v50, %v10470_v4  ;;  %v10511_v3 = vand.u32 4294901760, %v3916_v45 }
 0x138   : > { %v1367_v49 = vpop.f32.mrf.mxu0  ;;  %v10500_v23 = vpop.f32.mrf.mxu1  ;;  %v10509_v62 = vsub.f32 %v3913_v61, %v10472_v37  ;;  %12272 = vst [vmem:[#allocation117_spill] sm:$0xff] %v10516_v30  ;;  %v4034_v50 = vsub.f32 %v10455_v52, %v12010_v43  ;;  %v12011_v61 = vand.u32 4294901760, %v10485_v19  ;;  %v3925_v24 = vsel %vm419_vm2, %v12274_v9, 0 }
 0x139   : > { %12271 = vst [vmem:[#allocation116_spill] sm:$0xff] %v10511_v3  ;;  %v10513_v16 = vadd.f32 %v8241_v38, %v1374_v31  ;;  %v1368_v2 = vadd.f32 %v1367_v49, %v10360_v12  ;;  %v12014_v38 = vand.u32 4294901760, %v10488_v59  ;;  %v3922_v12 = vsel %vm419_vm2, %v12273_v53, 0 }
 0x13a   : > { %v8218_v44 = vpop.f32.mrf.mxu0  ;;  %8529 = vmatmul.mubr.f32.gmra.mxu0 %v12263_v7  ;;  %v10519_v20 = vpop.f32.mrf.mxu1  ;;  %8589 = vmatmul.mubr.f32.vlgmr.msra.gmra.mxu1 %v10421_v1  ;;  %v4015_v7 = vand.u32 4294901760, %v4014_v47  ;;  %v4025_v31 = vand.u32 4294901760, %v4024_v22  ;;  %v12015_v53 = vand.u32 4294901760, %v10506_v21  ;;  %v10551_v22 = vand.u32 4294901760, %v3922_v12 }
 0x13b   : > { %v10529_v40 = vadd.f32 %v1529_v55, %v1368_v2  ;;  %v1386_v32 = vadd.f32 %v8218_v44, %v10367_v14  ;;  %8531 = vmatprep.mubr.f32.mxu0 %v12266_v29  ;;  %8639 = vmatpush3.msra.mxu1 %v10192_v35  ;;  %v12017_v55 = vand.u32 4294901760, %v10509_v62  ;;  %v10542_v14 = vsub.f32 %v3916_v45, %v10511_v3 }
 0x13c   : > { %v1379_v26 = vpop.f32.mrf.mxu0  ;;  %v10536_v49 = vpop.f32.mrf.mxu1  ;;  %8591 = vmatprep.mubr.f32.mxu1 %v10431_v11  ;;  %8690 = vmatprep.subr.mxu1 %v10192_v35  ;;  %v10549_v2 = vsub.f32 %v3919_v0, %v10516_v30  ;;  %v4035_v9 = vand.u32 4294901760, %v4034_v50  ;;  %v4044_v45 = vsub.f32 %v10485_v19, %v12011_v61  ;;  %v12276_v50 = vld [vmem:[#allocation124_spill] sm:$0xff] }
 0x13d   : > { %v10545_v29 = vadd.f32 %v8244_v36, %v1386_v32  ;;  %v1380_v47 = vadd.f32 %v1379_v26, %v10372_v51  ;;  %v4054_v51 = vsub.f32 %v10488_v59, %v12014_v38  ;;  %v10563_v36 = vand.u32 4294901760, %v3925_v24  ;;  %v12277_v26 = vld [vmem:[#allocation125_spill] sm:$0xff] }
 0x13e   : > { %v8221_v44 = vpop.f32.mrf.mxu0  ;;  %8532 = vmatmul.mubr.f32.gmra.mxu0 %v10204_v28  ;;  %v10554_v43 = vpop.f32.mrf.mxu1  ;;  %8592 = vmatmul.mubr.f32.gmra.mxu1 %v10457_v10  ;;  %v3928_v32 = vsel %vm419_vm2, %v12276_v50, 0  ;;  %v3931_v61 = vsel %vm419_vm2, %v12277_v26, 0  ;;  %v4064_v38 = vsub.f32 %v10506_v21, %v12015_v53  ;;  %v10591_v50 = vsub.f32 %v3922_v12, %v10551_v22 }
 0x13f   : > { %12275 = vst [vmem:[#allocation118_spill] sm:$0xff] %v10563_v36  ;;  %v10566_v0 = vadd.f32 %v10467_v42, %v1380_v47  ;;  %v1398_v28 = vadd.f32 %v8221_v44, %v10379_v39  ;;  %8562 = vmatprep.mubr.f32.mxu0 %v4015_v7  ;;  %8594 = vmatprep.mubr.f32.mxu1 %v10459_v18  ;;  %v4045_v53 = vand.u32 4294901760, %v4044_v45  ;;  %v10599_v42 = vand.u32 4294901760, %v3928_v32 }
 0x140   : > { %v1391_v8 = vpop.f32.mrf.mxu0  ;;  %v10574_v57 = vpop.f32.mrf.mxu1  ;;  %v10582_v39 = vsub.f32 %v10509_v62, %v12017_v55  ;;  %v10597_v55 = vsub.f32 %v3925_v24, %v10563_v36  ;;  %v4055_v12 = vand.u32 4294901760, %v4054_v51  ;;  %v4065_v44 = vand.u32 4294901760, %v4064_v38 }
 0x141   : > { %v10586_v7 = vadd.f32 %v10480_v33, %v1398_v28  ;;  %v1392_v47 = vadd.f32 %v1391_v8, %v10384_v46  ;;  %v10601_v33 = vand.u32 4294901760, %v3931_v61  ;;  %v12280_v18 = vand.u32 4294901760, %v10542_v14 }
 0x142   : > { %v8252_v26 = vpop.f32.mrf.mxu0  ;;  %8563 = vmatmul.mubr.f32.vlgmr.msra.gmra.mxu0 %v4025_v31  ;;  %v10593_v56 = vpop.f32.mrf.mxu1  ;;  %8595 = vmatmul.mubr.f32.gmra.mxu1 %v10470_v4  ;;  %v12279_v31 = vld [vmem:[#allocation126_spill] sm:$0xff]  ;;  %v4075_v4 = vand.u32 4294901760, %v10582_v39  ;;  %v12283_v38 = vand.u32 4294901760, %v10549_v2 }
 0x143   : > { %12278 = vst [vmem:[#allocation119_spill] sm:$0xff] %v10601_v33  ;;  %v10604_v46 = vadd.f32 %v10500_v23, %v1392_v47  ;;  %v1695_v8 = vadd.f32 %v8252_v26, %v10393_v13  ;;  %8613 = vmatpush3.msra.mxu0 %v10217_v54  ;;  %8565 = vmatprep.mubr.f32.mxu0 %v4035_v9  ;;  %v3934_v45 = vsel %vm419_vm2, %v12279_v31, 0  ;;  %v12281_v47 = vld [vmem:[#allocation127_spill] sm:$0xff]  ;;  %v12282_v54 = vld [vmem:[#allocation136_spill] sm:$0xff] }
 0x144   : > { %v1684_v28 = vpop.f32.mrf.mxu0  ;;  %v1934_v24 = vpop.f32.mrf.mxu1  ;;  %8597 = vmatprep.mubr.f32.mxu1 %v10472_v37  ;;  %v4084_v23 = vsub.f32 %v10542_v14, %v12280_v18  ;;  %v3937_v13 = vsel %vm419_vm2, %v12281_v47, 0  ;;  %8664 = vmatprep.subr.mxu0 %v12282_v54  ;;  %v4094_v39 = vsub.f32 %v10549_v2, %v12283_v38  ;;  %v7472_v18 = vld [vmem:[%s11832_s2 + $0x10] sm:$0xff] }
 0x145   : > { %v10619_v9 = vadd.f32 %v10519_v20, %v1695_v8  ;;  %v1685_v51 = vadd.f32 %v1684_v28, %v10400_v34  ;;  %v10632_v8 = vsub.f32 %v3928_v32, %v10599_v42  ;;  %v10635_v34 = vsub.f32 %v3931_v61, %v10601_v33 }
 0x146   : > { %v8255_v31 = vpop.f32.mrf.mxu0  ;;  %8566 = vmatmul.mubr.f32.gmra.mxu0 %v4045_v53  ;;  %v8287_v47 = vpop.f32.mrf.mxu1  ;;  %8598 = vmatmul.mubr.f32.gmra.mxu1 %v10511_v3  ;;  %v10637_v28 = vand.u32 4294901760, %v3934_v45  ;;  %v10644_v53 = vand.u32 4294901760, %v3937_v13  ;;  %v12284_v3 = vld [vmem:[#allocation128_spill] sm:$0xff]  ;;  %v4085_v37 = vand.u32 4294901760, %v4084_v23  ;;  %v10648_v61 = vand.u32 4294901760, %v7472_v18 }
 0x147   : > { %v10640_v38 = vadd.f32 %v10536_v49, %v1685_v51  ;;  %v1715_v26 = vadd.f32 %v8255_v31, %v10406_v58  ;;  %8568 = vmatprep.mubr.f32.mxu0 %v4055_v12  ;;  %8600 = vmatprep.mubr.f32.mxu1 %v10516_v30  ;;  %v3940_v20 = vsel %vm419_vm2, %v12284_v3, 0  ;;  %v4095_v51 = vand.u32 4294901760, %v4094_v39 }
 0x148   : > { %v1704_v32 = vpop.f32.mrf.mxu0  ;;  %v1946_v10 = vpop.f32.mrf.mxu1  ;;  %v12285_v58 = vand.u32 4294901760, %v10591_v50  ;;  %v12286_v3 = vand.u32 4294901760, %v10597_v55 }
 0x149   : > { %v10651_v11 = vadd.f32 %v10554_v43, %v1715_v26  ;;  %v1705_v49 = vadd.f32 %v1704_v32, %v10414_v25  ;;  %v10663_v43 = vsub.f32 %v3934_v45, %v10637_v28  ;;  %v10665_v25 = vand.u32 4294901760, %v3940_v20 }
 0x14a   : > { %v4104_v12 = vsub.f32 %v10591_v50, %v12285_v58  ;;  %v8258_v31 = vpop.f32.mrf.mxu0  ;;  %8569 = vmatmul.mubr.f32.gmra.mxu0 %v4065_v44  ;;  %v8290_v30 = vpop.f32.mrf.mxu1  ;;  %8601 = vmatmul.mubr.f32.gmra.mxu1 %v10551_v22  ;;  %v4114_v23 = vsub.f32 %v10597_v55, %v12286_v3  ;;  %v10674_v32 = vsub.f32 %v3937_v13, %v10644_v53  ;;  %v12288_v44 = vand.u32 4294901760, %v10632_v8 }
 0x14b   : > { %12287 = vst [vmem:[#allocation134_spill] sm:$0xff] %v10665_v25  ;;  %v10668_v39 = vadd.f32 %v10574_v57, %v1705_v49  ;;  %v1735_v26 = vadd.f32 %v8258_v31, %v10423_v15  ;;  %8571 = vmatprep.mubr.f32.mxu0 %v4075_v4  ;;  %8603 = vmatprep.mubr.f32.mxu1 %v10563_v36  ;;  %v12038_v36 = vand.u32 4294901760, %v10663_v43 }
 0x14c   : > { %v1724_v58 = vpop.f32.mrf.mxu0  ;;  %v1958_v3 = vpop.f32.mrf.mxu1  ;;  %v10677_v45 = vsub.f32 %v7472_v18, %v10648_v61  ;;  %v4105_v49 = vand.u32 4294901760, %v4104_v12  ;;  %v4115_v4 = vand.u32 4294901760, %v4114_v23  ;;  %v4124_v13 = vsub.f32 %v10632_v8, %v12288_v44 }
 0x14d   : > { %v10680_v1 = vadd.f32 %v10593_v56, %v1735_v26  ;;  %v1725_v57 = vadd.f32 %v1724_v58, %v10433_v41  ;;  %v10689_v18 = vsub.f32 %v3940_v20, %v10665_v25 }
 0x14e   : > { %v8261_v15 = vpop.f32.mrf.mxu0  ;;  %8572 = vmatmul.mubr.f32.gmra.mxu0 %v4085_v37  ;;  %v8293_v31 = vpop.f32.mrf.mxu1  ;;  %8604 = vmatmul.mubr.f32.gmra.mxu1 %v10599_v42  ;;  %v12289_v37 = vand.u32 4294901760, %v10635_v34  ;;  %v10700_v58 = vand.u32 4294901760, %v10677_v45 }
 0x14f   : > { %v10691_v56 = vadd.f32 %v1934_v24, %v1725_v57  ;;  %v1755_v41 = vadd.f32 %v8261_v15, %v10445_v48  ;;  %8574 = vmatprep.mubr.f32.mxu0 %v4095_v51  ;;  %8606 = vmatprep.mubr.f32.mxu1 %v10601_v33  ;;  %v4125_v48 = vand.u32 4294901760, %v4124_v13  ;;  %v4144_v15 = vsub.f32 %v10663_v43, %v12038_v36 }
 0x150   : > { %v4134_v12 = vsub.f32 %v10635_v34, %v12289_v37  ;;  %v1744_v26 = vpop.f32.mrf.mxu0  ;;  %v1970_v44 = vpop.f32.mrf.mxu1  ;;  %12290 = vst [vmem:[#allocation135_spill] sm:$0xff] %v10700_v58  ;;  %v12041_v37 = vand.u32 4294901760, %v10689_v18 }
 0x151   : > { %v10702_v20 = vadd.f32 %v8287_v47, %v1755_v41  ;;  %v1745_v24 = vadd.f32 %v1744_v26, %v10461_v17  ;;  %v12291_v17 = vand.u32 4294901760, %v10674_v32  ;;  %v5320_v26 = vsub.f32 %v10677_v45, %v10700_v58 }
 0x152   : > { %v8264_v57 = vpop.f32.mrf.mxu0  ;;  %8575 = vmatmul.mubr.f32.gmra.mxu0 %v4105_v49  ;;  %v8296_v51 = vpop.f32.mrf.mxu1  ;;  %8607 = vmatmul.mubr.f32.gmra.mxu1 %v10637_v28  ;;  %v4135_v47 = vand.u32 4294901760, %v4134_v12  ;;  %v4164_v12 = vsub.f32 %v10689_v18, %v12041_v37 }
 0x153   : > { %v10710_v23 = vadd.f32 %v1946_v10, %v1745_v24  ;;  %v1775_v33 = vadd.f32 %v8264_v57, %v10474_v5  ;;  %8577 = vmatprep.mubr.f32.mxu0 %v4115_v4  ;;  %v4154_v49 = vsub.f32 %v10674_v32, %v12291_v17  ;;  %8609 = vmatprep.mubr.f32.mxu1 %v10644_v53  ;;  %v4145_v5 = vand.u32 4294901760, %v4144_v15 }
 0x154   : > { %v1764_v13 = vpop.f32.mrf.mxu0  ;;  %v1982_v41 = vpop.f32.mrf.mxu1 }
 0x155   : > { %v10719_v36 = vadd.f32 %v8290_v30, %v1775_v33  ;;  %v1765_v10 = vadd.f32 %v1764_v13, %v10492_v60  ;;  %v4155_v58 = vand.u32 4294901760, %v4154_v49  ;;  %v12292_v30 = vand.u32 4294901760, %v10429_v27 }
 0x156   : > { %v8267_v24 = vpop.f32.mrf.mxu0  ;;  %8578 = vmatmul.mubr.f32.gmra.mxu0 %v4125_v48  ;;  %v8299_v4 = vpop.f32.mrf.mxu1  ;;  %8610 = vmatmul.mubr.f32.gmra.mxu1 %v10665_v25  ;;  %v10731_v48 = vand.u32 4294901760, %v5320_v26  ;;  %v4165_v25 = vand.u32 4294901760, %v4164_v12  ;;  %v12295_v12 = vand.u32 4294901760, %v10485_v19 }
 0x157   : > { %v10726_v57 = vadd.f32 %v1958_v3, %v1765_v10  ;;  %v1795_v17 = vadd.f32 %v8267_v24, %v10513_v16  ;;  %8580 = vmatprep.mubr.f32.mxu0 %v4135_v47  ;;  %8640 = vmatprep.mubr.f32.mxu1 %v12292_v30  ;;  %v12293_v10 = vand.u32 4294901760, %v10443_v6 }
 0x158   : > { %v1784_v60 = vpop.f32.mrf.mxu0  ;;  %v1994_v33 = vpop.f32.mrf.mxu1 }
 0x159   : > { %v10733_v15 = vadd.f32 %v8293_v31, %v1795_v17  ;;  %v1785_v13 = vadd.f32 %v1784_v60, %v10529_v40  ;;  %v12294_v31 = vand.u32 4294901760, %v10455_v52 }
 0x15a   : > { %v8270_v37 = vpop.f32.mrf.mxu0  ;;  %8581 = vmatmul.mubr.f32.gmra.mxu0 %v4145_v5  ;;  %v8330_v3 = vpop.f32.mrf.mxu1  ;;  %8641 = vmatmul.mubr.f32.vlgmr.msra.gmra.mxu1 %v12293_v10 }
 0x15b   : > { %v10738_v16 = vadd.f32 %v1970_v44, %v1785_v13  ;;  %v1815_v47 = vadd.f32 %v8270_v37, %v10545_v29  ;;  %8583 = vmatprep.mubr.f32.mxu0 %v4155_v58  ;;  %8691 = vmatpush3.msra.mxu1 %v10192_v35  ;;  %v12296_v58 = vand.u32 4294901760, %v10488_v59  ;;  %v12298_v13 = vand.u32 4294901760, %v10509_v62 }
 0x15c   : > { %v1804_v49 = vpop.f32.mrf.mxu0  ;;  %v2253_v26 = vpop.f32.mrf.mxu1  ;;  %8643 = vmatprep.mubr.f32.mxu1 %v12294_v31  ;;  %8742 = vmatprep.subr.mxu1 %v10731_v48 }
 0x15d   : > { %v10745_v40 = vadd.f32 %v8296_v51, %v1815_v47  ;;  %v1805_v24 = vadd.f32 %v1804_v49, %v10566_v0  ;;  %v12300_v47 = vand.u32 4294901760, %v10549_v2 }
 0x15e   : > { %v8273_v5 = vpop.f32.mrf.mxu0  ;;  %8584 = vmatmul.mubr.f32.gmra.mxu0 %v4165_v25  ;;  %v8333_v44 = vpop.f32.mrf.mxu1  ;;  %8644 = vmatmul.mubr.f32.gmra.mxu1 %v12295_v12 }
 0x15f   : > { %v10750_v29 = vadd.f32 %v1982_v41, %v1805_v24  ;;  %v1835_v35 = vadd.f32 %v8273_v5, %v10586_v7  ;;  %8614 = vmatprep.mubr.f32.mxu0 %v10429_v27  ;;  %8646 = vmatprep.mubr.f32.mxu1 %v12296_v58  ;;  %v12297_v41 = vand.u32 4294901760, %v10506_v21 }
 0x160   : > { %v1824_v37 = vpop.f32.mrf.mxu0  ;;  %v2269_v51 = vpop.f32.mrf.mxu1 }
 0x161   : > { %v10756_v17 = vadd.f32 %v8299_v4, %v1835_v35  ;;  %v1825_v0 = vadd.f32 %v1824_v37, %v10604_v46  ;;  %v12303_v37 = vand.u32 4294901760, %v10632_v8 }
 0x162   : > { %v8304_v25 = vpop.f32.mrf.mxu0  ;;  %8615 = vmatmul.mubr.f32.vlgmr.msra.gmra.mxu0 %v10443_v6  ;;  %v8336_v30 = vpop.f32.mrf.mxu1  ;;  %8647 = vmatmul.mubr.f32.gmra.mxu1 %v12297_v41 }
 0x163   : > { %v10762_v60 = vadd.f32 %v1994_v33, %v1825_v0  ;;  %v2082_v27 = vadd.f32 %v8304_v25, %v10619_v9  ;;  %8665 = vmatpush3.msra.mxu0 %v12282_v54  ;;  %8617 = vmatprep.mubr.f32.mxu0 %v10455_v52  ;;  %v12299_v9 = vand.u32 4294901760, %v10542_v14 }
 0x164   : > { %v2074_v7 = vpop.f32.mrf.mxu0  ;;  %v2285_v4 = vpop.f32.mrf.mxu1  ;;  %8649 = vmatprep.mubr.f32.mxu1 %v12298_v13  ;;  %8716 = vmatprep.subr.mxu0 %v10648_v61 }
 0x165   : > { %v10770_v6 = vadd.f32 %v8330_v3, %v2082_v27  ;;  %v2075_v46 = vadd.f32 %v2074_v7, %v10640_v38  ;;  %v12305_v27 = vand.u32 4294901760, %v10663_v43 }
 0x166   : > { %v8307_v10 = vpop.f32.mrf.mxu0  ;;  %8618 = vmatmul.mubr.f32.gmra.mxu0 %v10485_v19  ;;  %v8339_v33 = vpop.f32.mrf.mxu1  ;;  %8650 = vmatmul.mubr.f32.gmra.mxu1 %v12299_v9 }
 0x167   : > { %v10776_v54 = vadd.f32 %v2253_v26, %v2075_v46  ;;  %v2096_v52 = vadd.f32 %v8307_v10, %v10651_v11  ;;  %8620 = vmatprep.mubr.f32.mxu0 %v10488_v59  ;;  %8652 = vmatprep.mubr.f32.mxu1 %v12300_v47  ;;  %v12301_v26 = vand.u32 4294901760, %v10591_v50  ;;  %v12302_v59 = vand.u32 4294901760, %v10597_v55 }
 0x168   : > { %v2088_v3 = vpop.f32.mrf.mxu0  ;;  %v2301_v49 = vpop.f32.mrf.mxu1 }
 0x169   : > { %v10782_v31 = vadd.f32 %v8333_v44, %v2096_v52  ;;  %v2089_v38 = vadd.f32 %v2088_v3, %v10668_v39 }
 0x16a   : > { %v8310_v19 = vpop.f32.mrf.mxu0  ;;  %8621 = vmatmul.mubr.f32.gmra.mxu0 %v10506_v21  ;;  %v8342_v24 = vpop.f32.mrf.mxu1  ;;  %8653 = vmatmul.mubr.f32.gmra.mxu1 %v12301_v26 }
 0x16b   : > { %v10788_v5 = vadd.f32 %v2269_v51, %v2089_v38  ;;  %v2110_v11 = vadd.f32 %v8310_v19, %v10680_v1  ;;  %8623 = vmatprep.mubr.f32.mxu0 %v10509_v62  ;;  %8655 = vmatprep.mubr.f32.mxu1 %v12302_v59  ;;  %v12304_v62 = vand.u32 4294901760, %v10635_v34  ;;  %v12310_v59 = vld [vmem:[#allocation131_spill] sm:$0xff] }
 0x16c   : > { %v2102_v44 = vpop.f32.mrf.mxu0  ;;  %v2317_v12 = vpop.f32.mrf.mxu1 }
 0x16d   : > { %v10794_v35 = vadd.f32 %v8336_v30, %v2110_v11  ;;  %v2103_v39 = vadd.f32 %v2102_v44, %v10691_v56 }
 0x16e   : > { %v8313_v21 = vpop.f32.mrf.mxu0  ;;  %8624 = vmatmul.mubr.f32.gmra.mxu0 %v10542_v14  ;;  %v8345_v58 = vpop.f32.mrf.mxu1  ;;  %8656 = vmatmul.mubr.f32.gmra.mxu1 %v12303_v37 }
 0x16f   : > { %v10800_v51 = vadd.f32 %v2285_v4, %v2103_v39  ;;  %v2124_v1 = vadd.f32 %v8313_v21, %v10702_v20  ;;  %8626 = vmatprep.mubr.f32.mxu0 %v10549_v2  ;;  %8658 = vmatprep.mubr.f32.mxu1 %v12304_v62  ;;  %v12306_v20 = vand.u32 4294901760, %v10674_v32  ;;  %v12313_v62 = vld [vmem:[#allocation133_spill] sm:$0xff] }
 0x170   : > { %v2116_v0 = vpop.f32.mrf.mxu0  ;;  %v2333_v25 = vpop.f32.mrf.mxu1 }
 0x171   : > { %v10806_v30 = vadd.f32 %v8339_v33, %v2124_v1  ;;  %v2117_v56 = vadd.f32 %v2116_v0, %v10710_v23  ;;  %v12307_v33 = vand.u32 4294901760, %v10689_v18 }
 0x172   : > { %v8316_v14 = vpop.f32.mrf.mxu0  ;;  %8627 = vmatmul.mubr.f32.gmra.mxu0 %v10591_v50  ;;  %v8348_v41 = vpop.f32.mrf.mxu1  ;;  %8659 = vmatmul.mubr.f32.gmra.mxu1 %v12305_v27  ;;  %v12315_v27 = vld [vmem:[#allocation117_spill] sm:$0xff] }
 0x173   : > { %v10812_v7 = vadd.f32 %v2301_v49, %v2117_v56  ;;  %v2138_v2 = vadd.f32 %v8316_v14, %v10719_v36  ;;  %8629 = vmatprep.mubr.f32.mxu0 %v10597_v55  ;;  %8661 = vmatprep.mubr.f32.mxu1 %v12306_v20  ;;  %v12308_v49 = vld [vmem:[#allocation129_spill] sm:$0xff]  ;;  %v12314_v14 = vld [vmem:[#allocation116_spill] sm:$0xff] }
 0x174   : > { %v2130_v4 = vpop.f32.mrf.mxu0  ;;  %v2349_v13 = vpop.f32.mrf.mxu1 }
 0x175   : > { %v10818_v46 = vadd.f32 %v8342_v24, %v2138_v2  ;;  %v2131_v23 = vadd.f32 %v2130_v4, %v10726_v57  ;;  %v12309_v24 = vld [vmem:[#allocation130_spill] sm:$0xff] }
 0x176   : > { %v8319_v50 = vpop.f32.mrf.mxu0  ;;  %8630 = vmatmul.mubr.f32.gmra.mxu0 %v10632_v8  ;;  %v8351_v10 = vpop.f32.mrf.mxu1  ;;  %8662 = vmatmul.mubr.f32.gmra.mxu1 %v12307_v33 }
 0x177   : > { %v10824_v9 = vadd.f32 %v2317_v12, %v2131_v23  ;;  %v2152_v55 = vadd.f32 %v8319_v50, %v10733_v15  ;;  %8632 = vmatprep.mubr.f32.mxu0 %v10635_v34  ;;  %8692 = vmatprep.mubr.f32.mxu1 %v10412_v63 }
 0x178   : > { %v2144_v36 = vpop.f32.mrf.mxu0  ;;  %v2365_v52 = vpop.f32.mrf.mxu1 }
 0x179   : > { %v10829_v47 = vadd.f32 %v8345_v58, %v2152_v55  ;;  %v2145_v57 = vadd.f32 %v2144_v36, %v10738_v16  ;;  %v12312_v58 = vld [vmem:[#allocation132_spill] sm:$0xff]  ;;  %v10888_v55 = vld [vmem:[%s333_s14] sm:$0xff]  ;;  %v10890_v36 = vld [vmem:[%s333_s14 + $0x8] sm:$0xff] }
 0x17a   : > { %v8322_v3 = vpop.f32.mrf.mxu0  ;;  %8633 = vmatmul.mubr.f32.gmra.mxu0 %v10663_v43  ;;  %v8382_v8 = vpop.f32.mrf.mxu1  ;;  %8693 = vmatmul.mubr.f32.vlgmr.msra.gmra.mxu1 %v12308_v49 }
 0x17b   : > { %v10834_v38 = vadd.f32 %v2333_v25, %v2145_v57  ;;  %v2166_v15 = vadd.f32 %v8322_v3, %v10745_v40  ;;  %8635 = vmatprep.mubr.f32.mxu0 %v10674_v32  ;;  %8743 = vmatpush3.msra.mxu1 %v10731_v48  ;;  %v12311_v48 = vld [vmem:[#allocation115_spill] sm:$0xff]  ;;  %v6167_v3 = vrot.slane %v10888_v55, 1 }
 0x17c   : > { %v2158_v34 = vpop.f32.mrf.mxu0  ;;  %v2609_v19 = vpop.f32.mrf.mxu1  ;;  %8695 = vmatprep.mubr.f32.mxu1 %v12309_v24  ;;  %8794 = vmatprep.subr.mxu1 %v10648_v61 }
 0x17d   : > { %v10841_v16 = vadd.f32 %v8348_v41, %v2166_v15  ;;  %v2159_v43 = vadd.f32 %v2158_v34, %v10750_v29 }
 0x17e   : > { %v8325_v26 = vpop.f32.mrf.mxu0  ;;  %8636 = vmatmul.mubr.f32.gmra.mxu0 %v10689_v18  ;;  %v8385_v11 = vpop.f32.mrf.mxu1  ;;  %8696 = vmatmul.mubr.f32.gmra.mxu1 %v12310_v59 }
 0x17f   : > { %v10846_v40 = vadd.f32 %v2349_v13, %v2159_v43  ;;  %v2180_v32 = vadd.f32 %v8325_v26, %v10756_v17  ;;  %8666 = vmatprep.mubr.f32.mxu0 %v10412_v63  ;;  %8698 = vmatprep.mubr.f32.mxu1 %v12311_v48 }
 0x180   : > { %v2172_v44 = vpop.f32.mrf.mxu0  ;;  %v2621_v12 = vpop.f32.mrf.mxu1 }
 0x181   : > { %v10851_v39 = vadd.f32 %v8351_v10, %v2180_v32  ;;  %v2173_v29 = vadd.f32 %v2172_v44, %v10762_v60  ;;  %v12316_v10 = vld [vmem:[#allocation118_spill] sm:$0xff] }
 0x182   : > { %v8356_v21 = vpop.f32.mrf.mxu0  ;;  %8667 = vmatmul.mubr.f32.vlgmr.msra.gmra.mxu0 %v12308_v49  ;;  %v8388_v18 = vpop.f32.mrf.mxu1  ;;  %8699 = vmatmul.mubr.f32.gmra.mxu1 %v12312_v58 }
 0x183   : > { %v10856_v37 = vadd.f32 %v2365_v52, %v2173_v29  ;;  %v2454_v17 = vadd.f32 %v8356_v21, %v10770_v6  ;;  %8717 = vmatpush3.msra.mxu0 %v10648_v61  ;;  %8669 = vmatprep.mubr.f32.mxu0 %v12309_v24 }
 0x184   : > { %v2447_v63 = vpop.f32.mrf.mxu0  ;;  %v2633_v1 = vpop.f32.mrf.mxu1  ;;  %8701 = vmatprep.mubr.f32.mxu1 %v12313_v62  ;;  %8768 = vmatprep.subr.mxu0 %v10677_v45 }
 0x185   : > { %v10863_v60 = vadd.f32 %v8382_v8, %v2454_v17  ;;  %v2448_v0 = vadd.f32 %v2447_v63, %v10776_v54  ;;  %v6168_v8 = vrot.slane %v10890_v36, 1  ;;  %v12322_v17 = vld [vmem:[#allocation134_spill] sm:$0xff] }
 0x186   : > { %v8359_v25 = vpop.f32.mrf.mxu0  ;;  %8670 = vmatmul.mubr.f32.gmra.mxu0 %v12310_v59  ;;  %v8391_v56 = vpop.f32.mrf.mxu1  ;;  %8702 = vmatmul.mubr.f32.gmra.mxu1 %v12314_v14 }
 0x187   : > { %v10870_v6 = vadd.f32 %v2609_v19, %v2448_v0  ;;  %v2466_v41 = vadd.f32 %v8359_v25, %v10782_v31  ;;  %8672 = vmatprep.mubr.f32.mxu0 %v12311_v48  ;;  %8704 = vmatprep.mubr.f32.mxu1 %v12315_v27  ;;  %v12317_v19 = vld [vmem:[#allocation119_spill] sm:$0xff]  ;;  %v10909_v59 = vsel %vm401_vm1, %v6167_v3, %v6168_v8 }
 0x188   : > { %v2459_v2 = vpop.f32.mrf.mxu0  ;;  %v2645_v20 = vpop.f32.mrf.mxu1  ;;  %12319 = vst [vmem:[#allocation120_spill] sm:$0xff] %v10909_v59 }
 0x189   : > { %v10875_v4 = vadd.f32 %v8385_v11, %v2466_v41  ;;  %v2460_v54 = vadd.f32 %v2459_v2, %v10788_v5  ;;  %v5055_v11 = vsel %vm1563_vm3, %v10888_v55, 0  ;;  %v5058_v55 = vsel %vm1563_vm3, %v10890_v36, 0 }
 0x18a   : > { %v8362_v13 = vpop.f32.mrf.mxu0  ;;  %8673 = vmatmul.mubr.f32.gmra.mxu0 %v12312_v58  ;;  %v8394_v23 = vpop.f32.mrf.mxu1  ;;  %8705 = vmatmul.mubr.f32.gmra.mxu1 %v10551_v22 }
 0x18b   : > { %v10883_v31 = vadd.f32 %v2621_v12, %v2460_v54  ;;  %v2478_v50 = vadd.f32 %v8362_v13, %v10794_v35  ;;  %8675 = vmatprep.mubr.f32.mxu0 %v12313_v62  ;;  %8707 = vmatprep.mubr.f32.mxu1 %v12316_v10 }
 0x18c   : > { %v2471_v33 = vpop.f32.mrf.mxu0  ;;  %v2657_v5 = vpop.f32.mrf.mxu1 }
 0x18d   : > { %v10892_v52 = vadd.f32 %v8388_v18, %v2478_v50  ;;  %v2472_v57 = vadd.f32 %v2471_v33, %v10800_v51  ;;  %v12332_v50 = vld [vmem:[#allocation85_spill] sm:$0xff] }
 0x18e   : > { %v8365_v49 = vpop.f32.mrf.mxu0  ;;  %8676 = vmatmul.mubr.f32.gmra.mxu0 %v12314_v14  ;;  %v8397_v35 = vpop.f32.mrf.mxu1  ;;  %8708 = vmatmul.mubr.f32.gmra.mxu1 %v10599_v42  ;;  %v12326_v14 = vld [vmem:[#allocation72_spill] sm:$0xff] }
 0x18f   : > { %v10899_v15 = vadd.f32 %v2633_v1, %v2472_v57  ;;  %v2490_v34 = vadd.f32 %v8365_v49, %v10806_v30  ;;  %8678 = vmatprep.mubr.f32.mxu0 %v12315_v27  ;;  %8710 = vmatprep.mubr.f32.mxu1 %v12317_v19  ;;  %v10915_v30 = vsel %vm401_vm1, %v6168_v8, %v6167_v3  ;;  %v12324_v1 = vld [vmem:[#allocation71_spill] sm:$0xff] }
 0x190   : > { %v2483_v24 = vpop.f32.mrf.mxu0  ;;  %v2669_v51 = vpop.f32.mrf.mxu1  ;;  %12320 = vst [vmem:[#allocation121_spill] sm:$0xff] %v10915_v30  ;;  %v12335_v8 = vld [vmem:[#allocation23_spill] sm:$0xff] }
 0x191   : > { %v10904_v43 = vadd.f32 %v8391_v56, %v2490_v34  ;;  %v2484_v26 = vadd.f32 %v2483_v24, %v10812_v7  ;;  %v12338_v24 = vld [vmem:[#allocation90_spill] sm:$0xff] }
 0x192   : > { %v8368_v32 = vpop.f32.mrf.mxu0  ;;  %8679 = vmatmul.mubr.f32.gmra.mxu0 %v10551_v22  ;;  %v8400_v48 = vpop.f32.mrf.mxu1  ;;  %8711 = vmatmul.mubr.f32.gmra.mxu1 %v10637_v28 }
 0x193   : > { %v10917_v44 = vadd.f32 %v2645_v20, %v2484_v26  ;;  %v2502_v12 = vadd.f32 %v8368_v32, %v10818_v46  ;;  %8681 = vmatprep.mubr.f32.mxu0 %v12316_v10  ;;  %8713 = vmatprep.mubr.f32.mxu1 %v10644_v53  ;;  %v12328_v20 = vld [vmem:[#allocation4_spill] sm:$0xff]  ;;  %v12333_v10 = vld [vmem:[#allocation74_spill] sm:$0xff]  ;;  %v12340_v32 = vld [vmem:[#allocation135_spill] sm:$0xff] }
 0x194   : > { %v2495_v7 = vpop.f32.mrf.mxu0  ;;  %v2681_v29 = vpop.f32.mrf.mxu1  ;;  %v12339_v26 = vld [vmem:[#allocation80_spill] sm:$0xff] }
 0x195   : > { %v10922_v21 = vadd.f32 %v8394_v23, %v2502_v12  ;;  %v2496_v22 = vadd.f32 %v2495_v7, %v10824_v9  ;;  %v12330_v23 = vld [vmem:[#allocation73_spill] sm:$0xff] }
 0x196   : > { %v8371_v18 = vpop.f32.mrf.mxu0  ;;  %8682 = vmatmul.mubr.f32.gmra.mxu0 %v10599_v42  ;;  %v8403_v58 = vpop.f32.mrf.mxu1  ;;  %8714 = vmatmul.mubr.f32.gmra.mxu1 %v12322_v17 }
 0x197   : > { %12321 = vst [vmem:[#allocation122_spill] sm:$0xff] %v10922_v21  ;;  %v10927_v63 = vadd.f32 %v2657_v5, %v2496_v22  ;;  %v2514_v46 = vadd.f32 %v8371_v18, %v10829_v47  ;;  %8684 = vmatprep.mubr.f32.mxu0 %v12317_v19  ;;  %8744 = vmatprep.mubr.f32.mxu1 %v12324_v1 }
 0x198   : > { %v2507_v62 = vpop.f32.mrf.mxu0  ;;  %v2693_v0 = vpop.f32.mrf.mxu1 }
 0x199   : > { %12323 = vst [vmem:[#allocation123_spill] sm:$0xff] %v10927_v63  ;;  %v10932_v25 = vadd.f32 %v8397_v35, %v2514_v46  ;;  %v2508_v9 = vadd.f32 %v2507_v62, %v10834_v38  ;;  %v12336_v35 = vld [vmem:[#allocation78_spill] sm:$0xff]  ;;  %v10981_v46 = vand.u32 4294901760, %v5055_v11  ;;  %v12372_v63 = vld [vmem:[#allocation57_spill] sm:$0xff] }
 0x19a   : > { %v8374_v56 = vpop.f32.mrf.mxu0  ;;  %8685 = vmatmul.mubr.f32.gmra.mxu0 %v10637_v28  ;;  %v8434_v42 = vpop.f32.mrf.mxu1  ;;  %8745 = vmatmul.mubr.f32.vlgmr.msra.gmra.mxu1 %v12326_v14 }
 0x19b   : > { %12325 = vst [vmem:[#allocation124_spill] sm:$0xff] %v10932_v25  ;;  %v10937_v41 = vadd.f32 %v2669_v51, %v2508_v9  ;;  %v2526_v47 = vadd.f32 %v8374_v56, %v10841_v16  ;;  %8687 = vmatprep.mubr.f32.mxu0 %v10644_v53  ;;  %8795 = vmatpush3.msra.mxu1 %v10648_v61  ;;  %v12362_v25 = vld [vmem:[#allocation79_spill] sm:$0xff] }
 0x19c   : > { %v2519_v27 = vpop.f32.mrf.mxu0  ;;  %v3051_v2 = vpop.f32.mrf.mxu1  ;;  %8747 = vmatprep.mubr.f32.mxu1 %v12328_v20  ;;  %8846 = vmatprep.subr.mxu1 %v10648_v61  ;;  %v10998_v36 = vsub.f32 %v5055_v11, %v10981_v46  ;;  %v12352_v11 = vld [vmem:[#allocation107_spill] sm:$0xff] }
 0x19d   : > { %12327 = vst [vmem:[#allocation125_spill] sm:$0xff] %v10937_v41  ;;  %v10944_v38 = vadd.f32 %v8400_v48, %v2526_v47  ;;  %v2520_v28 = vadd.f32 %v2519_v27, %v10846_v40  ;;  %v12345_v47 = vld [vmem:[#allocation47_spill] sm:$0xff] }
 0x19e   : > { %v8377_v54 = vpop.f32.mrf.mxu0  ;;  %8688 = vmatmul.mubr.f32.gmra.mxu0 %v12322_v17  ;;  %v8437_v13 = vpop.f32.mrf.mxu1  ;;  %8748 = vmatmul.mubr.f32.gmra.mxu1 %v12330_v23  ;;  %v12344_v17 = vld [vmem:[#allocation86_spill] sm:$0xff] }
 0x19f   : > { %12329 = vst [vmem:[#allocation126_spill] sm:$0xff] %v10944_v38  ;;  %v10949_v16 = vadd.f32 %v2681_v29, %v2520_v28  ;;  %v2538_v53 = vadd.f32 %v8377_v54, %v10851_v39  ;;  %8718 = vmatprep.mubr.f32.mxu0 %v12332_v50  ;;  %8750 = vmatprep.mubr.f32.mxu1 %v12333_v10  ;;  %v7473_v39 = vld [vmem:[%s11833_s3 + $0x8] sm:$0xf]  ;;  %v12341_v29 = vld [vmem:[#allocation33_spill] sm:$0xff]  ;;  %v10991_v28 = vand.u32 4294901760, %v5058_v55  ;;  %v12361_v38 = vld [vmem:[#allocation114_spill] sm:$0xff] }
 0x1a0   : > { %v2531_v33 = vpop.f32.mrf.mxu0  ;;  %v3063_v5 = vpop.f32.mrf.mxu1  ;;  %v6180_v12 = vsel %vm468_vm0, %v7473_v39, 0 }
 0x1a1   : > { %12331 = vst [vmem:[#allocation127_spill] sm:$0xff] %v10949_v16  ;;  %v10954_v57 = vadd.f32 %v8403_v58, %v2538_v53  ;;  %v2532_v40 = vadd.f32 %v2531_v33, %v10856_v37  ;;  %v12343_v58 = vld [vmem:[#allocation34_spill] sm:$0xff]  ;;  %v10985_v9 = vand.u32 4294901760, %v6180_v12  ;;  %12347 = vst [vmem:[#allocation129_spill] sm:$0xff] %v10991_v28  ;;  %v12349_v53 = vld [vmem:[#allocation92_spill] sm:$0xff] }
 0x1a2   : > { %v8408_v3 = vpop.f32.mrf.mxu0  ;;  %8719 = vmatmul.mubr.f32.vlgmr.msra.gmra.mxu0 %v12335_v8  ;;  %v8440_v49 = vpop.f32.mrf.mxu1  ;;  %8751 = vmatmul.mubr.f32.gmra.mxu1 %v12336_v35  ;;  %v12350_v8 = vld [vmem:[#allocation104_spill] sm:$0xff] }
 0x1a3   : > { %12334 = vst [vmem:[#allocation136_spill] sm:$0xff] %v10954_v57  ;;  %v10962_v34 = vadd.f32 %v2693_v0, %v2532_v40  ;;  %v10964_v19 = vadd.f32 %v8434_v42, %v8408_v3  ;;  %8769 = vmatpush3.msra.mxu0 %v10677_v45  ;;  %8721 = vmatprep.mubr.f32.mxu0 %v12338_v24  ;;  %v12342_v45 = vld [vmem:[#allocation84_spill] sm:$0xff]  ;;  %v12360_v57 = vld [vmem:[#allocation7_spill] sm:$0xff] }
 0x1a4   : > { %v2825_v51 = vpop.f32.mrf.mxu0  ;;  %v3075_v37 = vpop.f32.mrf.mxu1  ;;  %8753 = vmatprep.mubr.f32.mxu1 %v12339_v26  ;;  %8820 = vmatprep.subr.mxu0 %v12340_v32  ;;  %v11008_v24 = vsub.f32 %v5058_v55, %v10991_v28 }
 0x1a5   : > { %12337 = vst [vmem:[#allocation128_spill] sm:$0xff] %v10962_v34  ;;  %v10972_v48 = vadd.f32 %v3051_v2, %v2825_v51  ;;  %v12346_v2 = vld [vmem:[#allocation89_spill] sm:$0xff]  ;;  %v12358_v34 = vld [vmem:[#allocation112_spill] sm:$0xff] }
 0x1a6   : > { %v8411_v7 = vpop.f32.mrf.mxu0  ;;  %8722 = vmatmul.mubr.f32.gmra.mxu0 %v12341_v29  ;;  %v8443_v22 = vpop.f32.mrf.mxu1  ;;  %8754 = vmatmul.mubr.f32.gmra.mxu1 %v12342_v45 }
 0x1a7   : > { %v10977_v18 = vadd.f32 %v8437_v13, %v8411_v7  ;;  %8724 = vmatprep.mubr.f32.mxu0 %v12343_v58  ;;  %8756 = vmatprep.mubr.f32.mxu1 %v12344_v17  ;;  %v12348_v13 = vld [vmem:[#allocation101_spill] sm:$0xff] }
 0x1a8   : > { %v2845_v62 = vpop.f32.mrf.mxu0  ;;  %v3087_v0 = vpop.f32.mrf.mxu1  ;;  %v12353_v7 = vld [vmem:[#allocation97_spill] sm:$0xff] }
 0x1a9   : > { %v10987_v56 = vadd.f32 %v3063_v5, %v2845_v62  ;;  %v11001_v5 = vsub.f32 %v6180_v12, %v10985_v9  ;;  %v12044_v12 = vand.u32 4294901760, %v10998_v36 }
 0x1aa   : > { %v8414_v42 = vpop.f32.mrf.mxu0  ;;  %8725 = vmatmul.mubr.f32.gmra.mxu0 %v12345_v47  ;;  %v8446_v27 = vpop.f32.mrf.mxu1  ;;  %8757 = vmatmul.mubr.f32.gmra.mxu1 %v12346_v2  ;;  %v12355_v47 = vld [vmem:[#allocation109_spill] sm:$0xff] }
 0x1ab   : > { %v10993_v54 = vadd.f32 %v8440_v49, %v8414_v42  ;;  %8727 = vmatprep.mubr.f32.mxu0 %v12348_v13  ;;  %8759 = vmatprep.mubr.f32.mxu1 %v12349_v53  ;;  %v12351_v49 = vld [vmem:[#allocation94_spill] sm:$0xff]  ;;  %v11016_v58 = vand.u32 4294901760, %v11001_v5  ;;  %v12356_v13 = vld [vmem:[#allocation100_spill] sm:$0xff] }
 0x1ac   : > { %v2865_v50 = vpop.f32.mrf.mxu0  ;;  %v3099_v33 = vpop.f32.mrf.mxu1 }
 0x1ad   : > { %v11003_v40 = vadd.f32 %v3075_v37, %v2865_v50  ;;  %12354 = vst [vmem:[#allocation130_spill] sm:$0xff] %v11016_v58 }
 0x1ae   : > { %v8417_v3 = vpop.f32.mrf.mxu0  ;;  %8728 = vmatmul.mubr.f32.gmra.mxu0 %v12350_v8  ;;  %v8449_v39 = vpop.f32.mrf.mxu1  ;;  %8760 = vmatmul.mubr.f32.gmra.mxu1 %v12351_v49  ;;  %v5269_v8 = vsub.f32 %v10998_v36, %v12044_v12  ;;  %v12359_v12 = vld [vmem:[#allocation113_spill] sm:$0xff] }
 0x1af   : > { %v11010_v51 = vadd.f32 %v8443_v22, %v8417_v3  ;;  %8730 = vmatprep.mubr.f32.mxu0 %v12352_v11  ;;  %8762 = vmatprep.mubr.f32.mxu1 %v12353_v7  ;;  %v12047_v22 = vand.u32 4294901760, %v11008_v24  ;;  %v12357_v3 = vld [vmem:[#allocation111_spill] sm:$0xff] }
 0x1b0   : > { %v2885_v29 = vpop.f32.mrf.mxu0  ;;  %v3111_v37 = vpop.f32.mrf.mxu1  ;;  %v5270_v59 = vand.u32 4294901760, %v5269_v8  ;;  %v12364_v8 = vld [vmem:[#allocation19_spill] sm:$0xff] }
 0x1b1   : > { %v11018_v62 = vadd.f32 %v3087_v0, %v2885_v29  ;;  %v6442_v29 = vsub.f32 %v11001_v5, %v11016_v58 }
 0x1b2   : > { %v8420_v42 = vpop.f32.mrf.mxu0  ;;  %8731 = vmatmul.mubr.f32.gmra.mxu0 %v12355_v47  ;;  %v8452_v55 = vpop.f32.mrf.mxu1  ;;  %8763 = vmatmul.mubr.f32.gmra.mxu1 %v12356_v13 }
 0x1b3   : > { %v11023_v50 = vadd.f32 %v8446_v27, %v8420_v42  ;;  %8733 = vmatprep.mubr.f32.mxu0 %v12357_v3  ;;  %8765 = vmatprep.mubr.f32.mxu1 %v10981_v46  ;;  %v5279_v42 = vsub.f32 %v11008_v24, %v12047_v22 }
 0x1b4   : > { %v2905_v0 = vpop.f32.mrf.mxu0  ;;  %v3123_v11 = vpop.f32.mrf.mxu1 }
 0x1b5   : > { %v11032_v47 = vadd.f32 %v3099_v33, %v2905_v0  ;;  %v11043_v0 = vand.u32 4294901760, %v6442_v29  ;;  %v5280_v41 = vand.u32 4294901760, %v5279_v42 }
 0x1b6   : > { %v8423_v30 = vpop.f32.mrf.mxu0  ;;  %8734 = vmatmul.mubr.f32.gmra.mxu0 %v12358_v34  ;;  %v8455_v27 = vpop.f32.mrf.mxu1  ;;  %8766 = vmatmul.mubr.f32.gmra.mxu1 %v10991_v28  ;;  %v12376_v28 = vld [vmem:[#allocation98_spill] sm:$0xff] }
 0x1b7   : > { %v11039_v3 = vadd.f32 %v8449_v39, %v8423_v30  ;;  %8736 = vmatprep.mubr.f32.mxu0 %v12359_v12  ;;  %8796 = vmatprep.mubr.f32.mxu1 %v12360_v57  ;;  %v12363_v12 = vld [vmem:[#allocation81_spill] sm:$0xff] }
 0x1b8   : > { %v2925_v58 = vpop.f32.mrf.mxu0  ;;  %v3135_v33 = vpop.f32.mrf.mxu1 }
 0x1b9   : > { %v11045_v16 = vadd.f32 %v3111_v37, %v2925_v58 }
 0x1ba   : > { %v8426_v34 = vpop.f32.mrf.mxu0  ;;  %8737 = vmatmul.mubr.f32.gmra.mxu0 %v12361_v38  ;;  %v8486_v22 = vpop.f32.mrf.mxu1  ;;  %8797 = vmatmul.mubr.f32.vlgmr.msra.gmra.mxu1 %v12362_v25  ;;  %v12365_v25 = vld [vmem:[#allocation3_spill] sm:$0xff] }
 0x1bb   : > { %v11049_v30 = vadd.f32 %v8452_v55, %v8426_v34  ;;  %8739 = vmatprep.mubr.f32.mxu0 %v5270_v59  ;;  %8847 = vmatpush3.msra.mxu1 %v10648_v61  ;;  %v12366_v59 = vld [vmem:[#allocation20_spill] sm:$0xff] }
 0x1bc   : > { %v2945_v39 = vpop.f32.mrf.mxu0  ;;  %v3394_v57 = vpop.f32.mrf.mxu1  ;;  %8799 = vmatprep.mubr.f32.mxu1 %v12363_v12  ;;  %8898 = vmatprep.subr.mxu1 %v11043_v0  ;;  %v12367_v12 = vld [vmem:[#allocation75_spill] sm:$0xff] }
 0x1bd   : > { %v11054_v37 = vadd.f32 %v3123_v11, %v2945_v39  ;;  %v12368_v39 = vld [vmem:[#allocation21_spill] sm:$0xff] }
 0x1be   : > { %v8429_v58 = vpop.f32.mrf.mxu0  ;;  %8740 = vmatmul.mubr.f32.gmra.mxu0 %v5280_v41  ;;  %v8489_v38 = vpop.f32.mrf.mxu1  ;;  %8800 = vmatmul.mubr.f32.gmra.mxu1 %v12364_v8 }
 0x1bf   : > { %v11057_v29 = vadd.f32 %v8455_v27, %v8429_v58  ;;  %8770 = vmatprep.mubr.f32.mxu0 %v12365_v25  ;;  %8802 = vmatprep.mubr.f32.mxu1 %v12366_v59  ;;  %v12369_v27 = vld [vmem:[#allocation76_spill] sm:$0xff]  ;;  %v12370_v25 = vld [vmem:[#allocation87_spill] sm:$0xff] }
 0x1c0   : > { %v2965_v61 = vpop.f32.mrf.mxu0  ;;  %v3410_v55 = vpop.f32.mrf.mxu1 }
 0x1c1   : > { %v11061_v42 = vadd.f32 %v3135_v33, %v2965_v61 }
 0x1c2   : > { %v8460_v34 = vpop.f32.mrf.mxu0  ;;  %8771 = vmatmul.mubr.f32.vlgmr.msra.gmra.mxu0 %v12367_v12  ;;  %v8492_v11 = vpop.f32.mrf.mxu1  ;;  %8803 = vmatmul.mubr.f32.gmra.mxu1 %v12368_v39  ;;  %v12371_v12 = vld [vmem:[#allocation8_spill] sm:$0xff] }
 0x1c3   : > { %v3223_v41 = vadd.f32 %v8460_v34, %v10964_v19  ;;  %8821 = vmatpush3.msra.mxu0 %v12340_v32  ;;  %8773 = vmatprep.mubr.f32.mxu0 %v12369_v27  ;;  %v12373_v34 = vld [vmem:[#allocation77_spill] sm:$0xff]  ;;  %v12374_v27 = vld [vmem:[#allocation95_spill] sm:$0xff] }
 0x1c4   : > { %v3215_v58 = vpop.f32.mrf.mxu0  ;;  %v3426_v8 = vpop.f32.mrf.mxu1  ;;  %8805 = vmatprep.mubr.f32.mxu1 %v12370_v25  ;;  %8872 = vmatprep.subr.mxu0 %v10985_v9 }
 0x1c5   : > { %v11070_v33 = vadd.f32 %v8486_v22, %v3223_v41  ;;  %v3216_v59 = vadd.f32 %v3215_v58, %v10972_v48  ;;  %v12375_v58 = vld [vmem:[#allocation82_spill] sm:$0xff] }
 0x1c6   : > { %v8463_v61 = vpop.f32.mrf.mxu0  ;;  %8774 = vmatmul.mubr.f32.gmra.mxu0 %v12371_v12  ;;  %v8495_v39 = vpop.f32.mrf.mxu1  ;;  %8806 = vmatmul.mubr.f32.gmra.mxu1 %v12372_v63 }
 0x1c7   : > { %v11075_v19 = vadd.f32 %v3394_v57, %v3216_v59  ;;  %v3237_v32 = vadd.f32 %v8463_v61, %v10977_v18  ;;  %8776 = vmatprep.mubr.f32.mxu0 %v12373_v34  ;;  %8808 = vmatprep.mubr.f32.mxu1 %v12374_v27  ;;  %v12377_v57 = vld [vmem:[#allocation83_spill] sm:$0xff]  ;;  %v12378_v59 = vld [vmem:[#allocation102_spill] sm:$0xff]  ;;  %v12379_v27 = vld [vmem:[#allocation88_spill] sm:$0xff] }
 0x1c8   : > { %v3229_v25 = vpop.f32.mrf.mxu0  ;;  %v3442_v21 = vpop.f32.mrf.mxu1 }
 0x1c9   : > { %v11080_v22 = vadd.f32 %v8489_v38, %v3237_v32  ;;  %v3230_v48 = vadd.f32 %v3229_v25, %v10987_v56 }
 0x1ca   : > { %v8466_v41 = vpop.f32.mrf.mxu0  ;;  %8777 = vmatmul.mubr.f32.gmra.mxu0 %v12375_v58  ;;  %v8498_v12 = vpop.f32.mrf.mxu1  ;;  %8809 = vmatmul.mubr.f32.gmra.mxu1 %v12376_v28  ;;  %v12380_v58 = vld [vmem:[#allocation105_spill] sm:$0xff] }
 0x1cb   : > { %v11085_v63 = vadd.f32 %v3410_v55, %v3230_v48  ;;  %v3251_v18 = vadd.f32 %v8466_v41, %v10993_v54  ;;  %8779 = vmatprep.mubr.f32.mxu0 %v12377_v57  ;;  %8811 = vmatprep.mubr.f32.mxu1 %v12378_v59  ;;  %v12381_v55 = vld [vmem:[#allocation91_spill] sm:$0xff]  ;;  %v12382_v48 = vld [vmem:[#allocation108_spill] sm:$0xff]  ;;  %v12383_v59 = vld [vmem:[#allocation93_spill] sm:$0xff] }
 0x1cc   : > { %v3243_v61 = vpop.f32.mrf.mxu0  ;;  %v3458_v34 = vpop.f32.mrf.mxu1 }
 0x1cd   : > { %v11090_v38 = vadd.f32 %v8492_v11, %v3251_v18  ;;  %v3244_v56 = vadd.f32 %v3243_v61, %v11003_v40 }
 0x1ce   : > { %v8469_v32 = vpop.f32.mrf.mxu0  ;;  %8780 = vmatmul.mubr.f32.gmra.mxu0 %v12379_v27  ;;  %v8501_v25 = vpop.f32.mrf.mxu1  ;;  %8812 = vmatmul.mubr.f32.gmra.mxu1 %v12380_v58  ;;  %v12384_v27 = vld [vmem:[#allocation110_spill] sm:$0xff] }
 0x1cf   : > { %v11095_v28 = vadd.f32 %v3426_v8, %v3244_v56  ;;  %v3265_v54 = vadd.f32 %v8469_v32, %v11010_v51  ;;  %8782 = vmatprep.mubr.f32.mxu0 %v12381_v55  ;;  %8814 = vmatprep.mubr.f32.mxu1 %v12382_v48  ;;  %v12385_v56 = vld [vmem:[#allocation96_spill] sm:$0xff]  ;;  %v12386_v32 = vand.u32 4294901760, %v10998_v36  ;;  %v12387_v48 = vld [vmem:[#allocation99_spill] sm:$0xff] }
 0x1d0   : > { %v3257_v41 = vpop.f32.mrf.mxu0  ;;  %v3474_v57 = vpop.f32.mrf.mxu1 }
 0x1d1   : > { %v11100_v11 = vadd.f32 %v8495_v39, %v3265_v54  ;;  %v3258_v40 = vadd.f32 %v3257_v41, %v11018_v62 }
 0x1d2   : > { %v8472_v18 = vpop.f32.mrf.mxu0  ;;  %8783 = vmatmul.mubr.f32.gmra.mxu0 %v12383_v59  ;;  %v8504_v61 = vpop.f32.mrf.mxu1  ;;  %8815 = vmatmul.mubr.f32.gmra.mxu1 %v12384_v27 }
 0x1d3   : > { %v11105_v8 = vadd.f32 %v3442_v21, %v3258_v40  ;;  %v3279_v51 = vadd.f32 %v8472_v18, %v11023_v50  ;;  %8785 = vmatprep.mubr.f32.mxu0 %v12385_v56  ;;  %8817 = vmatprep.mubr.f32.mxu1 %v12386_v32  ;;  %v12388_v21 = vand.u32 4294901760, %v11008_v24  ;;  %v12389_v18 = vld [vmem:[#allocation103_spill] sm:$0xff]  ;;  %v12390_v56 = vld [vmem:[#allocation106_spill] sm:$0xff] }
 0x1d4   : > { %v3271_v58 = vpop.f32.mrf.mxu0  ;;  %v3490_v39 = vpop.f32.mrf.mxu1 }
 0x1d5   : > { %v11111_v54 = vadd.f32 %v8498_v12, %v3279_v51  ;;  %v3272_v62 = vadd.f32 %v3271_v58, %v11032_v47 }
 0x1d6   : > { %v8475_v55 = vpop.f32.mrf.mxu0  ;;  %8786 = vmatmul.mubr.f32.gmra.mxu0 %v12387_v48  ;;  %v8507_v41 = vpop.f32.mrf.mxu1  ;;  %8818 = vmatmul.mubr.f32.gmra.mxu1 %v12388_v21 }
 0x1d7   : > { %v11117_v40 = vadd.f32 %v3458_v34, %v3272_v62  ;;  %v3293_v50 = vadd.f32 %v8475_v55, %v11039_v3  ;;  %8788 = vmatprep.mubr.f32.mxu0 %v12389_v18  ;;  %8848 = vmatprep.mubr.f32.mxu1 %v12324_v1 }
 0x1d8   : > { %v3285_v59 = vpop.f32.mrf.mxu0  ;;  %v3506_v12 = vpop.f32.mrf.mxu1 }
 0x1d9   : > { %v11122_v27 = vadd.f32 %v8501_v25, %v3293_v50  ;;  %v3286_v47 = vadd.f32 %v3285_v59, %v11045_v16 }
 0x1da   : > { %v8478_v51 = vpop.f32.mrf.mxu0  ;;  %8789 = vmatmul.mubr.f32.gmra.mxu0 %v12390_v56  ;;  %v8538_v32 = vpop.f32.mrf.mxu1  ;;  %8849 = vmatmul.mubr.f32.vlgmr.msra.gmra.mxu1 %v12326_v14 }
 0x1db   : > { %v11127_v34 = vadd.f32 %v3474_v57, %v3286_v47  ;;  %v3307_v3 = vadd.f32 %v8478_v51, %v11049_v30  ;;  %8791 = vmatprep.mubr.f32.mxu0 %v10998_v36  ;;  %8899 = vmatpush3.msra.mxu1 %v11043_v0 }
 0x1dc   : > { %v3299_v58 = vpop.f32.mrf.mxu0  ;;  %v3750_v62 = vpop.f32.mrf.mxu1  ;;  %8851 = vmatprep.mubr.f32.mxu1 %v12328_v20  ;;  %8950 = vmatprep.subr.mxu1 %v10985_v9 }
 0x1dd   : > { %v11134_v16 = vadd.f32 %v8504_v61, %v3307_v3  ;;  %v3300_v25 = vadd.f32 %v3299_v58, %v11054_v37 }
 0x1de   : > { %v8481_v55 = vpop.f32.mrf.mxu0  ;;  %8792 = vmatmul.mubr.f32.gmra.mxu0 %v11008_v24  ;;  %v8541_v57 = vpop.f32.mrf.mxu1  ;;  %8852 = vmatmul.mubr.f32.gmra.mxu1 %v12330_v23 }
 0x1df   : > { %v11139_v30 = vadd.f32 %v3490_v39, %v3300_v25  ;;  %v3321_v36 = vadd.f32 %v8481_v55, %v11057_v29  ;;  %8822 = vmatprep.mubr.f32.mxu0 %v12324_v1  ;;  %8854 = vmatprep.mubr.f32.mxu1 %v12333_v10 }
 0x1e0   : > { %v3313_v0 = vpop.f32.mrf.mxu0  ;;  %v3762_v48 = vpop.f32.mrf.mxu1 }
 0x1e1   : > { %v11144_v61 = vadd.f32 %v8507_v41, %v3321_v36  ;;  %v3314_v37 = vadd.f32 %v3313_v0, %v11061_v42 }
 0x1e2   : > { %v8512_v21 = vpop.f32.mrf.mxu0  ;;  %8823 = vmatmul.mubr.f32.vlgmr.msra.gmra.mxu0 %v12326_v14  ;;  %v8544_v24 = vpop.f32.mrf.mxu1  ;;  %8855 = vmatmul.mubr.f32.gmra.mxu1 %v12336_v35 }
 0x1e3   : > { %v11149_v39 = vadd.f32 %v3506_v12, %v3314_v37  ;;  %v3595_v29 = vadd.f32 %v8512_v21, %v11070_v33  ;;  %8873 = vmatpush3.msra.mxu0 %v10985_v9  ;;  %8825 = vmatprep.mubr.f32.mxu0 %v12328_v20 }
 0x1e4   : > { %v3588_v1 = vpop.f32.mrf.mxu0  ;;  %v3774_v50 = vpop.f32.mrf.mxu1  ;;  %8857 = vmatprep.mubr.f32.mxu1 %v12339_v26  ;;  %8924 = vmatprep.subr.mxu0 %v11001_v5 }
 0x1e5   : > { %v3757_v42 = vadd.f32 %v8538_v32, %v3595_v29  ;;  %v3589_v14 = vadd.f32 %v3588_v1, %v11075_v19  ;;  %v12392_v29 = vld [vmem:[#allocation122_spill] sm:$0xff] }
 0x1e6   : > { %v8515_v41 = vpop.f32.mrf.mxu0  ;;  %8826 = vmatmul.mubr.f32.gmra.mxu0 %v12330_v23  ;;  %v8547_v18 = vpop.f32.mrf.mxu1  ;;  %8858 = vmatmul.mubr.f32.gmra.mxu1 %v12342_v45 }
 0x1e7   : > { %v11160_v33 = vadd.f32 %v3757_v42, %v10863_v60  ;;  %v3751_v59 = vadd.f32 %v3750_v62, %v3589_v14  ;;  %v3607_v20 = vadd.f32 %v8515_v41, %v11080_v22  ;;  %8828 = vmatprep.mubr.f32.mxu0 %v12333_v10  ;;  %8860 = vmatprep.mubr.f32.mxu1 %v12344_v17  ;;  %v12394_v14 = vld [vmem:[#allocation123_spill] sm:$0xff] }
 0x1e8   : > { %v3600_v12 = vpop.f32.mrf.mxu0  ;;  %v3786_v47 = vpop.f32.mrf.mxu1 }
 0x1e9   : > { %v11166_v19 = vadd.f32 %v3751_v59, %v10870_v6  ;;  %v3769_v51 = vadd.f32 %v8541_v57, %v3607_v20  ;;  %v3601_v23 = vadd.f32 %v3600_v12, %v11085_v63  ;;  %v12395_v20 = vld [vmem:[#allocation6_spill] sm:$0xff]  ;;  %v12396_v12 = vld [vmem:[#allocation124_spill] sm:$0xff] }
 0x1ea   : > { %v8518_v56 = vpop.f32.mrf.mxu0  ;;  %8829 = vmatmul.mubr.f32.gmra.mxu0 %v12336_v35  ;;  %v8550_v60 = vpop.f32.mrf.mxu1  ;;  %8861 = vmatmul.mubr.f32.gmra.mxu1 %v12346_v2 }
 0x1eb   : > { %v11172_v22 = vadd.f32 %v3769_v51, %v10875_v4  ;;  %v3763_v10 = vadd.f32 %v3762_v48, %v3601_v23  ;;  %v3619_v32 = vadd.f32 %v8518_v56, %v11090_v38  ;;  %8831 = vmatprep.mubr.f32.mxu0 %v12339_v26  ;;  %8863 = vmatprep.mubr.f32.mxu1 %v12349_v53  ;;  %v12398_v56 = vld [vmem:[#allocation10_spill] sm:$0xff] }
 0x1ec   : > { %v3612_v6 = vpop.f32.mrf.mxu0  ;;  %v3798_v3 = vpop.f32.mrf.mxu1 }
 0x1ed   : > { %v11178_v63 = vadd.f32 %v3763_v10, %v10883_v31  ;;  %v3781_v58 = vadd.f32 %v8544_v24, %v3619_v32  ;;  %v3613_v35 = vadd.f32 %v3612_v6, %v11095_v28  ;;  %v12391_v24 = vld [vmem:[#allocation129_spill] sm:$0xff]  ;;  %v12401_v6 = vld [vmem:[#allocation12_spill] sm:$0xff] }
 0x1ee   : > { %v8521_v62 = vpop.f32.mrf.mxu0  ;;  %8832 = vmatmul.mubr.f32.gmra.mxu0 %v12342_v45  ;;  %v8553_v4 = vpop.f32.mrf.mxu1  ;;  %8864 = vmatmul.mubr.f32.gmra.mxu1 %v12351_v49 }
 0x1ef   : > { %v11184_v38 = vadd.f32 %v3781_v58, %v10892_v52  ;;  %v3775_v26 = vadd.f32 %v3774_v50, %v3613_v35  ;;  %v3631_v25 = vadd.f32 %v8521_v62, %v11100_v11  ;;  %8834 = vmatprep.mubr.f32.mxu0 %v12344_v17  ;;  %8866 = vmatprep.mubr.f32.mxu1 %v12353_v7  ;;  %v12393_v50 = vld [vmem:[#allocation5_spill] sm:$0xff]  ;;  %v12404_v62 = vld [vmem:[#allocation22_spill] sm:$0xff] }
 0x1f0   : > { %v3624_v31 = vpop.f32.mrf.mxu0  ;;  %v3810_v55 = vpop.f32.mrf.mxu1 }
 0x1f1   : > { %v11190_v28 = vadd.f32 %v3775_v26, %v10899_v15  ;;  %v3793_v57 = vadd.f32 %v8547_v18, %v3631_v25  ;;  %v3625_v45 = vadd.f32 %v3624_v31, %v11105_v8  ;;  %v12406_v31 = vld [vmem:[#allocation127_spill] sm:$0xff] }
 0x1f2   : > { %v8524_v36 = vpop.f32.mrf.mxu0  ;;  %8835 = vmatmul.mubr.f32.gmra.mxu0 %v12346_v2  ;;  %v8556_v52 = vpop.f32.mrf.mxu1  ;;  %8867 = vmatmul.mubr.f32.gmra.mxu1 %v12356_v13 }
 0x1f3   : > { %v11196_v11 = vadd.f32 %v3793_v57, %v10904_v43  ;;  %v3787_v17 = vadd.f32 %v3786_v47, %v3625_v45  ;;  %v3643_v0 = vadd.f32 %v8524_v36, %v11111_v54  ;;  %8837 = vmatprep.mubr.f32.mxu0 %v12349_v53  ;;  %8869 = vmatprep.mubr.f32.mxu1 %v10981_v46  ;;  %v12408_v36 = vld [vmem:[#allocation24_spill] sm:$0xff] }
 0x1f4   : > { %v3636_v15 = vpop.f32.mrf.mxu0  ;;  %v3822_v48 = vpop.f32.mrf.mxu1 }
 0x1f5   : > { %v11202_v8 = vadd.f32 %v3787_v17, %v10917_v44  ;;  %v3805_v37 = vadd.f32 %v8550_v60, %v3643_v0  ;;  %v3637_v2 = vadd.f32 %v3636_v15, %v11117_v40  ;;  %v12409_v17 = vld [vmem:[#allocation26_spill] sm:$0xff]  ;;  %v12410_v0 = vld [vmem:[#allocation136_spill] sm:$0xff] }
 0x1f6   : > { %v8527_v21 = vpop.f32.mrf.mxu0  ;;  %8838 = vmatmul.mubr.f32.gmra.mxu0 %v12351_v49  ;;  %v8559_v43 = vpop.f32.mrf.mxu1  ;;  %8870 = vmatmul.mubr.f32.gmra.mxu1 %v12391_v24 }
 0x1f7   : > { %v11208_v54 = vadd.f32 %v3805_v37, %v12392_v29  ;;  %v3799_v53 = vadd.f32 %v3798_v3, %v3637_v2  ;;  %v3655_v1 = vadd.f32 %v8527_v21, %v11122_v27  ;;  %8840 = vmatprep.mubr.f32.mxu0 %v12353_v7  ;;  %8900 = vmatprep.mubr.f32.mxu1 %v12393_v50  ;;  %v12412_v37 = vld [vmem:[#allocation27_spill] sm:$0xff]  ;;  %v12415_v29 = vld [vmem:[#allocation130_spill] sm:$0xff] }
 0x1f8   : > { %v3648_v44 = vpop.f32.mrf.mxu0  ;;  %v3834_v42 = vpop.f32.mrf.mxu1 }
 0x1f9   : > { %v11214_v40 = vadd.f32 %v3799_v53, %v12394_v14  ;;  %v3817_v41 = vadd.f32 %v8553_v4, %v3655_v1  ;;  %v3649_v49 = vadd.f32 %v3648_v44, %v11127_v34  ;;  %v12405_v4 = vld [vmem:[#allocation25_spill] sm:$0xff]  ;;  %v12416_v53 = vld [vmem:[#allocation128_spill] sm:$0xff] }
 0x1fa   : > { %v8530_v18 = vpop.f32.mrf.mxu0  ;;  %8841 = vmatmul.mubr.f32.gmra.mxu0 %v12356_v13  ;;  %v8590_v59 = vpop.f32.mrf.mxu1  ;;  %8901 = vmatmul.mubr.f32.vlgmr.msra.gmra.mxu1 %v12395_v20  ;;  %v12399_v13 = vld [vmem:[#allocation125_spill] sm:$0xff]  ;;  %v12418_v14 = vld [vmem:[#allocation28_spill] sm:$0xff] }
 0x1fb   : > { %v11220_v27 = vadd.f32 %v3817_v41, %v12396_v12  ;;  %v3811_v7 = vadd.f32 %v3810_v55, %v3649_v49  ;;  %v3667_v47 = vadd.f32 %v8530_v18, %v11134_v16  ;;  %8843 = vmatprep.mubr.f32.mxu0 %v10981_v46  ;;  %8951 = vmatpush3.msra.mxu1 %v10985_v9  ;;  %v12402_v46 = vld [vmem:[#allocation126_spill] sm:$0xff]  ;;  %v12419_v41 = vld [vmem:[#allocation36_spill] sm:$0xff]  ;;  %v12420_v18 = vld [vmem:[#allocation41_spill] sm:$0xff] }
 0x1fc   : > { %v3660_v51 = vpop.f32.mrf.mxu0  ;;  %v4243_v23 = vpop.f32.mrf.mxu1  ;;  %8903 = vmatprep.mubr.f32.mxu1 %v12398_v56  ;;  %9002 = vmatprep.subr.mxu1 %v10985_v9 }
 0x1fd   : > { %12397 = vst [vmem:[#allocation131_spill] sm:$0xff] %v11220_v27  ;;  %v11228_v34 = vadd.f32 %v3811_v7, %v12399_v13  ;;  %v3829_v60 = vadd.f32 %v8556_v52, %v3667_v47  ;;  %v3661_v10 = vadd.f32 %v3660_v51, %v11139_v30  ;;  %v12422_v7 = vld [vmem:[#allocation121_spill] sm:$0xff] }
 0x1fe   : > { %v8533_v32 = vpop.f32.mrf.mxu0  ;;  %8844 = vmatmul.mubr.f32.gmra.mxu0 %v12391_v24  ;;  %v8593_v16 = vpop.f32.mrf.mxu1  ;;  %8904 = vmatmul.mubr.f32.gmra.mxu1 %v12401_v6  ;;  %v6177_v47 = vsel %vm419_vm2, %v12422_v7, 0  ;;  %v12432_v7 = vld [vmem:[#allocation61_spill] sm:$0xff] }
 0x1ff   : > { %12400 = vst [vmem:[#allocation115_spill] sm:$0xff] %v11228_v34  ;;  %v11234_v3 = vadd.f32 %v3829_v60, %v12402_v46  ;;  %v3823_v58 = vadd.f32 %v3822_v48, %v3661_v10  ;;  %v3679_v35 = vadd.f32 %v8533_v32, %v11144_v61  ;;  %8874 = vmatprep.mubr.f32.mxu0 %v12404_v62  ;;  %v12423_v10 = vld [vmem:[#allocation42_spill] sm:$0xff]  ;;  %v12452_v27 = vld [vmem:[#allocation49_spill] sm:$0xff] }
 0x200   : > { %8906 = vmatprep.mubr.f32.mxu1 %v12405_v4  ;;  %v3672_v26 = vpop.f32.mrf.mxu0  ;;  %v4255_v25 = vpop.f32.mrf.mxu1  ;;  %v12424_v46 = vld [vmem:[#allocation38_spill] sm:$0xff] }
 0x201   : > { %12403 = vst [vmem:[#allocation132_spill] sm:$0xff] %v11234_v3  ;;  %v11240_v30 = vadd.f32 %v3823_v58, %v12406_v31  ;;  %v3841_v55 = vadd.f32 %v8559_v43, %v3679_v35  ;;  %v3673_v57 = vadd.f32 %v3672_v26, %v11149_v39  ;;  %v12413_v43 = vld [vmem:[#allocation35_spill] sm:$0xff]  ;;  %v12414_v39 = vld [vmem:[#allocation120_spill] sm:$0xff]  ;;  %v12426_v62 = vld [vmem:[#allocation50_spill] sm:$0xff] }
 0x202   : > { %v8564_v45 = vpop.f32.mrf.mxu0  ;;  %8875 = vmatmul.mubr.f32.vlgmr.msra.gmra.mxu0 %v12408_v36  ;;  %v8596_v52 = vpop.f32.mrf.mxu1  ;;  %8907 = vmatmul.mubr.f32.gmra.mxu1 %v12409_v17  ;;  %v6174_v24 = vsel %vm419_vm2, %v12414_v39, 0  ;;  %v12425_v35 = vld [vmem:[#allocation52_spill] sm:$0xff]  ;;  %v12443_v3 = vld [vmem:[#allocation11_spill] sm:$0xff]  ;;  %v12448_v34 = vld [vmem:[#allocation46_spill] sm:$0xff] }
 0x203   : > { %12407 = vst [vmem:[#allocation133_spill] sm:$0xff] %v11240_v30  ;;  %v11246_v61 = vadd.f32 %v3841_v55, %v12410_v0  ;;  %v3835_v15 = vadd.f32 %v3834_v42, %v3673_v57  ;;  %v11248_v48 = vadd.f32 %v8590_v59, %v8564_v45  ;;  %8925 = vmatpush3.msra.mxu0 %v11001_v5  ;;  %v12421_v59 = vld [vmem:[#allocation37_spill] sm:$0xff]  ;;  %v11267_v12 = vand.u32 4294901760, %v6174_v24  ;;  %v12428_v0 = vld [vmem:[#allocation51_spill] sm:$0xff] }
 0x204   : > { %8877 = vmatprep.mubr.f32.mxu0 %v12412_v37  ;;  %v4017_v2 = vpop.f32.mrf.mxu0  ;;  %v4267_v21 = vpop.f32.mrf.mxu1  ;;  %8909 = vmatprep.mubr.f32.mxu1 %v12413_v43  ;;  %v12427_v45 = vld [vmem:[#allocation53_spill] sm:$0xff]  ;;  %v12429_v37 = vld [vmem:[#allocation56_spill] sm:$0xff]  ;;  %v12438_v30 = vld [vmem:[#allocation15_spill] sm:$0xff] }
 0x205   : > { %12411 = vst [vmem:[#allocation116_spill] sm:$0xff] %v11246_v61  ;;  %8976 = vmatprep.subr.mxu0 %v12415_v29  ;;  %v11257_v1 = vadd.f32 %v3835_v15, %v12416_v53  ;;  %v11259_v44 = vadd.f32 %v4243_v23, %v4017_v2  ;;  %v11282_v26 = vsub.f32 %v6174_v24, %v11267_v12  ;;  %v12430_v2 = vld [vmem:[#allocation60_spill] sm:$0xff] }
 0x206   : > { %v8567_v42 = vpop.f32.mrf.mxu0  ;;  %8878 = vmatmul.mubr.f32.gmra.mxu0 %v12418_v14  ;;  %v8599_v5 = vpop.f32.mrf.mxu1  ;;  %8910 = vmatmul.mubr.f32.gmra.mxu1 %v12419_v41  ;;  %v12431_v14 = vld [vmem:[#allocation62_spill] sm:$0xff] }
 0x207   : > { %12417 = vst [vmem:[#allocation117_spill] sm:$0xff] %v11257_v1  ;;  %v11263_v49 = vadd.f32 %v8593_v16, %v8567_v42  ;;  %8880 = vmatprep.mubr.f32.mxu0 %v12420_v18  ;;  %8912 = vmatprep.mubr.f32.mxu1 %v12421_v59  ;;  %v11275_v16 = vand.u32 4294901760, %v6177_v47  ;;  %v12050_v39 = vand.u32 4294901760, %v11282_v26 }
 0x208   : > { %v4037_v51 = vpop.f32.mrf.mxu0  ;;  %v4279_v23 = vpop.f32.mrf.mxu1 }
 0x209   : > { %v11271_v13 = vadd.f32 %v4255_v25, %v4037_v51  ;;  %v12433_v51 = vld [vmem:[#allocation65_spill] sm:$0xff] }
 0x20a   : > { %v8570_v60 = vpop.f32.mrf.mxu0  ;;  %8881 = vmatmul.mubr.f32.gmra.mxu0 %v12423_v10  ;;  %v8602_v32 = vpop.f32.mrf.mxu1  ;;  %8913 = vmatmul.mubr.f32.gmra.mxu1 %v12424_v46 }
 0x20b   : > { %v11277_v58 = vadd.f32 %v8596_v52, %v8570_v60  ;;  %8883 = vmatprep.mubr.f32.mxu0 %v12425_v35  ;;  %8915 = vmatprep.mubr.f32.mxu1 %v12426_v62  ;;  %v11289_v52 = vsub.f32 %v6177_v47, %v11275_v16  ;;  %v6391_v60 = vsub.f32 %v11282_v26, %v12050_v39 }
 0x20c   : > { %v4057_v31 = vpop.f32.mrf.mxu0  ;;  %v4291_v25 = vpop.f32.mrf.mxu1 }
 0x20d   : > { %v11284_v55 = vadd.f32 %v4267_v21, %v4057_v31  ;;  %v12051_v47 = vand.u32 4294901760, %v11289_v52 }
 0x20e   : > { %v8573_v57 = vpop.f32.mrf.mxu0  ;;  %8884 = vmatmul.mubr.f32.gmra.mxu0 %v12427_v45  ;;  %v8605_v36 = vpop.f32.mrf.mxu1  ;;  %8916 = vmatmul.mubr.f32.gmra.mxu1 %v12428_v0 }
 0x20f   : > { %v11291_v15 = vadd.f32 %v8599_v5, %v8573_v57  ;;  %8886 = vmatprep.mubr.f32.mxu0 %v12429_v37  ;;  %8918 = vmatprep.mubr.f32.mxu1 %v12430_v2  ;;  %v12434_v57 = vld [vmem:[#allocation68_spill] sm:$0xff] }
 0x210   : > { %v4077_v24 = vpop.f32.mrf.mxu0  ;;  %v4303_v21 = vpop.f32.mrf.mxu1 }
 0x211   : > { %v11296_v53 = vadd.f32 %v4279_v23, %v4077_v24  ;;  %v12435_v24 = vld [vmem:[#allocation69_spill] sm:$0xff] }
 0x212   : > { %v8576_v42 = vpop.f32.mrf.mxu0  ;;  %8887 = vmatmul.mubr.f32.gmra.mxu0 %v12431_v14  ;;  %v8608_v18 = vpop.f32.mrf.mxu1  ;;  %8919 = vmatmul.mubr.f32.gmra.mxu1 %v12432_v7  ;;  %v12436_v14 = vld [vmem:[#allocation13_spill] sm:$0xff] }
 0x213   : > { %v11301_v5 = vadd.f32 %v8602_v32, %v8576_v42  ;;  %8889 = vmatprep.mubr.f32.mxu0 %v12433_v51  ;;  %8921 = vmatprep.mubr.f32.mxu1 %v11267_v12  ;;  %v6401_v32 = vsub.f32 %v11289_v52, %v12051_v47  ;;  %v6392_v42 = vand.u32 4294901760, %v6391_v60 }
 0x214   : > { %v4097_v23 = vpop.f32.mrf.mxu0  ;;  %v4315_v10 = vpop.f32.mrf.mxu1 }
 0x215   : > { %v11308_v35 = vadd.f32 %v4291_v25, %v4097_v23  ;;  %v6402_v1 = vand.u32 4294901760, %v6401_v32 }
 0x216   : > { %v8579_v31 = vpop.f32.mrf.mxu0  ;;  %8890 = vmatmul.mubr.f32.gmra.mxu0 %v12434_v57  ;;  %v8611_v45 = vpop.f32.mrf.mxu1  ;;  %8922 = vmatmul.mubr.f32.gmra.mxu1 %v11275_v16  ;;  %v12437_v57 = vld [vmem:[#allocation70_spill] sm:$0xff] }
 0x217   : > { %v11315_v37 = vadd.f32 %v8605_v36, %v8579_v31  ;;  %8892 = vmatprep.mubr.f32.mxu0 %v12435_v24  ;;  %8952 = vmatprep.mubr.f32.mxu1 %v12436_v14  ;;  %v12439_v31 = vld [vmem:[#allocation17_spill] sm:$0xff] }
 0x218   : > { %v4117_v51 = vpop.f32.mrf.mxu0  ;;  %v4327_v25 = vpop.f32.mrf.mxu1 }
 0x219   : > { %v11319_v23 = vadd.f32 %v4303_v21, %v4117_v51  ;;  %v12440_v51 = vld [vmem:[#allocation18_spill] sm:$0xff] }
 0x21a   : > { %v8582_v39 = vpop.f32.mrf.mxu0  ;;  %8893 = vmatmul.mubr.f32.gmra.mxu0 %v12437_v57  ;;  %v8642_v61 = vpop.f32.mrf.mxu1  ;;  %8953 = vmatmul.mubr.f32.vlgmr.msra.gmra.mxu1 %v12438_v30  ;;  %v12441_v57 = vld [vmem:[#allocation9_spill] sm:$0xff]  ;;  %v12442_v30 = vld [vmem:[#allocation31_spill] sm:$0xff] }
 0x21b   : > { %v11323_v47 = vadd.f32 %v8608_v18, %v8582_v39  ;;  %8895 = vmatprep.mubr.f32.mxu0 %v6392_v42  ;;  %9003 = vmatpush3.msra.mxu1 %v10985_v9 }
 0x21c   : > { %v4137_v36 = vpop.f32.mrf.mxu0  ;;  %v4586_v60 = vpop.f32.mrf.mxu1  ;;  %8955 = vmatprep.mubr.f32.mxu1 %v12439_v31 }
 0x21d   : > { %v11327_v24 = vadd.f32 %v4315_v10, %v4137_v36  ;;  %v12444_v36 = vld [vmem:[#allocation32_spill] sm:$0xff] }
 0x21e   : > { %v8585_v21 = vpop.f32.mrf.mxu0  ;;  %8896 = vmatmul.mubr.f32.gmra.mxu0 %v6402_v1  ;;  %v8645_v14 = vpop.f32.mrf.mxu1  ;;  %8956 = vmatmul.mubr.f32.gmra.mxu1 %v12440_v51  ;;  %v12446_v51 = vld [vmem:[#allocation45_spill] sm:$0xff] }
 0x21f   : > { %v11330_v32 = vadd.f32 %v8611_v45, %v8585_v21  ;;  %8926 = vmatprep.mubr.f32.mxu0 %v12441_v57  ;;  %8958 = vmatprep.mubr.f32.mxu1 %v12442_v30  ;;  %v12445_v45 = vld [vmem:[#allocation14_spill] sm:$0xff] }
 0x220   : > { %v4157_v39 = vpop.f32.mrf.mxu0  ;;  %v4602_v18 = vpop.f32.mrf.mxu1 }
 0x221   : > { %v11334_v9 = vadd.f32 %v4327_v25, %v4157_v39  ;;  %v12447_v39 = vld [vmem:[#allocation16_spill] sm:$0xff] }
 0x222   : > { %v8616_v42 = vpop.f32.mrf.mxu0  ;;  %8927 = vmatmul.mubr.f32.vlgmr.msra.gmra.mxu0 %v12443_v3  ;;  %v8648_v10 = vpop.f32.mrf.mxu1  ;;  %8959 = vmatmul.mubr.f32.gmra.mxu1 %v12444_v36 }
 0x223   : > { %v4415_v1 = vadd.f32 %v8616_v42, %v11248_v48  ;;  %8977 = vmatpush3.msra.mxu0 %v12415_v29  ;;  %8929 = vmatprep.mubr.f32.mxu0 %v12445_v45  ;;  %v12449_v29 = vld [vmem:[#allocation29_spill] sm:$0xff]  ;;  %v12450_v42 = vld [vmem:[#allocation48_spill] sm:$0xff] }
 0x224   : > { %v4407_v31 = vpop.f32.mrf.mxu0  ;;  %v4618_v21 = vpop.f32.mrf.mxu1  ;;  %8961 = vmatprep.mubr.f32.mxu1 %v12446_v51 }
 0x225   : > { %v11342_v57 = vadd.f32 %v8642_v61, %v4415_v1  ;;  %v4408_v25 = vadd.f32 %v4407_v31, %v11259_v44  ;;  %v12451_v31 = vld [vmem:[#allocation30_spill] sm:$0xff] }
 0x226   : > { %v8619_v30 = vpop.f32.mrf.mxu0  ;;  %8930 = vmatmul.mubr.f32.gmra.mxu0 %v12447_v39  ;;  %v8651_v3 = vpop.f32.mrf.mxu1  ;;  %8962 = vmatmul.mubr.f32.gmra.mxu1 %v12448_v34 }
 0x227   : > { %v11347_v36 = vadd.f32 %v4586_v60, %v4408_v25  ;;  %v4429_v48 = vadd.f32 %v8619_v30, %v11263_v49  ;;  %8932 = vmatprep.mubr.f32.mxu0 %v12449_v29  ;;  %8964 = vmatprep.mubr.f32.mxu1 %v12450_v42  ;;  %v12453_v60 = vld [vmem:[#allocation39_spill] sm:$0xff]  ;;  %v12454_v25 = vld [vmem:[#allocation58_spill] sm:$0xff]  ;;  %v12455_v42 = vld [vmem:[#allocation40_spill] sm:$0xff] }
 0x228   : > { %v4421_v45 = vpop.f32.mrf.mxu0  ;;  %v4634_v51 = vpop.f32.mrf.mxu1 }
 0x229   : > { %v11352_v61 = vadd.f32 %v8645_v14, %v4429_v48  ;;  %v4422_v44 = vadd.f32 %v4421_v45, %v11271_v13 }
 0x22a   : > { %v8622_v1 = vpop.f32.mrf.mxu0  ;;  %8933 = vmatmul.mubr.f32.gmra.mxu0 %v12451_v31  ;;  %v8654_v39 = vpop.f32.mrf.mxu1  ;;  %8965 = vmatmul.mubr.f32.gmra.mxu1 %v12452_v27  ;;  %v12456_v31 = vld [vmem:[#allocation59_spill] sm:$0xff] }
 0x22b   : > { %v11357_v34 = vadd.f32 %v4602_v18, %v4422_v44  ;;  %v4443_v49 = vadd.f32 %v8622_v1, %v11277_v58  ;;  %8935 = vmatprep.mubr.f32.mxu0 %v12453_v60  ;;  %8967 = vmatprep.mubr.f32.mxu1 %v12454_v25  ;;  %v12457_v18 = vld [vmem:[#allocation43_spill] sm:$0xff]  ;;  %v12458_v44 = vld [vmem:[#allocation66_spill] sm:$0xff]  ;;  %v12459_v25 = vld [vmem:[#allocation44_spill] sm:$0xff] }
 0x22c   : > { %v4435_v30 = vpop.f32.mrf.mxu0  ;;  %v4650_v29 = vpop.f32.mrf.mxu1 }
 0x22d   : > { %v11362_v14 = vadd.f32 %v8648_v10, %v4443_v49  ;;  %v4436_v13 = vadd.f32 %v4435_v30, %v11284_v55 }
 0x22e   : > { %v8625_v48 = vpop.f32.mrf.mxu0  ;;  %8936 = vmatmul.mubr.f32.gmra.mxu0 %v12455_v42  ;;  %v8657_v45 = vpop.f32.mrf.mxu1  ;;  %8968 = vmatmul.mubr.f32.gmra.mxu1 %v12456_v31  ;;  %v12460_v42 = vld [vmem:[#allocation67_spill] sm:$0xff] }
 0x22f   : > { %v11367_v27 = vadd.f32 %v4618_v21, %v4436_v13  ;;  %v4457_v58 = vadd.f32 %v8625_v48, %v11291_v15  ;;  %8938 = vmatprep.mubr.f32.mxu0 %v12457_v18  ;;  %8970 = vmatprep.mubr.f32.mxu1 %v12458_v44  ;;  %v12461_v13 = vld [vmem:[#allocation54_spill] sm:$0xff]  ;;  %v12462_v48 = vand.u32 4294901760, %v11282_v26  ;;  %v12463_v44 = vld [vmem:[#allocation55_spill] sm:$0xff] }
 0x230   : > { %v4449_v1 = vpop.f32.mrf.mxu0  ;;  %v4666_v60 = vpop.f32.mrf.mxu1 }
 0x231   : > { %v11372_v10 = vadd.f32 %v8651_v3, %v4457_v58  ;;  %v4450_v55 = vadd.f32 %v4449_v1, %v11296_v53 }
 0x232   : > { %v8628_v49 = vpop.f32.mrf.mxu0  ;;  %8939 = vmatmul.mubr.f32.gmra.mxu0 %v12459_v25  ;;  %v8660_v30 = vpop.f32.mrf.mxu1  ;;  %8971 = vmatmul.mubr.f32.gmra.mxu1 %v12460_v42 }
 0x233   : > { %v11377_v21 = vadd.f32 %v4634_v51, %v4450_v55  ;;  %v4471_v15 = vadd.f32 %v8628_v49, %v11301_v5  ;;  %8941 = vmatprep.mubr.f32.mxu0 %v12461_v13  ;;  %8973 = vmatprep.mubr.f32.mxu1 %v12462_v48  ;;  %v12464_v51 = vand.u32 4294901760, %v11289_v52  ;;  %v12465_v49 = vld [vmem:[#allocation63_spill] sm:$0xff]  ;;  %v12466_v13 = vld [vmem:[#allocation64_spill] sm:$0xff] }
 0x234   : > { %v4463_v31 = vpop.f32.mrf.mxu0  ;;  %v4682_v3 = vpop.f32.mrf.mxu1 }
 0x235   : > { %v11383_v58 = vadd.f32 %v8654_v39, %v4471_v15  ;;  %v4464_v53 = vadd.f32 %v4463_v31, %v11308_v35 }
 0x236   : > { %v8631_v18 = vpop.f32.mrf.mxu0  ;;  %8942 = vmatmul.mubr.f32.gmra.mxu0 %v12463_v44  ;;  %v8663_v1 = vpop.f32.mrf.mxu1  ;;  %8974 = vmatmul.mubr.f32.gmra.mxu1 %v12464_v51 }
 0x237   : > { %v11389_v55 = vadd.f32 %v4650_v29, %v4464_v53  ;;  %v4485_v5 = vadd.f32 %v8631_v18, %v11315_v37  ;;  %8944 = vmatprep.mubr.f32.mxu0 %v12465_v49  ;;  %9004 = vmatprep.mubr.f32.mxu1 %v12393_v50 }
 0x238   : > { %v4477_v25 = vpop.f32.mrf.mxu0  ;;  %v4698_v39 = vpop.f32.mrf.mxu1 }
 0x239   : > { %v11394_v42 = vadd.f32 %v8657_v45, %v4485_v5  ;;  %v4478_v35 = vadd.f32 %v4477_v25, %v11319_v23 }
 0x23a   : > { %v8634_v15 = vpop.f32.mrf.mxu0  ;;  %8945 = vmatmul.mubr.f32.gmra.mxu0 %v12466_v13  ;;  %v8694_v48 = vpop.f32.mrf.mxu1  ;;  %9005 = vmatmul.mubr.f32.vlgmr.msra.gmra.mxu1 %v12395_v20 }
 0x23b   : > { %v11399_v29 = vadd.f32 %v4666_v60, %v4478_v35  ;;  %v4499_v37 = vadd.f32 %v8634_v15, %v11323_v47  ;;  %8947 = vmatprep.mubr.f32.mxu0 %v11282_v26  ;;  %9007 = vmatprep.mubr.f32.mxu1 %v12398_v56 }
 0x23c   : > { %v4491_v31 = vpop.f32.mrf.mxu0  ;;  %v4942_v53 = vpop.f32.mrf.mxu1 }
 0x23d   : > { %v11404_v45 = vadd.f32 %v8660_v30, %v4499_v37  ;;  %v4492_v23 = vadd.f32 %v4491_v31, %v11327_v24 }
 0x23e   : > { %v8637_v18 = vpop.f32.mrf.mxu0  ;;  %8948 = vmatmul.mubr.f32.gmra.mxu0 %v11289_v52  ;;  %v8697_v44 = vpop.f32.mrf.mxu1  ;;  %9008 = vmatmul.mubr.f32.gmra.mxu1 %v12401_v6 }
 0x23f   : > { %v11409_v60 = vadd.f32 %v4682_v3, %v4492_v23  ;;  %v4513_v47 = vadd.f32 %v8637_v18, %v11330_v32  ;;  %8978 = vmatprep.mubr.f32.mxu0 %v12393_v50  ;;  %9010 = vmatprep.mubr.f32.mxu1 %v12405_v4 }
 0x240   : > { %v4505_v26 = vpop.f32.mrf.mxu0  ;;  %v4954_v51 = vpop.f32.mrf.mxu1 }
 0x241   : > { %v11414_v30 = vadd.f32 %v8663_v1, %v4513_v47  ;;  %v4506_v24 = vadd.f32 %v4505_v26, %v11334_v9 }
 0x242   : > { %v8668_v5 = vpop.f32.mrf.mxu0  ;;  %8979 = vmatmul.mubr.f32.vlgmr.msra.gmra.mxu0 %v12395_v20  ;;  %v8700_v52 = vpop.f32.mrf.mxu1  ;;  %9011 = vmatmul.mubr.f32.gmra.mxu1 %v12409_v17 }
 0x243   : > { %v11419_v3 = vadd.f32 %v4698_v39, %v4506_v24  ;;  %v4787_v32 = vadd.f32 %v8668_v5, %v11342_v57  ;;  %8981 = vmatprep.mubr.f32.mxu0 %v12398_v56  ;;  %9013 = vmatprep.mubr.f32.mxu1 %v12413_v43 }
 0x244   : > { %v4780_v50 = vpop.f32.mrf.mxu0  ;;  %v4966_v49 = vpop.f32.mrf.mxu1 }
 0x245   : > { %v4949_v1 = vadd.f32 %v8694_v48, %v4787_v32  ;;  %v4781_v25 = vadd.f32 %v4780_v50, %v11347_v36 }
 0x246   : > { %v8671_v9 = vpop.f32.mrf.mxu0  ;;  %8982 = vmatmul.mubr.f32.gmra.mxu0 %v12401_v6  ;;  %v8703_v20 = vpop.f32.mrf.mxu1  ;;  %9014 = vmatmul.mubr.f32.gmra.mxu1 %v12419_v41 }
 0x247   : > { %v11428_v39 = vadd.f32 %v4949_v1, %v11160_v33  ;;  %v4943_v35 = vadd.f32 %v4942_v53, %v4781_v25  ;;  %v4799_v57 = vadd.f32 %v8671_v9, %v11352_v61  ;;  %8984 = vmatprep.mubr.f32.mxu0 %v12405_v4  ;;  %9016 = vmatprep.mubr.f32.mxu1 %v12421_v59  ;;  %v12467_v9 = vld [vmem:[#allocation131_spill] sm:$0xff] }
 0x248   : > { %v4792_v56 = vpop.f32.mrf.mxu0  ;;  %v4978_v15 = vpop.f32.mrf.mxu1 }
 0x249   : > { %v11434_v36 = vadd.f32 %v4943_v35, %v11166_v19  ;;  %v4961_v13 = vadd.f32 %v8697_v44, %v4799_v57  ;;  %v4793_v6 = vadd.f32 %v4792_v56, %v11357_v34  ;;  %v12468_v57 = vld [vmem:[#allocation115_spill] sm:$0xff] }
 0x24a   : > { %v8674_v48 = vpop.f32.mrf.mxu0  ;;  %8985 = vmatmul.mubr.f32.gmra.mxu0 %v12409_v17  ;;  %v8706_v33 = vpop.f32.mrf.mxu1  ;;  %9017 = vmatmul.mubr.f32.gmra.mxu1 %v12424_v46 }
 0x24b   : > { %v11440_v61 = vadd.f32 %v4961_v13, %v11172_v22  ;;  %v4955_v4 = vadd.f32 %v4954_v51, %v4793_v6  ;;  %v4811_v37 = vadd.f32 %v8674_v48, %v11362_v14  ;;  %8987 = vmatprep.mubr.f32.mxu0 %v12413_v43  ;;  %9019 = vmatprep.mubr.f32.mxu1 %v12426_v62  ;;  %v12469_v13 = vld [vmem:[#allocation132_spill] sm:$0xff] }
 0x24c   : > { %v4804_v19 = vpop.f32.mrf.mxu0  ;;  %v4990_v31 = vpop.f32.mrf.mxu1 }
 0x24d   : > { %v11446_v34 = vadd.f32 %v4955_v4, %v11178_v63  ;;  %v4973_v53 = vadd.f32 %v8700_v52, %v4811_v37  ;;  %v4805_v17 = vadd.f32 %v4804_v19, %v11367_v27  ;;  %v12470_v4 = vld [vmem:[#allocation133_spill] sm:$0xff] }
 0x24e   : > { %v8677_v23 = vpop.f32.mrf.mxu0  ;;  %8988 = vmatmul.mubr.f32.gmra.mxu0 %v12419_v41  ;;  %v8709_v22 = vpop.f32.mrf.mxu1  ;;  %9020 = vmatmul.mubr.f32.gmra.mxu1 %v12428_v0 }
 0x24f   : > { %v11452_v14 = vadd.f32 %v4973_v53, %v11184_v38  ;;  %v4967_v43 = vadd.f32 %v4966_v49, %v4805_v17  ;;  %v4823_v18 = vadd.f32 %v8677_v23, %v11372_v10  ;;  %8990 = vmatprep.mubr.f32.mxu0 %v12421_v59  ;;  %9022 = vmatprep.mubr.f32.mxu1 %v12430_v2  ;;  %v12471_v17 = vld [vmem:[#allocation116_spill] sm:$0xff] }
 0x250   : > { %v4816_v63 = vpop.f32.mrf.mxu0  ;;  %v5002_v44 = vpop.f32.mrf.mxu1 }
 0x251   : > { %v11458_v27 = vadd.f32 %v4967_v43, %v11190_v28  ;;  %v4985_v47 = vadd.f32 %v8703_v20, %v4823_v18  ;;  %v4817_v41 = vadd.f32 %v4816_v63, %v11377_v21  ;;  %v12472_v63 = vld [vmem:[#allocation117_spill] sm:$0xff] }
 0x252   : > { %v8680_v26 = vpop.f32.mrf.mxu0  ;;  %8991 = vmatmul.mubr.f32.gmra.mxu0 %v12424_v46  ;;  %v8712_v38 = vpop.f32.mrf.mxu1  ;;  %9023 = vmatmul.mubr.f32.gmra.mxu1 %v12432_v7 }
 0x253   : > { %v11464_v10 = vadd.f32 %v4985_v47, %v11196_v11  ;;  %v4979_v59 = vadd.f32 %v4978_v15, %v4817_v41  ;;  %v4835_v51 = vadd.f32 %v8680_v26, %v11383_v58  ;;  %8993 = vmatprep.mubr.f32.mxu0 %v12426_v62  ;;  %9025 = vmatprep.mubr.f32.mxu1 %v11267_v12 }
 0x254   : > { %v4828_v28 = vpop.f32.mrf.mxu0  ;;  %v5014_v24 = vpop.f32.mrf.mxu1 }
 0x255   : > { %v11470_v21 = vadd.f32 %v4979_v59, %v11202_v8  ;;  %v4997_v5 = vadd.f32 %v8706_v33, %v4835_v51  ;;  %v4829_v46 = vadd.f32 %v4828_v28, %v11389_v55 }
 0x256   : > { %v8683_v52 = vpop.f32.mrf.mxu0  ;;  %8994 = vmatmul.mubr.f32.gmra.mxu0 %v12428_v0  ;;  %v8715_v11 = vpop.f32.mrf.mxu1  ;;  %9026 = vmatmul.mubr.f32.gmra.mxu1 %v11275_v16 }
 0x257   : > { %v11476_v58 = vadd.f32 %v4997_v5, %v11208_v54  ;;  %v4991_v62 = vadd.f32 %v4990_v31, %v4829_v46  ;;  %v4847_v32 = vadd.f32 %v8683_v52, %v11394_v42  ;;  %8996 = vmatprep.mubr.f32.mxu0 %v12430_v2 }
 0x258   : > { %v4840_v50 = vpop.f32.mrf.mxu0  ;;  %v5026_v8 = vpop.f32.mrf.mxu1 }
 0x259   : > { %v11481_v49 = vadd.f32 %v4991_v62, %v11214_v40  ;;  %v5009_v55 = vadd.f32 %v8709_v22, %v4847_v32  ;;  %v4841_v1 = vadd.f32 %v4840_v50, %v11399_v29 }
 0x25a   : > { %v8686_v0 = vpop.f32.mrf.mxu0  ;;  %8997 = vmatmul.mubr.f32.gmra.mxu0 %v12432_v7  ;;  %v8746_v25 = vpop.f32.mrf.mxu1 }
 0x25b   : > { %v11486_v54 = vadd.f32 %v5009_v55, %v12467_v9  ;;  %v5003_v20 = vadd.f32 %v5002_v44, %v4841_v1  ;;  %v4859_v42 = vadd.f32 %v8686_v0, %v11404_v45  ;;  %8999 = vmatprep.mubr.f32.mxu0 %v11267_v12 }
 0x25c   : > { %v4852_v2 = vpop.f32.mrf.mxu0  ;;  %v5358_v35 = vpop.f32.mrf.mxu1 }
 0x25d   : > { %v11491_v40 = vadd.f32 %v5003_v20, %v12468_v57  ;;  %v5021_v56 = vadd.f32 %v8712_v38, %v4859_v42  ;;  %v4853_v29 = vadd.f32 %v4852_v2, %v11409_v60 }
 0x25e   : > { %v8689_v15 = vpop.f32.mrf.mxu0  ;;  %9000 = vmatmul.mubr.f32.gmra.mxu0 %v11275_v16  ;;  %v8749_v7 = vpop.f32.mrf.mxu1 }
 0x25f   : > { %v11496_v6 = vadd.f32 %v5021_v56, %v12469_v13  ;;  %v5015_v48 = vadd.f32 %v5014_v24, %v4853_v29  ;;  %v4871_v45 = vadd.f32 %v8689_v15, %v11414_v30 }
 0x260   : > { %v4864_v33 = vpop.f32.mrf.mxu0  ;;  %v5370_v12 = vpop.f32.mrf.mxu1 }
 0x261   : > { %v11500_v37 = vadd.f32 %v5015_v48, %v12470_v4  ;;  %v5033_v19 = vadd.f32 %v8715_v11, %v4871_v45  ;;  %v4865_v31 = vadd.f32 %v4864_v33, %v11419_v3 }
 0x262   : > { %v8720_v53 = vpop.f32.mrf.mxu0  ;;  %v8752_v60 = vpop.f32.mrf.mxu1 }
 0x263   : > { %v11504_v23 = vadd.f32 %v5033_v19, %v12471_v17  ;;  %v5027_v16 = vadd.f32 %v5026_v8, %v4865_v31  ;;  %v5365_v22 = vadd.f32 %v8746_v25, %v8720_v53 }
 0x264   : > { %v5132_v43 = vpop.f32.mrf.mxu0  ;;  %v5382_v18 = vpop.f32.mrf.mxu1 }
 0x265   : > { %v11507_v44 = vadd.f32 %v5027_v16, %v12472_v63  ;;  %v5359_v30 = vadd.f32 %v5358_v35, %v5132_v43 }
 0x266   : > { %v8723_v47 = vpop.f32.mrf.mxu0  ;;  %v8755_v41 = vpop.f32.mrf.mxu1 }
 0x267   : > { %v5377_v26 = vadd.f32 %v8749_v7, %v8723_v47 }
 0x268   : > { %v5152_v38 = vpop.f32.mrf.mxu0  ;;  %v5394_v59 = vpop.f32.mrf.mxu1 }
 0x269   : > { %v5371_v51 = vadd.f32 %v5370_v12, %v5152_v38 }
 0x26a   : > { %v8726_v3 = vpop.f32.mrf.mxu0  ;;  %v8758_v28 = vpop.f32.mrf.mxu1 }
 0x26b   : > { %v5389_v24 = vadd.f32 %v8752_v60, %v8726_v3 }
 0x26c   : > { %v5172_v5 = vpop.f32.mrf.mxu0  ;;  %v5406_v46 = vpop.f32.mrf.mxu1 }
 0x26d   : > { %v5383_v52 = vadd.f32 %v5382_v18, %v5172_v5 }
 0x26e   : > { %v8729_v11 = vpop.f32.mrf.mxu0  ;;  %v8761_v62 = vpop.f32.mrf.mxu1 }
 0x26f   : > { %v5401_v32 = vadd.f32 %v8755_v41, %v8729_v11 }
 0x270   : > { %v5192_v50 = vpop.f32.mrf.mxu0  ;;  %v5418_v8 = vpop.f32.mrf.mxu1 }
 0x271   : > { %v5395_v55 = vadd.f32 %v5394_v59, %v5192_v50 }
 0x272   : > { %v8732_v1 = vpop.f32.mrf.mxu0  ;;  %v8764_v0 = vpop.f32.mrf.mxu1 }
 0x273   : > { %v5413_v25 = vadd.f32 %v8758_v28, %v8732_v1 }
 0x274   : > { %v5212_v9 = vpop.f32.mrf.mxu0  ;;  %v5430_v20 = vpop.f32.mrf.mxu1 }
 0x275   : > { %v5407_v42 = vadd.f32 %v5406_v46, %v5212_v9 }
 0x276   : > { %v8735_v2 = vpop.f32.mrf.mxu0  ;;  %v8767_v35 = vpop.f32.mrf.mxu1 }
 0x277   : > { %v5425_v57 = vadd.f32 %v8761_v62, %v8735_v2 }
 0x278   : > { %v5232_v56 = vpop.f32.mrf.mxu0  ;;  %v5442_v29 = vpop.f32.mrf.mxu1 }
 0x279   : > { %v5419_v15 = vadd.f32 %v5418_v8, %v5232_v56 }
 0x27a   : > { %v8738_v7 = vpop.f32.mrf.mxu0  ;;  %v8798_v13 = vpop.f32.mrf.mxu1 }
 0x27b   : > { %v5437_v48 = vadd.f32 %v8764_v0, %v8738_v7 }
 0x27c   : > { %v5252_v45 = vpop.f32.mrf.mxu0  ;;  %v5701_v33 = vpop.f32.mrf.mxu1 }
 0x27d   : > { %v5431_v12 = vadd.f32 %v5430_v20, %v5252_v45 }
 0x27e   : > { %v8741_v4 = vpop.f32.mrf.mxu0  ;;  %v8801_v19 = vpop.f32.mrf.mxu1 }
 0x27f   : > { %v5449_v31 = vadd.f32 %v8767_v35, %v8741_v4 }
 0x280   : > { %v5272_v53 = vpop.f32.mrf.mxu0  ;;  %v5717_v60 = vpop.f32.mrf.mxu1 }
 0x281   : > { %v11509_v17 = vadd.f32 %v5442_v29, %v5272_v53 }
 0x282   : > { %v8772_v16 = vpop.f32.mrf.mxu0  ;;  %v8804_v43 = vpop.f32.mrf.mxu1 }
 0x283   : > { %v5530_v18 = vadd.f32 %v8772_v16, %v5365_v22 }
 0x284   : > { %v5522_v63 = vpop.f32.mrf.mxu0  ;;  %v5733_v47 = vpop.f32.mrf.mxu1 }
 0x285   : > { %v5710_v41 = vadd.f32 %v8798_v13, %v5530_v18  ;;  %v5523_v38 = vadd.f32 %v5522_v63, %v5359_v30 }
 0x286   : > { %v8775_v59 = vpop.f32.mrf.mxu0  ;;  %v8807_v3 = vpop.f32.mrf.mxu1 }
 0x287   : > { %v5702_v28 = vadd.f32 %v5701_v33, %v5523_v38  ;;  %v5544_v5 = vadd.f32 %v8775_v59, %v5377_v26 }
 0x288   : > { %v5536_v46 = vpop.f32.mrf.mxu0  ;;  %v5749_v11 = vpop.f32.mrf.mxu1 }
 0x289   : > { %v5726_v62 = vadd.f32 %v8801_v19, %v5544_v5  ;;  %v5537_v50 = vadd.f32 %v5536_v46, %v5371_v51 }
 0x28a   : > { %v8778_v8 = vpop.f32.mrf.mxu0  ;;  %v8810_v1 = vpop.f32.mrf.mxu1 }
 0x28b   : > { %v11511_v0 = vadd.f32 %v5717_v60, %v5537_v50  ;;  %v5558_v9 = vadd.f32 %v8778_v8, %v5389_v24 }
 0x28c   : > { %v5550_v20 = vpop.f32.mrf.mxu0  ;;  %v5765_v2 = vpop.f32.mrf.mxu1 }
 0x28d   : > { %v11513_v22 = vadd.f32 %v8804_v43, %v5558_v9  ;;  %v5551_v35 = vadd.f32 %v5550_v20, %v5383_v52 }
 0x28e   : > { %v8781_v56 = vpop.f32.mrf.mxu0  ;;  %v8813_v30 = vpop.f32.mrf.mxu1 }
 0x28f   : > { %v11515_v29 = vadd.f32 %v5733_v47, %v5551_v35  ;;  %v5572_v7 = vadd.f32 %v8781_v56, %v5401_v32 }
 0x290   : > { %v5564_v26 = vpop.f32.mrf.mxu0  ;;  %v5781_v13 = vpop.f32.mrf.mxu1 }
 0x291   : > { %v11517_v45 = vadd.f32 %v8807_v3, %v5572_v7  ;;  %v5565_v51 = vadd.f32 %v5564_v26, %v5395_v55 }
 0x292   : > { %v8784_v33 = vpop.f32.mrf.mxu0  ;;  %v8816_v4 = vpop.f32.mrf.mxu1 }
 0x293   : > { %v11519_v19 = vadd.f32 %v5749_v11, %v5565_v51  ;;  %v5586_v24 = vadd.f32 %v8784_v33, %v5413_v25 }
 0x294   : > { %v5578_v53 = vpop.f32.mrf.mxu0  ;;  %v5797_v60 = vpop.f32.mrf.mxu1 }
 0x295   : > { %v11521_v16 = vadd.f32 %v8810_v1, %v5586_v24  ;;  %v5579_v52 = vadd.f32 %v5578_v53, %v5407_v42 }
 0x296   : > { %v8787_v43 = vpop.f32.mrf.mxu0  ;;  %v8819_v18 = vpop.f32.mrf.mxu1 }
 0x297   : > { %v11523_v63 = vadd.f32 %v5765_v2, %v5579_v52  ;;  %v5600_v32 = vadd.f32 %v8787_v43, %v5425_v57 }
 0x298   : > { %v5592_v47 = vpop.f32.mrf.mxu0  ;;  %v5813_v38 = vpop.f32.mrf.mxu1 }
 0x299   : > { %v11525_v59 = vadd.f32 %v8813_v30, %v5600_v32  ;;  %v5593_v55 = vadd.f32 %v5592_v47, %v5419_v15 }
 0x29a   : > { %v8790_v3 = vpop.f32.mrf.mxu0  ;;  %v8850_v5 = vpop.f32.mrf.mxu1 }
 0x29b   : > { %v11527_v46 = vadd.f32 %v5781_v13, %v5593_v55  ;;  %v5614_v25 = vadd.f32 %v8790_v3, %v5437_v48 }
 0x29c   : > { %v5606_v11 = vpop.f32.mrf.mxu0  ;;  %v6057_v50 = vpop.f32.mrf.mxu1 }
 0x29d   : > { %v11529_v8 = vadd.f32 %v8816_v4, %v5614_v25  ;;  %v5607_v42 = vadd.f32 %v5606_v11, %v5431_v12 }
 0x29e   : > { %v8793_v1 = vpop.f32.mrf.mxu0  ;;  %v8853_v9 = vpop.f32.mrf.mxu1 }
 0x29f   : > { %v11531_v20 = vadd.f32 %v5797_v60, %v5607_v42  ;;  %v5628_v57 = vadd.f32 %v8793_v1, %v5449_v31 }
 0x2a0   : > { %v5620_v2 = vpop.f32.mrf.mxu0  ;;  %v6069_v35 = vpop.f32.mrf.mxu1 }
 0x2a1   : > { %v11533_v56 = vadd.f32 %v8819_v18, %v5628_v57  ;;  %v5621_v15 = vadd.f32 %v5620_v2, %v11509_v17 }
 0x2a2   : > { %v8824_v30 = vpop.f32.mrf.mxu0  ;;  %v8856_v7 = vpop.f32.mrf.mxu1 }
 0x2a3   : > { %v11536_v26 = vadd.f32 %v5813_v38, %v5621_v15  ;;  %v5902_v48 = vadd.f32 %v8824_v30, %v5710_v41 }
 0x2a4   : > { %v5895_v13 = vpop.f32.mrf.mxu0  ;;  %v6081_v51 = vpop.f32.mrf.mxu1 }
 0x2a5   : > { %v6064_v33 = vadd.f32 %v8850_v5, %v5902_v48  ;;  %v5896_v12 = vadd.f32 %v5895_v13, %v5702_v28 }
 0x2a6   : > { %v8827_v4 = vpop.f32.mrf.mxu0  ;;  %v8859_v24 = vpop.f32.mrf.mxu1 }
 0x2a7   : > { %v11539_v53 = vadd.f32 %v6064_v33, %v11428_v39  ;;  %v6058_v31 = vadd.f32 %v6057_v50, %v5896_v12  ;;  %v5914_v60 = vadd.f32 %v8827_v4, %v5726_v62 }
 0x2a8   : > { %v5907_v52 = vpop.f32.mrf.mxu0  ;;  %v6093_v43 = vpop.f32.mrf.mxu1 }
 0x2a9   : > { %v11542_v17 = vadd.f32 %v6058_v31, %v11434_v36  ;;  %v6076_v18 = vadd.f32 %v8853_v9, %v5914_v60  ;;  %v5908_v32 = vadd.f32 %v5907_v52, %v11511_v0 }
 0x2aa   : > { %v8830_v41 = vpop.f32.mrf.mxu0  ;;  %v8862_v47 = vpop.f32.mrf.mxu1 }
 0x2ab   : > { %v11546_v38 = vadd.f32 %v6076_v18, %v11440_v61  ;;  %v6070_v28 = vadd.f32 %v6069_v35, %v5908_v32  ;;  %v5926_v55 = vadd.f32 %v8830_v41, %v11513_v22 }
 0x2ac   : > { %v5919_v39 = vpop.f32.mrf.mxu0  ;;  %v6105_v3 = vpop.f32.mrf.mxu1 }
 0x2ad   : > { %v11550_v62 = vadd.f32 %v6070_v28, %v11446_v34  ;;  %v6088_v5 = vadd.f32 %v8856_v7, %v5926_v55  ;;  %v5920_v36 = vadd.f32 %v5919_v39, %v11515_v29 }
 0x2ae   : > { %v8833_v25 = vpop.f32.mrf.mxu0  ;;  %v8865_v11 = vpop.f32.mrf.mxu1 }
 0x2af   : > { %v11554_v0 = vadd.f32 %v6088_v5, %v11452_v14  ;;  %v6082_v50 = vadd.f32 %v6081_v51, %v5920_v36  ;;  %v5938_v61 = vadd.f32 %v8833_v25, %v11517_v45 }
 0x2b0   : > { %v5931_v42 = vpop.f32.mrf.mxu0  ;;  %v6117_v1 = vpop.f32.mrf.mxu1 }
 0x2b1   : > { %v11558_v22 = vadd.f32 %v6082_v50, %v11458_v27  ;;  %v6100_v9 = vadd.f32 %v8859_v24, %v5938_v61  ;;  %v5932_v34 = vadd.f32 %v5931_v42, %v11519_v19 }
 0x2b2   : > { %v8836_v57 = vpop.f32.mrf.mxu0  ;;  %v8868_v2 = vpop.f32.mrf.mxu1 }
 0x2b3   : > { %v11562_v29 = vadd.f32 %v6100_v9, %v11464_v10  ;;  %v6094_v35 = vadd.f32 %v6093_v43, %v5932_v34  ;;  %v5950_v14 = vadd.f32 %v8836_v57, %v11521_v16 }
 0x2b4   : > { %v5943_v15 = vpop.f32.mrf.mxu0  ;;  %v6129_v30 = vpop.f32.mrf.mxu1 }
 0x2b5   : > { %12473 = vst [vmem:[#allocation118_spill] sm:$0xff] %v11562_v29  ;;  %v11566_v45 = vadd.f32 %v6094_v35, %v11470_v21  ;;  %v6112_v7 = vadd.f32 %v8862_v47, %v5950_v14  ;;  %v5944_v27 = vadd.f32 %v5943_v15, %v11523_v63 }
 0x2b6   : > { %v8839_v48 = vpop.f32.mrf.mxu0  ;;  %v8871_v13 = vpop.f32.mrf.mxu1 }
 0x2b7   : > { %12474 = vst [vmem:[#allocation119_spill] sm:$0xff] %v11566_v45  ;;  %v11570_v19 = vadd.f32 %v6112_v7, %v11476_v58  ;;  %v6106_v51 = vadd.f32 %v6105_v3, %v5944_v27  ;;  %v5962_v10 = vadd.f32 %v8839_v48, %v11525_v59 }
 0x2b8   : > { %v5955_v33 = vpop.f32.mrf.mxu0  ;;  %v6141_v12 = vpop.f32.mrf.mxu1 }
 0x2b9   : > { %12475 = vst [vmem:[#allocation2_spill] sm:$0xff] %v11570_v19  ;;  %v11574_v16 = vadd.f32 %v6106_v51, %v11481_v49  ;;  %v6124_v4 = vadd.f32 %v8865_v11, %v5962_v10  ;;  %v5956_v21 = vadd.f32 %v5955_v33, %v11527_v46 }
 0x2ba   : > { %v8842_v24 = vpop.f32.mrf.mxu0  ;;  %v11577_v31 = vpop.f32.mrf.mxu1 }
 0x2bb   : > { %12476 = vst [vmem:[#allocation134_spill] sm:$0xff] %v11574_v16  ;;  %v11580_v63 = vadd.f32 %v6124_v4, %v11486_v54  ;;  %v6118_v60 = vadd.f32 %v6117_v1, %v5956_v21  ;;  %v5974_v58 = vadd.f32 %v8842_v24, %v11529_v8 }
 0x2bc   : > { %v5967_v52 = vpop.f32.mrf.mxu0  ;;  %v11583_v43 = vpop.f32.mrf.mxu1 }
 0x2bd   : > { %12477 = vst [vmem:[#allocation71_spill] sm:$0xff] %v11580_v63  ;;  %v11586_v59 = vadd.f32 %v6118_v60, %v11491_v40  ;;  %v6136_v49 = vadd.f32 %v8868_v2, %v5974_v58  ;;  %v5968_v18 = vadd.f32 %v5967_v52, %v11531_v20 }
 0x2be   : > { %v8845_v32 = vpop.f32.mrf.mxu0  ;;  %v11589_v46 = vpop.f32.mrf.mxu1 }
 0x2bf   : > { %12478 = vst [vmem:[#allocation72_spill] sm:$0xff] %v11586_v59  ;;  %v11592_v41 = vadd.f32 %v6136_v49, %v11496_v6  ;;  %v6130_v54 = vadd.f32 %v6129_v30, %v5968_v18  ;;  %v5986_v47 = vadd.f32 %v8845_v32, %v11533_v56 }
 0x2c0   : > { %v5979_v28 = vpop.f32.mrf.mxu0  ;;  %v11595_v8 = vpop.f32.mrf.mxu1 }
 0x2c1   : > { %12479 = vst [vmem:[#allocation4_spill] sm:$0xff] %v11592_v41  ;;  %v11598_v55 = vadd.f32 %v6130_v54, %v11500_v37  ;;  %v6148_v40 = vadd.f32 %v8871_v13, %v5986_v47  ;;  %v5980_v39 = vadd.f32 %v5979_v28, %v11536_v26 }
 0x2c2   : > { %v8876_v3 = vpop.f32.mrf.mxu0  ;;  %v11601_v20 = vpop.f32.mrf.mxu1 }
 0x2c3   : > { %12480 = vst [vmem:[#allocation73_spill] sm:$0xff] %v11598_v55  ;;  %v11604_v5 = vadd.f32 %v6148_v40, %v11504_v23  ;;  %v6142_v6 = vadd.f32 %v6141_v12, %v5980_v39 }
 0x2c4   : > { %v6254_v36 = vpop.f32.mrf.mxu0  ;;  %v11606_v25 = vpop.f32.mrf.mxu1 }
 0x2c5   : > { %12481 = vst [vmem:[#allocation85_spill] sm:$0xff] %v11604_v5  ;;  %v11609_v56 = vadd.f32 %v6142_v6, %v11507_v44 }
 0x2c6   : > { %v8879_v11 = vpop.f32.mrf.mxu0  ;;  %v11611_v50 = vpop.f32.mrf.mxu1 }
 0x2c7   : > { %12482 = vst [vmem:[#allocation74_spill] sm:$0xff] %v11609_v56 }
 0x2c8   : > { %v11613_v37 = vpop.f32.mrf.mxu0  ;;  %v11615_v61 = vpop.f32.mrf.mxu1 }
 0x2ca   : > { %v11617_v26 = vpop.f32.mrf.mxu0  ;;  %v11619_v42 = vpop.f32.mrf.mxu1 }
 0x2cc   : > { %v11621_v23 = vpop.f32.mrf.mxu0  ;;  %v11623_v1 = vpop.f32.mrf.mxu1 }
 0x2ce   : > { %v11625_v9 = vpop.f32.mrf.mxu0  ;;  %v11627_v34 = vpop.f32.mrf.mxu1 }
 0x2d0   : > { %v11629_v44 = vpop.f32.mrf.mxu0  ;;  %v11631_v57 = vpop.f32.mrf.mxu1 }
 0x2d2   : > { %v11633_v2 = vpop.f32.mrf.mxu0  ;;  %v11635_v35 = vpop.f32.mrf.mxu1 }
 0x2d3   : > { %12483 = vst [vmem:[#allocation23_spill] sm:$0xff] %v11635_v35 }
 0x2d4   : > { %v11637_v14 = vpop.f32.mrf.mxu0  ;;  %v11639_v15 = vpop.f32.mrf.mxu1 }
 0x2d5   : > { %12484 = vst [vmem:[#allocation78_spill] sm:$0xff] %v11639_v15 }
 0x2d6   : > { %v11641_v30 = vpop.f32.mrf.mxu0  ;;  %v11643_v7 = vpop.f32.mrf.mxu1 }
 0x2d7   : > { %12485 = vst [vmem:[#allocation90_spill] sm:$0xff] %v11643_v7 }
 0x2d8   : > { %v11645_v27 = vpop.f32.mrf.mxu0  ;;  %v11647_v48 = vpop.f32.mrf.mxu1 }
 0x2d9   : > { %12486 = vst [vmem:[#allocation80_spill] sm:$0xff] %v11647_v48 }
 0x2da   : > { %v11649_v13 = vpop.f32.mrf.mxu0  ;;  %v8954_v51 = vpop.f32.mrf.mxu1 }
 0x2db   : > { %12487 = vst [vmem:[#allocation135_spill] sm:$0xff] %v11649_v13 }
 0x2dc   : > { %v11651_v10 = vpop.f32.mrf.mxu0  ;;  %v6823_v33 = vpop.f32.mrf.mxu1 }
 0x2dd   : > { %12488 = vst [vmem:[#allocation33_spill] sm:$0xff] %v11651_v10  ;;  %v6481_v10 = vadd.f32 %v11583_v43, %v6254_v36 }
 0x2de   : > { %v11653_v12 = vpop.f32.mrf.mxu0  ;;  %v8957_v4 = vpop.f32.mrf.mxu1 }
 0x2df   : > { %12489 = vst [vmem:[#allocation84_spill] sm:$0xff] %v11653_v12 }
 0x2e0   : > { %v11655_v21 = vpop.f32.mrf.mxu0  ;;  %v6839_v24 = vpop.f32.mrf.mxu1 }
 0x2e1   : > { %12490 = vst [vmem:[#allocation34_spill] sm:$0xff] %v11655_v21 }
 0x2e2   : > { %v8928_v60 = vpop.f32.mrf.mxu0  ;;  %v11657_v58 = vpop.f32.mrf.mxu1 }
 0x2e4   : > { %v6644_v52 = vpop.f32.mrf.mxu0  ;;  %v11659_v49 = vpop.f32.mrf.mxu1 }
 0x2e5   : > { %v6645_v35 = vadd.f32 %v6644_v52, %v6481_v10 }
 0x2e6   : > { %v8931_v18 = vpop.f32.mrf.mxu0  ;;  %v11661_v32 = vpop.f32.mrf.mxu1 }
 0x2e7   : > { %v6824_v36 = vadd.f32 %v6823_v33, %v6645_v35 }
 0x2e8   : > { %v6658_v54 = vpop.f32.mrf.mxu0  ;;  %v11663_v47 = vpop.f32.mrf.mxu1 }
 0x2ea   : > { %v8934_v28 = vpop.f32.mrf.mxu0  ;;  %v11665_v40 = vpop.f32.mrf.mxu1 }
 0x2ec   : > { %v6672_v39 = vpop.f32.mrf.mxu0  ;;  %v11667_v6 = vpop.f32.mrf.mxu1 }
 0x2ed   : > { %12491 = vst [vmem:[#allocation86_spill] sm:$0xff] %v11667_v6 }
 0x2ee   : > { %v8937_v56 = vpop.f32.mrf.mxu0  ;;  %v11669_v5 = vpop.f32.mrf.mxu1 }
 0x2ef   : > { %12492 = vst [vmem:[#allocation47_spill] sm:$0xff] %v11669_v5 }
 0x2f0   : > { %v6686_v55 = vpop.f32.mrf.mxu0  ;;  %v11671_v41 = vpop.f32.mrf.mxu1 }
 0x2f1   : > { %12493 = vst [vmem:[#allocation89_spill] sm:$0xff] %v11671_v41  ;;  %v6487_v41 = vadd.f32 %v11577_v31, %v8876_v3 }
 0x2f2   : > { %v11673_v59 = vpop.f32.mrf.mxu0  ;;  %v11675_v63 = vpop.f32.mrf.mxu1 }
 0x2f3   : > { %12494 = vst [vmem:[#allocation101_spill] sm:$0xff] %v11675_v63  ;;  %v6652_v29 = vadd.f32 %v8928_v60, %v6487_v41 }
 0x2f4   : > { %v11677_v16 = vpop.f32.mrf.mxu0  ;;  %v11679_v48 = vpop.f32.mrf.mxu1 }
 0x2f5   : > { %12495 = vst [vmem:[#allocation92_spill] sm:$0xff] %v11679_v48  ;;  %v6832_v31 = vadd.f32 %v8954_v51, %v6652_v29  ;;  %v6523_v29 = vadd.f32 %v11611_v50, %v11625_v9 }
 0x2f6   : > { %v11681_v21 = vpop.f32.mrf.mxu0  ;;  %v11683_v19 = vpop.f32.mrf.mxu1 }
 0x2f7   : > { %12496 = vst [vmem:[#allocation104_spill] sm:$0xff] %v11683_v19  ;;  %v6499_v19 = vadd.f32 %v11589_v46, %v8879_v11  ;;  %v6505_v46 = vadd.f32 %v11606_v25, %v11621_v23 }
 0x2f8   : > { %v11685_v7 = vpop.f32.mrf.mxu0  ;;  %v11687_v12 = vpop.f32.mrf.mxu1 }
 0x2f9   : > { %12497 = vst [vmem:[#allocation94_spill] sm:$0xff] %v11685_v7  ;;  %12498 = vst [vmem:[#allocation107_spill] sm:$0xff] %v11687_v12  ;;  %v6666_v3 = vadd.f32 %v8931_v18, %v6499_v19  ;;  %v6673_v19 = vadd.f32 %v6672_v39, %v6505_v46  ;;  %v12504_v46 = vld [vmem:[#allocation23_spill] sm:$0xff] }
 0x2fa   : > { %v11689_v45 = vpop.f32.mrf.mxu0  ;;  %v9006_v5 = vpop.f32.mrf.mxu1 }
 0x2fb   : > { %12499 = vst [vmem:[#allocation97_spill] sm:$0xff] %v11689_v45  ;;  %v6493_v45 = vadd.f32 %v11595_v8, %v11613_v37 }
 0x2fc   : > { %v11692_v15 = vpop.f32.mrf.mxu0  ;;  %v7179_v63 = vpop.f32.mrf.mxu1 }
 0x2fd   : > { %12500 = vst [vmem:[#allocation109_spill] sm:$0xff] %v11692_v15  ;;  %v6511_v15 = vadd.f32 %v11601_v20, %v11617_v26  ;;  %v6659_v60 = vadd.f32 %v6658_v54, %v6493_v45  ;;  %v11712_v20 = vld [vmem:[%s11834_s4] ss:$0 sm:$0xff] }
 0x2fe   : > { %v11695_v48 = vpop.f32.mrf.mxu0  ;;  %v9009_v6 = vpop.f32.mrf.mxu1 }
 0x2ff   : > { %12501 = vst [vmem:[#allocation100_spill] sm:$0xff] %v11695_v48  ;;  %v6680_v11 = vadd.f32 %v8934_v28, %v6511_v15  ;;  %v6840_v26 = vadd.f32 %v6839_v24, %v6659_v60  ;;  %v12503_v60 = vld [vmem:[#allocation135_spill] sm:$0xff] }
 0x300   : > { %v11698_v7 = vpop.f32.mrf.mxu0  ;;  %v7191_v12 = vpop.f32.mrf.mxu1 }
 0x301   : > { %12502 = vst [vmem:[#allocation111_spill] sm:$0xff] %v11698_v7  ;;  %v6848_v7 = vadd.f32 %v8957_v4, %v6666_v3  ;;  %v6864_v15 = vadd.f32 %v11657_v58, %v6680_v11  ;;  %v6559_v11 = vadd.f32 %v12504_v46, %v12503_v60 }
 0x302   : > { %v8980_v43 = vpop.f32.mrf.mxu0  ;;  %v9012_v41 = vpop.f32.mrf.mxu1 }
 0x303   : > { %v7024_v48 = vadd.f32 %v8980_v43, %v6832_v31  ;;  %v6541_v43 = vadd.f32 %v11631_v57, %v11645_v27  ;;  %v12506_v57 = vld [vmem:[#allocation94_spill] sm:$0xff] }
 0x304   : > { %v7017_v10 = vpop.f32.mrf.mxu0  ;;  %v7203_v52 = vpop.f32.mrf.mxu1 }
 0x305   : > { %v7186_v13 = vadd.f32 %v9006_v5, %v7024_v48  ;;  %v7018_v8 = vadd.f32 %v7017_v10, %v6824_v36  ;;  %v6517_v5 = vadd.f32 %v11615_v61, %v11629_v44  ;;  %v6694_v48 = vadd.f32 %v8937_v56, %v6523_v29  ;;  %v12505_v10 = vld [vmem:[#allocation86_spill] sm:$0xff] }
 0x306   : > { %v8983_v45 = vpop.f32.mrf.mxu0  ;;  %v9015_v37 = vpop.f32.mrf.mxu1  ;;  %v6535_v61 = vadd.f32 %v11619_v42, %v11633_v2  ;;  %v6856_v56 = vadd.f32 %v11659_v49, %v6673_v19  ;;  %v6715_v27 = vadd.f32 %v12506_v57, %v6541_v43  ;;  %v12507_v29 = vld [vmem:[#allocation118_spill] sm:$0xff] }
 0x307   : > { %v7274_v25 = vadd.f32 %v7186_v13, %v11539_v53  ;;  %v7180_v23 = vadd.f32 %v7179_v63, %v7018_v8  ;;  %v7036_v35 = vadd.f32 %v8983_v45, %v6848_v7  ;;  %v6687_v44 = vadd.f32 %v6686_v55, %v6517_v5  ;;  %v12511_v5 = vld [vmem:[#allocation97_spill] sm:$0xff] }
 0x308   : > { %v7029_v50 = vpop.f32.mrf.mxu0  ;;  %v7215_v9 = vpop.f32.mrf.mxu1  ;;  %v6880_v54 = vadd.f32 %v11661_v32, %v6694_v48  ;;  %v6708_v42 = vadd.f32 %v11673_v59, %v6535_v61  ;;  %v12514_v61 = vld [vmem:[#allocation90_spill] sm:$0xff] }
 0x309   : > { %v7297_v51 = vadd.f32 %v11712_v20, %v7274_v25  ;;  %v7273_v53 = vadd.f32 %v7180_v23, %v11542_v17  ;;  %v7198_v63 = vadd.f32 %v9009_v6, %v7036_v35  ;;  %v7030_v7 = vadd.f32 %v7029_v50, %v6840_v26  ;;  %v12509_v26 = vld [vmem:[#allocation78_spill] sm:$0xff]  ;;  %v12510_v23 = vld [vmem:[#allocation47_spill] sm:$0xff] }
 0x30a   : > { %v8986_v13 = vpop.f32.mrf.mxu0  ;;  %v9018_v33 = vpop.f32.mrf.mxu1  ;;  %v6529_v17 = vadd.f32 %v11623_v1, %v11637_v14  ;;  %v6872_v1 = vadd.f32 %v11663_v47, %v6687_v44  ;;  %v12515_v44 = vld [vmem:[#allocation89_spill] sm:$0xff] }
 0x30b   : > { %7313 = vst.msk [vmem:[%s11721_s25 + $0x8] sm:$0xff] %vm419_vm2, %v7297_v51  ;;  %v7296_v4 = vadd.f32 %v11712_v20, %v7273_v53  ;;  %v7276_v24 = vadd.f32 %v7198_v63, %v11546_v38  ;;  %v7192_v58 = vadd.f32 %v7191_v12, %v7030_v7  ;;  %v7048_v18 = vadd.f32 %v8986_v13, %v6864_v15  ;;  %v12512_v51 = vld [vmem:[#allocation119_spill] sm:$0xff] }
 0x30c   : > { %v7041_v2 = vpop.f32.mrf.mxu0  ;;  %v7227_v55 = vpop.f32.mrf.mxu1  ;;  %v6547_v12 = vadd.f32 %v11627_v34, %v11641_v30  ;;  %v6701_v14 = vadd.f32 %v11677_v16, %v6529_v17  ;;  %v6896_v34 = vadd.f32 %v11665_v40, %v6708_v42  ;;  %v6736_v15 = vadd.f32 %v12511_v5, %v6559_v11 }
 0x30d   : > { %7312 = vst.msk [vmem:[%s11721_s25] sm:$0xff] %vm419_vm2, %v7296_v4  ;;  %v7299_v49 = vadd.f32 %v11712_v20, %v7276_v24  ;;  %v7275_v28 = vadd.f32 %v7192_v58, %v11550_v62  ;;  %v7210_v39 = vadd.f32 %v9012_v41, %v7048_v18  ;;  %v7042_v38 = vadd.f32 %v7041_v2, %v6856_v56  ;;  %v12516_v4 = vld [vmem:[#allocation109_spill] sm:$0xff] }
 0x30e   : > { %v8989_v32 = vpop.f32.mrf.mxu0  ;;  %v9021_v59 = vpop.f32.mrf.mxu1  ;;  %v6722_v30 = vadd.f32 %v11681_v21, %v6547_v12  ;;  %v6904_v13 = vadd.f32 %v12515_v44, %v6715_v27  ;;  %v12527_v27 = vld [vmem:[#allocation72_spill] sm:$0xff] }
 0x30f   : > { %7315 = vst.msk [vmem:[%s11721_s25 + $0x18] sm:$0xff] %vm419_vm2, %v7299_v49  ;;  %v7298_v6 = vadd.f32 %v11712_v20, %v7275_v28  ;;  %v7278_v31 = vadd.f32 %v7210_v39, %v11554_v0  ;;  %v7204_v3 = vadd.f32 %v7203_v52, %v7042_v38  ;;  %v7060_v62 = vadd.f32 %v8989_v32, %v6880_v54  ;;  %v12517_v54 = vld [vmem:[#allocation2_spill] sm:$0xff]  ;;  %v12519_v28 = vld [vmem:[#allocation80_spill] sm:$0xff]  ;;  %v12520_v38 = vld [vmem:[#allocation101_spill] sm:$0xff] }
 0x310   : > { %v7053_v47 = vpop.f32.mrf.mxu0  ;;  %v6888_v52 = vadd.f32 %v12505_v10, %v6701_v14  ;;  %v7239_v8 = vpop.f32.mrf.mxu1  ;;  %v6912_v35 = vadd.f32 %v12510_v23, %v6722_v30  ;;  %v12518_v49 = vld [vmem:[#allocation34_spill] sm:$0xff]  ;;  %v6928_v12 = vadd.f32 %v12520_v38, %v6736_v15  ;;  %v12524_v30 = vld [vmem:[#allocation111_spill] sm:$0xff]  ;;  %v12526_v10 = vld [vmem:[#allocation104_spill] sm:$0xff] }
 0x311   : > { %7314 = vst.msk [vmem:[%s11721_s25 + $0x10] sm:$0xff] %vm419_vm2, %v7298_v6  ;;  %v7301_v16 = vadd.f32 %v11712_v20, %v7278_v31  ;;  %v7277_v41 = vadd.f32 %v7204_v3, %v11558_v22  ;;  %v7222_v36 = vadd.f32 %v9015_v37, %v7060_v62  ;;  %v7054_v0 = vadd.f32 %v7053_v47, %v6872_v1  ;;  %v12508_v37 = vld [vmem:[#allocation33_spill] sm:$0xff]  ;;  %v12521_v1 = vld [vmem:[#allocation100_spill] sm:$0xff]  ;;  %v12522_v31 = vld [vmem:[#allocation134_spill] sm:$0xff] }
 0x312   : > { %v8992_v40 = vpop.f32.mrf.mxu0  ;;  %v6553_v25 = vadd.f32 %v12509_v26, %v12508_v37  ;;  %v9024_v18 = vpop.f32.mrf.mxu1  ;;  %v6565_v39 = vadd.f32 %v12519_v28, %v12518_v49  ;;  %v12529_v26 = vld [vmem:[#allocation4_spill] sm:$0xff] }
 0x313   : > { %7317 = vst.msk [vmem:[%s11721_s25 + $0x28] sm:$0xff] %vm419_vm2, %v7301_v16  ;;  %v7300_v21 = vadd.f32 %v11712_v20, %v7277_v41  ;;  %v7280_v19 = vadd.f32 %v7222_v36, %v12507_v29  ;;  %v7216_v45 = vadd.f32 %v7215_v9, %v7054_v0  ;;  %v7072_v22 = vadd.f32 %v8992_v40, %v6896_v34  ;;  %v12513_v9 = vld [vmem:[#allocation84_spill] sm:$0xff]  ;;  %v12525_v0 = vld [vmem:[#allocation71_spill] sm:$0xff] }
 0x314   : > { %v7065_v48 = vpop.f32.mrf.mxu0  ;;  %v6571_v56 = vadd.f32 %v12514_v61, %v12513_v9  ;;  %v6729_v24 = vadd.f32 %v12516_v4, %v6553_v25  ;;  %v12523_v34 = vld [vmem:[#allocation92_spill] sm:$0xff]  ;;  %v6743_v47 = vadd.f32 %v12524_v30, %v6565_v39  ;;  %v7251_v41 = vpop.f32.mrf.mxu1  ;;  %v12531_v9 = vld [vmem:[#allocation85_spill] sm:$0xff] }
 0x315   : > { %7316 = vst.msk [vmem:[%s11721_s25 + $0x20] sm:$0xff] %vm419_vm2, %v7300_v21  ;;  %v7303_v50 = vadd.f32 %v11712_v20, %v7280_v19  ;;  %v7279_v53 = vadd.f32 %v7216_v45, %v12512_v51  ;;  %v7234_v63 = vadd.f32 %v9018_v33, %v7072_v22  ;;  %v7066_v7 = vadd.f32 %v7065_v48, %v6888_v52  ;;  %v12528_v19 = vld [vmem:[#allocation107_spill] sm:$0xff]  ;;  %v12530_v48 = vld [vmem:[#allocation73_spill] sm:$0xff] }
 0x316   : > { %v8995_v58 = vpop.f32.mrf.mxu0  ;;  %v6750_v14 = vadd.f32 %v12521_v1, %v6571_v56  ;;  %v6936_v45 = vadd.f32 %v12528_v19, %v6743_v47  ;;  %v9027_v37 = vpop.f32.mrf.mxu1 }
 0x317   : > { %7319 = vst.msk [vmem:[%s11721_s25 + $0x38] sm:$0xff] %vm419_vm2, %v7303_v50  ;;  %v7302_v17 = vadd.f32 %v11712_v20, %v7279_v53  ;;  %v7282_v42 = vadd.f32 %v7234_v63, %v12517_v54  ;;  %v7228_v2 = vadd.f32 %v7227_v55, %v7066_v7  ;;  %v7084_v33 = vadd.f32 %v8995_v58, %v6912_v35 }
 0x318   : > { %v7077_v32 = vpop.f32.mrf.mxu0  ;;  %v6920_v55 = vadd.f32 %v12523_v34, %v6729_v24  ;;  %v6944_v52 = vadd.f32 %v12526_v10, %v6750_v14  ;;  %v7263_v63 = vpop.f32.mrf.mxu1 }
 0x319   : > { %7318 = vst.msk [vmem:[%s11721_s25 + $0x30] sm:$0xff] %vm419_vm2, %v7302_v17  ;;  %v7305_v6 = vadd.f32 %v11712_v20, %v7282_v42  ;;  %v7281_v3 = vadd.f32 %v7228_v2, %v12522_v31  ;;  %v7246_v62 = vadd.f32 %v9021_v59, %v7084_v33  ;;  %v7078_v43 = vadd.f32 %v7077_v32, %v6904_v13  ;;  %v12532_v13 = vld [vmem:[#allocation74_spill] sm:$0xff] }
 0x31a   : > { %v8998_v16 = vpop.f32.mrf.mxu0 }
 0x31b   : > { %7321 = vst.msk [vmem:[%s11721_s25 + $0x48] sm:$0xff] %vm419_vm2, %v7305_v6  ;;  %v7304_v36 = vadd.f32 %v11712_v20, %v7281_v3  ;;  %v7284_v60 = vadd.f32 %v7246_v62, %v12525_v0  ;;  %v7240_v46 = vadd.f32 %v7239_v8, %v7078_v43  ;;  %v7096_v11 = vadd.f32 %v8998_v16, %v6928_v12 }
 0x31c   : > { %v7089_v59 = vpop.f32.mrf.mxu0 }
 0x31d   : > { %7320 = vst.msk [vmem:[%s11721_s25 + $0x40] sm:$0xff] %vm419_vm2, %v7304_v36  ;;  %v7307_v57 = vadd.f32 %v11712_v20, %v7284_v60  ;;  %v7283_v40 = vadd.f32 %v7240_v46, %v12527_v27  ;;  %v7258_v21 = vadd.f32 %v9024_v18, %v7096_v11  ;;  %v7090_v29 = vadd.f32 %v7089_v59, %v6920_v55 }
 0x31e   : > { %v9001_v22 = vpop.f32.mrf.mxu0 }
 0x31f   : > { %7323 = vst.msk [vmem:[%s11721_s25 + $0x58] sm:$0xff] %vm419_vm2, %v7307_v57  ;;  %v7306_v8 = vadd.f32 %v11712_v20, %v7283_v40  ;;  %v7286_v25 = vadd.f32 %v7258_v21, %v12529_v26  ;;  %v7252_v23 = vadd.f32 %v7251_v41, %v7090_v29  ;;  %v7108_v35 = vadd.f32 %v9001_v22, %v6944_v52 }
 0x320   : > { %v7101_v5 = vpop.f32.mrf.mxu0 }
 0x321   : > { %7322 = vst.msk [vmem:[%s11721_s25 + $0x50] sm:$0xff] %vm419_vm2, %v7306_v8  ;;  %v7309_v15 = vadd.f32 %v11712_v20, %v7286_v25  ;;  %v7285_v50 = vadd.f32 %v7252_v23, %v12530_v48  ;;  %v7270_v51 = vadd.f32 %v9027_v37, %v7108_v35  ;;  %v7102_v53 = vadd.f32 %v7101_v5, %v6936_v45 }
 0x323   : > { %7325 = vst.msk [vmem:[%s11721_s25 + $0x68] sm:$0xff] %vm419_vm2, %v7309_v15  ;;  %v7308_v7 = vadd.f32 %v11712_v20, %v7285_v50  ;;  %v7288_v61 = vadd.f32 %v7270_v51, %v12531_v9  ;;  %v7264_v56 = vadd.f32 %v7263_v63, %v7102_v53 }
 0x325   : > { %7324 = vst.msk [vmem:[%s11721_s25 + $0x60] sm:$0xff] %vm419_vm2, %v7308_v7  ;;  %v7311_v44 = vadd.f32 %v11712_v20, %v7288_v61  ;;  %v7287_v4 = vadd.f32 %v7264_v56, %v12532_v13 }
 0x327   : > { %7327 = vst.msk [vmem:[%s11721_s25 + $0x78] sm:$0xff] %vm419_vm2, %v7311_v44  ;;  %v7310_v24 = vadd.f32 %v11712_v20, %v7287_v4 }
 0x329   : > { %7326 = vst.msk [vmem:[%s11721_s25 + $0x70] sm:$0xff] %vm419_vm2, %v7310_v24 }
 0x32a PF: > { %s15_s20 = sadd.s32 1, %s9077_s20   ;;  %s12533_s18 = smov %s9073_s19 }
 0x32b   : > { %p12_p5 = scmp.ge.s32.totalorder %s15_s20, 4   ;;  %s12534_s19 = smov %s12536_s21 }
 0x32d   :  { %14 = sbr.rel (!%p12_p5) target bundleno = 2 (0x2), region = 78 }

</bundles_post_ra>
